<compile_context>
chip_gen: v6e
topology: v6e:2x2x1
jax: 0.10.0
libtpu: 0.0.40
codegen_flags: <defaults>
</compile_context>

<pallas_src>
import functools

import jax
import jax.numpy as jnp
from jax.experimental import pallas as pl
from jax.experimental.pallas import tpu as pltpu


_VMEM_LIMIT_BYTES = 48 * 1024 * 1024   # < v7x 64 MiB phys; > v5e/v6e scoped defaults


def _round_up(n, m):
    return -(-n // m) * m


# ----------------------------------------------------------------------------
# Pallas kernels
# ----------------------------------------------------------------------------
def _mlp_chain(h, param_refs, nlayers):
    # (1x1 conv with BN scale folded into the weight) -> bias -> ReLU, repeated.
    # Matmuls are bf16 on the MXU with f32 accumulation; bias/ReLU in f32.
    for l in range(nlayers):
        w = param_refs[2 * l][...]          # (Cin_l, Cout_l)  bf16
        b = param_refs[2 * l + 1][...]      # (1, Cout_l)      f32
        h = jnp.dot(h, w, preferred_element_type=jnp.float32)
        h = jnp.maximum(h + b, 0.0)
        if l < nlayers - 1:
            h = h.astype(jnp.bfloat16)
    return h                                # f32


def _make_sa_kernel(nlayers, nsample, tile_rows):
    """Fused shared-MLP over nsample*tile_rows rows + max-pool over nsample."""
    def kernel(*refs):
        x_ref = refs[0]                          # (nsample*tile_rows, Cin) bf16
        param_refs = refs[1:1 + 2 * nlayers]
        o_ref = refs[1 + 2 * nlayers]            # (tile_rows, Cout_p) f32

        h = _mlp_chain(x_ref[...], param_refs, nlayers)   # (ns*tr, Cout_p) f32
        # Rows are sample-major inside the tile: max-pool over the samples with
        # static sublane-aligned slices (pure VPU work, no layout ops).
        m = h[0:tile_rows]
        for s in range(1, nsample):
            m = jnp.maximum(m, h[s * tile_rows:(s + 1) * tile_rows])
        o_ref[...] = m
    return kernel


def _make_fp_kernel(nlayers):
    """Point-wise conv1d MLP (no pooling)."""
    def kernel(*refs):
        x_ref = refs[0]                          # (tile_rows, Cin) bf16
        param_refs = refs[1:1 + 2 * nlayers]
        o_ref = refs[1 + 2 * nlayers]            # (tile_rows, Cout_p) f32
        o_ref[...] = _mlp_chain(x_ref[...], param_refs, nlayers)
    return kernel


def _prepare_params(params, cin_pad, cout_pad):
    """Fold BN scale into the conv weight, cast weights to bf16, pad the first
    layer's input channels to `cin_pad` and the last layer's output channels to
    `cout_pad` with zeros (mathematically inert)."""
    nlayers = len(params)
    prepped = []
    for l, (w, s, b) in enumerate(params):
        wf = (w * s).astype(jnp.float32)         # fold per-channel BN scale
        bf = b.astype(jnp.float32)
        if l == 0 and cin_pad > wf.shape[0]:
            wf = jnp.pad(wf, ((0, cin_pad - wf.shape[0]), (0, 0)))
        if l == nlayers - 1 and cout_pad > wf.shape[1]:
            pc = cout_pad - wf.shape[1]
            wf = jnp.pad(wf, ((0, 0), (0, pc)))
            bf = jnp.pad(bf, ((0, 0), (0, pc)))
        prepped.append((wf.astype(jnp.bfloat16), bf))
    flat, specs = [], []
    for (w, b) in prepped:
        flat += [w, b]
        specs += [pl.BlockSpec(w.shape, lambda *_: (0, 0)),
                  pl.BlockSpec(b.shape, lambda *_: (0, 0))]
    return flat, specs


def sa_mlp_maxpool(x, params, tile_rows=256):
    """x: (nsample, R, Cin) f32 -> (R, Cout) f32, max-pooled over nsample."""
    ns, R, cin = x.shape
    nlayers = len(params)
    cout = params[-1][0].shape[1]
    cin_p = _round_up(cin, 8)        # sublane-align first matmul K
    cout_p = _round_up(cout, 128)    # lane-dense output stores

    tr = min(tile_rows, _round_up(R, 16))
    Rp = _round_up(R, tr)
    if Rp != R or cin_p != cin:
        x = jnp.pad(x, ((0, 0), (0, Rp - R), (0, cin_p - cin)))
    n_tiles = Rp // tr
    # (ns, Rp, cin_p) -> (n_tiles*ns*tr, cin_p), sample-major within each tile,
    # so one rectangular 2-D block per grid step feeds one fused matmul chain.
    x = jnp.transpose(x.reshape(ns, n_tiles, tr, cin_p), (1, 0, 2, 3))
    x = x.reshape(n_tiles * ns * tr, cin_p).astype(jnp.bfloat16)

    flat, pspecs = _prepare_params(params, cin_p, cout_p)
    out = pl.pallas_call(
        _make_sa_kernel(nlayers, ns, tr),
        out_shape=jax.ShapeDtypeStruct((Rp, cout_p), jnp.float32),
        grid_spec=pltpu.PrefetchScalarGridSpec(
            num_scalar_prefetch=0,
            grid=(n_tiles,),
            in_specs=[pl.BlockSpec((ns * tr, cin_p), lambda i: (i, 0))] + pspecs,
            out_specs=pl.BlockSpec((tr, cout_p), lambda i: (i, 0))),
        compiler_params=pltpu.CompilerParams(
            dimension_semantics=("parallel",),
            vmem_limit_bytes=_VMEM_LIMIT_BYTES),
    )(x, *flat)
    return out[:R, :cout]


def fp_mlp(x, params, tile_rows=512):
    """x: (R, Cin) f32 -> (R, Cout) f32."""
    R, cin = x.shape
    nlayers = len(params)
    cout = params[-1][0].shape[1]
    cin_p = _round_up(cin, 8)
    cout_p = _round_up(cout, 128)

    tr = min(tile_rows, _round_up(R, 16))
    Rp = _round_up(R, tr)
    if Rp != R or cin_p != cin:
        x = jnp.pad(x, ((0, Rp - R), (0, cin_p - cin)))
    x = x.astype(jnp.bfloat16)

    flat, pspecs = _prepare_params(params, cin_p, cout_p)
    out = pl.pallas_call(
        _make_fp_kernel(nlayers),
        out_shape=jax.ShapeDtypeStruct((Rp, cout_p), jnp.float32),
        grid_spec=pltpu.PrefetchScalarGridSpec(
            num_scalar_prefetch=0,
            grid=(Rp // tr,),
            in_specs=[pl.BlockSpec((tr, cin_p), lambda i: (i, 0))] + pspecs,
            out_specs=pl.BlockSpec((tr, cout_p), lambda i: (i, 0))),
        compiler_params=pltpu.CompilerParams(
            dimension_semantics=("parallel",),
            vmem_limit_bytes=_VMEM_LIMIT_BYTES),
    )(x, *flat)
    return out[:R, :cout]


# ----------------------------------------------------------------------------
# Plain-JAX glue: data-dependent sampling / grouping (matches pointnet2 CUDA ops)
# ----------------------------------------------------------------------------
def farthest_point_sample(xyz, npoint):
    # TODO(synk): sequential, data-dependent; kept in JAX (lax.fori_loop), not Pallas.
    B, N, _ = xyz.shape

    def body(i, state):
        idx, mind, last = state
        last_xyz = jnp.take_along_axis(xyz, last[:, None, None], axis=1)  # (B,1,3)
        d = jnp.sum((xyz - last_xyz) ** 2, axis=-1)                       # (B,N)
        mind = jnp.minimum(mind, d)
        nxt = jnp.argmax(mind, axis=-1).astype(jnp.int32)
        idx = idx.at[:, i].set(nxt)
        return idx, mind, nxt

    idx0 = jnp.zeros((B, npoint), jnp.int32)
    mind0 = jnp.full((B, N), 1e10, jnp.float32)
    last0 = jnp.zeros((B,), jnp.int32)
    idx, _, _ = jax.lax.fori_loop(1, npoint, body, (idx0, mind0, last0))
    return idx


def ball_query(radius, nsample, xyz, new_xyz):
    B, N, _ = xyz.shape
    S = new_xyz.shape[1]
    d2 = jnp.sum((new_xyz[:, :, None, :] - xyz[:, None, :, :]) ** 2, axis=-1)  # (B,S,N)
    mask = d2 < radius * radius
    ar = jnp.arange(N, dtype=jnp.int32)
    sort_key = jnp.where(mask, ar[None, None, :], N)
    order = jnp.argsort(sort_key, axis=-1)
    k = min(nsample, N)
    order = order[..., :k].astype(jnp.int32)
    if k < nsample:
        order = jnp.concatenate(
            [order, jnp.broadcast_to(order[..., :1], (B, S, nsample - k))], axis=-1)
    cnt = jnp.sum(mask, axis=-1, dtype=jnp.int32)
    valid = jnp.arange(nsample, dtype=jnp.int32)[None, None, :] < cnt[:, :, None]
    first = order[..., :1]
    return jnp.where(valid, order, first)


def grouping_operation(features, idx):
    # features (B,C,N), idx (B,S,ns) -> (B,C,S,ns)
    B, C, N = features.shape
    _, S, ns = idx.shape
    g = jnp.take_along_axis(features, idx.reshape(B, 1, S * ns), axis=2)
    return g.reshape(B, C, S, ns)


# ----------------------------------------------------------------------------
# Module forward pieces
# ----------------------------------------------------------------------------
def sa_module_msg(xyz, features, npoint, radii, nsamples, scale_params, use_xyz=True):
    B, N, _ = xyz.shape
    fps_idx = farthest_point_sample(xyz, npoint)                        # (B, npoint)
    new_xyz = jnp.take_along_axis(xyz, fps_idx[:, :, None], axis=1)     # (B, npoint, 3)

    outs = []
    for r, ns, params in zip(radii, nsamples, scale_params):
        idx = ball_query(r, ns, xyz, new_xyz)                           # (B, npoint, ns)
        gx = grouping_operation(jnp.swapaxes(xyz, 1, 2), idx)           # (B,3,npoint,ns)
        gx = gx - jnp.swapaxes(new_xyz, 1, 2)[..., None]
        if features is not None:
            gf = grouping_operation(features, idx)
            gfeat = jnp.concatenate([gx, gf], axis=1) if use_xyz else gf
        else:
            gfeat = gx                                                  # (B,Cin,npoint,ns)
        cin = gfeat.shape[1]
        # -> (ns, B*npoint, Cin) for the Pallas kernel
        x = jnp.transpose(gfeat, (3, 0, 2, 1)).reshape(ns, B * npoint, cin)
        y = sa_mlp_maxpool(x, params)                                   # (B*npoint, Cout)
        y = y.reshape(B, npoint, -1)
        outs.append(jnp.transpose(y, (0, 2, 1)))                        # (B,Cout,npoint)
    return new_xyz, jnp.concatenate(outs, axis=1)


def fp_module(unknown, known, unknown_feats, known_feats, params):
    # three_nn: squared distances (as in the pointnet2 CUDA op)
    d2 = jnp.sum((unknown[:, :, None, :] - known[:, None, :, :]) ** 2, axis=-1)
    neg, idx = jax.lax.top_k(-d2, 3)
    dist = -neg                                                         # (B,n,3)
    dist_recip = 1.0 / (dist + 1e-8)
    norm = jnp.sum(dist_recip, axis=2, keepdims=True)
    weight = dist_recip / norm
    # three_interpolate
    B, C, m = known_feats.shape
    n = unknown.shape[1]
    g = jnp.take_along_axis(known_feats, idx.reshape(B, 1, n * 3), axis=2)
    g = g.reshape(B, C, n, 3)
    interp = jnp.sum(g * weight[:, None, :, :], axis=-1)                # (B,C,n)

    new_f = interp if unknown_feats is None else jnp.concatenate([interp, unknown_feats], axis=1)
    cin = new_f.shape[1]
    x = jnp.transpose(new_f, (0, 2, 1)).reshape(B * n, cin)
    y = fp_mlp(x, params)                                               # (B*n, Cout)
    return jnp.transpose(y.reshape(B, n, -1), (0, 2, 1))                # (B,Cout,n)


def pointnet2_backbone_forward(pointcloud, params, npoint_per_layer, radius_per_layer,
                               use_xyz=True):
    nscale = len(radius_per_layer[0])
    xyz = pointcloud[..., 0:3]
    features = (jnp.swapaxes(pointcloud[..., 3:], 1, 2)
                if pointcloud.shape[-1] > 3 else None)

    l_xyz, l_features = [xyz], [features]
    for i in range(2):
        li_xyz, li_feat = sa_module_msg(l_xyz[i], l_features[i],
                                        npoint_per_layer[i], radius_per_layer[i],
                                        [32] * nscale, params["sa"][i], use_xyz)
        l_xyz.append(li_xyz)
        l_features.append(li_feat)

    global_features = l_features[-1]
    for i in range(-1, -3, -1):
        l_features[i - 1] = fp_module(l_xyz[i - 1], l_xyz[i],
                                      l_features[i - 1], l_features[i],
                                      params["fp"][i])
    return l_features[0], global_features


# ----------------------------------------------------------------------------
# Deterministic synthetic parameters (conv weight + folded eval-mode BN)
# ----------------------------------------------------------------------------
def init_mlp_params(key, channels):
    params = []
    for cin, cout in zip(channels[:-1], channels[1:]):
        key, kw, ks, kb = jax.random.split(key, 4)
        w = jax.random.normal(kw, (cin, cout), jnp.float32) / (cin ** 0.5)
        s = 1.0 + 0.1 * jax.random.normal(ks, (1, cout), jnp.float32)
        b = 0.1 * jax.random.normal(kb, (1, cout), jnp.float32)
        params.append((w, s, b))
    return params, key


def build_params(key, npoint_per_layer, radius_per_layer, input_feature_dims=0, use_xyz=True):
    nscale = len(radius_per_layer[0])
    add = 3 if use_xyz else 0
    sa_params = []

    sa1 = []
    for _ in range(nscale):
        p, key = init_mlp_params(key, [input_feature_dims + add, 32, 32, 64])
        sa1.append(p)
    sa_params.append(sa1)
    c_out_0 = 64 * nscale

    sa2 = []
    for _ in range(nscale):
        p, key = init_mlp_params(key, [c_out_0 + add, 64, 64, 128])
        sa2.append(p)
    sa_params.append(sa2)
    c_out_1 = 128 * nscale

    fp_params = []
    p, key = init_mlp_params(key, [128 + input_feature_dims, 128, 128, 128])
    fp_params.append(p)
    p, key = init_mlp_params(key, [c_out_1 + c_out_0, 256, 128])
    fp_params.append(p)

    return {"sa": sa_params, "fp": fp_params}


if __name__ == "__main__":
    key = jax.random.PRNGKey(0)
    B, N = 2, 64
    npoint_per_layer = [16, 8]
    radius_per_layer = [[0.2, 0.4], [0.4, 0.8]]   # nscale = 2
    nscale = len(radius_per_layer[0])

    kpc, kparam = jax.random.split(key)
    pointcloud = jax.random.uniform(kpc, (B, N, 3), jnp.float32)        # (B, N, 3+0)
    params = build_params(kparam, npoint_per_layer, radius_per_layer,
                          input_feature_dims=0, use_xyz=True)

    fwd = jax.jit(functools.partial(pointnet2_backbone_forward,
                                    npoint_per_layer=npoint_per_layer,
                                    radius_per_layer=radius_per_layer,
                                    use_xyz=True))
    pointwise_feat, global_feat = fwd(pointcloud, params)
    jax.block_until_ready((pointwise_feat, global_feat))

    assert pointwise_feat.shape == (B, 128, N)
    assert global_feat.shape == (B, 128 * nscale, npoint_per_layer[1])
    assert bool(jnp.all(jnp.isfinite(pointwise_feat)))
    assert bool(jnp.all(jnp.isfinite(global_feat)))
    print("KERNEL_OK")
</pallas_src>

<mosaic_0001>
module attributes {stable_mosaic.version = 11 : i64} {
  func.func @kernel(%arg0: i32, %arg1: memref<1024x8xbf16, #tpu.memory_space<vmem>>, %arg2: memref<8x32xbf16, #tpu.memory_space<vmem>>, %arg3: memref<1x32xf32, #tpu.memory_space<vmem>>, %arg4: memref<32x32xbf16, #tpu.memory_space<vmem>>, %arg5: memref<1x32xf32, #tpu.memory_space<vmem>>, %arg6: memref<32x128xbf16, #tpu.memory_space<vmem>>, %arg7: memref<1x128xf32, #tpu.memory_space<vmem>>, %arg8: memref<32x128xf32, #tpu.memory_space<vmem>>) attributes {dimension_semantics = [#tpu.dimension_semantics<parallel>], iteration_bounds = array<i64: 1>, scalar_prefetch = 0 : i64, scratch_operands = 0 : i64, tpu.core_type = #tpu.core_type<tc>, window_params = [{transform_indices = @transform_0, window_bounds = array<i64: 1024, 8>}, {pipeline_mode = #tpu.pipeline_mode<synchronous>, transform_indices = @transform_1, window_bounds = array<i64: 8, 32>}, {pipeline_mode = #tpu.pipeline_mode<synchronous>, transform_indices = @transform_2, window_bounds = array<i64: 1, 32>}, {pipeline_mode = #tpu.pipeline_mode<synchronous>, transform_indices = @transform_3, window_bounds = array<i64: 32, 32>}, {pipeline_mode = #tpu.pipeline_mode<synchronous>, transform_indices = @transform_4, window_bounds = array<i64: 1, 32>}, {pipeline_mode = #tpu.pipeline_mode<synchronous>, transform_indices = @transform_5, window_bounds = array<i64: 32, 128>}, {pipeline_mode = #tpu.pipeline_mode<synchronous>, transform_indices = @transform_6, window_bounds = array<i64: 1, 128>}, {transform_indices = @transform_7, window_bounds = array<i64: 32, 128>}]} {
    %c0 = arith.constant 0 : index
    %c0_0 = arith.constant 0 : index
    %0 = vector.load %arg1[%c0, %c0_0] : memref<1024x8xbf16, #tpu.memory_space<vmem>>, vector<1024x8xbf16>
    %c0_1 = arith.constant 0 : index
    %c0_2 = arith.constant 0 : index
    %1 = vector.load %arg2[%c0_1, %c0_2] : memref<8x32xbf16, #tpu.memory_space<vmem>>, vector<8x32xbf16>
    %c0_3 = arith.constant 0 : index
    %c0_4 = arith.constant 0 : index
    %2 = vector.load %arg3[%c0_3, %c0_4] : memref<1x32xf32, #tpu.memory_space<vmem>>, vector<1x32xf32>
    %cst = arith.constant dense<0.000000e+00> : vector<1024x32xf32>
    %3 = tpu.matmul %0, %1, %cst {dimension_numbers = #tpu.dot_dimension_numbers<[1], [0], [0], [1], [0, 0, 1, 1], [], []>} : vector<1024x8xbf16>, vector<8x32xbf16>, vector<1024x32xf32> -> vector<1024x32xf32>
    %4 = vector.broadcast %2 : vector<1x32xf32> to vector<1024x32xf32>
    %5 = arith.addf %3, %4 : vector<1024x32xf32>
    %cst_5 = arith.constant 0.000000e+00 : f32
    %6 = vector.broadcast %cst_5 : f32 to vector<1024x32xf32>
    %7 = arith.maximumf %5, %6 : vector<1024x32xf32>
    %8 = arith.truncf %7 : vector<1024x32xf32> to vector<1024x32xbf16>
    %c0_6 = arith.constant 0 : index
    %c0_7 = arith.constant 0 : index
    %9 = vector.load %arg4[%c0_6, %c0_7] : memref<32x32xbf16, #tpu.memory_space<vmem>>, vector<32x32xbf16>
    %c0_8 = arith.constant 0 : index
    %c0_9 = arith.constant 0 : index
    %10 = vector.load %arg5[%c0_8, %c0_9] : memref<1x32xf32, #tpu.memory_space<vmem>>, vector<1x32xf32>
    %cst_10 = arith.constant dense<0.000000e+00> : vector<1024x32xf32>
    %11 = tpu.matmul %8, %9, %cst_10 {dimension_numbers = #tpu.dot_dimension_numbers<[1], [0], [0], [1], [0, 0, 1, 1], [], []>} : vector<1024x32xbf16>, vector<32x32xbf16>, vector<1024x32xf32> -> vector<1024x32xf32>
    %12 = vector.broadcast %10 : vector<1x32xf32> to vector<1024x32xf32>
    %13 = arith.addf %11, %12 : vector<1024x32xf32>
    %cst_11 = arith.constant 0.000000e+00 : f32
    %14 = vector.broadcast %cst_11 : f32 to vector<1024x32xf32>
    %15 = arith.maximumf %13, %14 : vector<1024x32xf32>
    %16 = arith.truncf %15 : vector<1024x32xf32> to vector<1024x32xbf16>
    %c0_12 = arith.constant 0 : index
    %c0_13 = arith.constant 0 : index
    %17 = vector.load %arg6[%c0_12, %c0_13] : memref<32x128xbf16, #tpu.memory_space<vmem>>, vector<32x128xbf16>
    %c0_14 = arith.constant 0 : index
    %c0_15 = arith.constant 0 : index
    %18 = vector.load %arg7[%c0_14, %c0_15] : memref<1x128xf32, #tpu.memory_space<vmem>>, vector<1x128xf32>
    %cst_16 = arith.constant dense<0.000000e+00> : vector<1024x128xf32>
    %19 = tpu.matmul %16, %17, %cst_16 {dimension_numbers = #tpu.dot_dimension_numbers<[1], [0], [0], [1], [0, 0, 1, 1], [], []>} : vector<1024x32xbf16>, vector<32x128xbf16>, vector<1024x128xf32> -> vector<1024x128xf32>
    %20 = vector.broadcast %18 : vector<1x128xf32> to vector<1024x128xf32>
    %21 = arith.addf %19, %20 : vector<1024x128xf32>
    %cst_17 = arith.constant 0.000000e+00 : f32
    %22 = vector.broadcast %cst_17 : f32 to vector<1024x128xf32>
    %23 = arith.maximumf %21, %22 : vector<1024x128xf32>
    %24 = vector.extract_strided_slice %23 {offsets = [0, 0], sizes = [32, 128], strides = [1, 1]} : vector<1024x128xf32> to vector<32x128xf32>
    %25 = vector.extract_strided_slice %23 {offsets = [32, 0], sizes = [32, 128], strides = [1, 1]} : vector<1024x128xf32> to vector<32x128xf32>
    %26 = arith.maximumf %24, %25 : vector<32x128xf32>
    %27 = vector.extract_strided_slice %23 {offsets = [64, 0], sizes = [32, 128], strides = [1, 1]} : vector<1024x128xf32> to vector<32x128xf32>
    %28 = arith.maximumf %26, %27 : vector<32x128xf32>
    %29 = vector.extract_strided_slice %23 {offsets = [96, 0], sizes = [32, 128], strides = [1, 1]} : vector<1024x128xf32> to vector<32x128xf32>
    %30 = arith.maximumf %28, %29 : vector<32x128xf32>
    %31 = vector.extract_strided_slice %23 {offsets = [128, 0], sizes = [32, 128], strides = [1, 1]} : vector<1024x128xf32> to vector<32x128xf32>
    %32 = arith.maximumf %30, %31 : vector<32x128xf32>
    %33 = vector.extract_strided_slice %23 {offsets = [160, 0], sizes = [32, 128], strides = [1, 1]} : vector<1024x128xf32> to vector<32x128xf32>
    %34 = arith.maximumf %32, %33 : vector<32x128xf32>
    %35 = vector.extract_strided_slice %23 {offsets = [192, 0], sizes = [32, 128], strides = [1, 1]} : vector<1024x128xf32> to vector<32x128xf32>
    %36 = arith.maximumf %34, %35 : vector<32x128xf32>
    %37 = vector.extract_strided_slice %23 {offsets = [224, 0], sizes = [32, 128], strides = [1, 1]} : vector<1024x128xf32> to vector<32x128xf32>
    %38 = arith.maximumf %36, %37 : vector<32x128xf32>
    %39 = vector.extract_strided_slice %23 {offsets = [256, 0], sizes = [32, 128], strides = [1, 1]} : vector<1024x128xf32> to vector<32x128xf32>
    %40 = arith.maximumf %38, %39 : vector<32x128xf32>
    %41 = vector.extract_strided_slice %23 {offsets = [288, 0], sizes = [32, 128], strides = [1, 1]} : vector<1024x128xf32> to vector<32x128xf32>
    %42 = arith.maximumf %40, %41 : vector<32x128xf32>
    %43 = vector.extract_strided_slice %23 {offsets = [320, 0], sizes = [32, 128], strides = [1, 1]} : vector<1024x128xf32> to vector<32x128xf32>
    %44 = arith.maximumf %42, %43 : vector<32x128xf32>
    %45 = vector.extract_strided_slice %23 {offsets = [352, 0], sizes = [32, 128], strides = [1, 1]} : vector<1024x128xf32> to vector<32x128xf32>
    %46 = arith.maximumf %44, %45 : vector<32x128xf32>
    %47 = vector.extract_strided_slice %23 {offsets = [384, 0], sizes = [32, 128], strides = [1, 1]} : vector<1024x128xf32> to vector<32x128xf32>
    %48 = arith.maximumf %46, %47 : vector<32x128xf32>
    %49 = vector.extract_strided_slice %23 {offsets = [416, 0], sizes = [32, 128], strides = [1, 1]} : vector<1024x128xf32> to vector<32x128xf32>
    %50 = arith.maximumf %48, %49 : vector<32x128xf32>
    %51 = vector.extract_strided_slice %23 {offsets = [448, 0], sizes = [32, 128], strides = [1, 1]} : vector<1024x128xf32> to vector<32x128xf32>
    %52 = arith.maximumf %50, %51 : vector<32x128xf32>
    %53 = vector.extract_strided_slice %23 {offsets = [480, 0], sizes = [32, 128], strides = [1, 1]} : vector<1024x128xf32> to vector<32x128xf32>
    %54 = arith.maximumf %52, %53 : vector<32x128xf32>
    %55 = vector.extract_strided_slice %23 {offsets = [512, 0], sizes = [32, 128], strides = [1, 1]} : vector<1024x128xf32> to vector<32x128xf32>
    %56 = arith.maximumf %54, %55 : vector<32x128xf32>
    %57 = vector.extract_strided_slice %23 {offsets = [544, 0], sizes = [32, 128], strides = [1, 1]} : vector<1024x128xf32> to vector<32x128xf32>
    %58 = arith.maximumf %56, %57 : vector<32x128xf32>
    %59 = vector.extract_strided_slice %23 {offsets = [576, 0], sizes = [32, 128], strides = [1, 1]} : vector<1024x128xf32> to vector<32x128xf32>
    %60 = arith.maximumf %58, %59 : vector<32x128xf32>
    %61 = vector.extract_strided_slice %23 {offsets = [608, 0], sizes = [32, 128], strides = [1, 1]} : vector<1024x128xf32> to vector<32x128xf32>
    %62 = arith.maximumf %60, %61 : vector<32x128xf32>
    %63 = vector.extract_strided_slice %23 {offsets = [640, 0], sizes = [32, 128], strides = [1, 1]} : vector<1024x128xf32> to vector<32x128xf32>
    %64 = arith.maximumf %62, %63 : vector<32x128xf32>
    %65 = vector.extract_strided_slice %23 {offsets = [672, 0], sizes = [32, 128], strides = [1, 1]} : vector<1024x128xf32> to vector<32x128xf32>
    %66 = arith.maximumf %64, %65 : vector<32x128xf32>
    %67 = vector.extract_strided_slice %23 {offsets = [704, 0], sizes = [32, 128], strides = [1, 1]} : vector<1024x128xf32> to vector<32x128xf32>
    %68 = arith.maximumf %66, %67 : vector<32x128xf32>
    %69 = vector.extract_strided_slice %23 {offsets = [736, 0], sizes = [32, 128], strides = [1, 1]} : vector<1024x128xf32> to vector<32x128xf32>
    %70 = arith.maximumf %68, %69 : vector<32x128xf32>
    %71 = vector.extract_strided_slice %23 {offsets = [768, 0], sizes = [32, 128], strides = [1, 1]} : vector<1024x128xf32> to vector<32x128xf32>
    %72 = arith.maximumf %70, %71 : vector<32x128xf32>
    %73 = vector.extract_strided_slice %23 {offsets = [800, 0], sizes = [32, 128], strides = [1, 1]} : vector<1024x128xf32> to vector<32x128xf32>
    %74 = arith.maximumf %72, %73 : vector<32x128xf32>
    %75 = vector.extract_strided_slice %23 {offsets = [832, 0], sizes = [32, 128], strides = [1, 1]} : vector<1024x128xf32> to vector<32x128xf32>
    %76 = arith.maximumf %74, %75 : vector<32x128xf32>
    %77 = vector.extract_strided_slice %23 {offsets = [864, 0], sizes = [32, 128], strides = [1, 1]} : vector<1024x128xf32> to vector<32x128xf32>
    %78 = arith.maximumf %76, %77 : vector<32x128xf32>
    %79 = vector.extract_strided_slice %23 {offsets = [896, 0], sizes = [32, 128], strides = [1, 1]} : vector<1024x128xf32> to vector<32x128xf32>
    %80 = arith.maximumf %78, %79 : vector<32x128xf32>
    %81 = vector.extract_strided_slice %23 {offsets = [928, 0], sizes = [32, 128], strides = [1, 1]} : vector<1024x128xf32> to vector<32x128xf32>
    %82 = arith.maximumf %80, %81 : vector<32x128xf32>
    %83 = vector.extract_strided_slice %23 {offsets = [960, 0], sizes = [32, 128], strides = [1, 1]} : vector<1024x128xf32> to vector<32x128xf32>
    %84 = arith.maximumf %82, %83 : vector<32x128xf32>
    %85 = vector.extract_strided_slice %23 {offsets = [992, 0], sizes = [32, 128], strides = [1, 1]} : vector<1024x128xf32> to vector<32x128xf32>
    %86 = arith.maximumf %84, %85 : vector<32x128xf32>
    %c0_18 = arith.constant 0 : index
    %c0_19 = arith.constant 0 : index
    %87 = vector.load %arg8[%c0_18, %c0_19] : memref<32x128xf32, #tpu.memory_space<vmem>>, vector<32x128xf32>
    tpu.vector_store %arg8[%c0_18, %c0_19], %86 {strides = array<i32>} : memref<32x128xf32, #tpu.memory_space<vmem>>, vector<32x128xf32>,
    return
  }
  func.func @transform_0(%arg0: i32) -> (i32, i32) {
    %c0_i32 = arith.constant 0 : i32
    %c0_i32_0 = arith.constant 0 : i32
    return %arg0, %c0_i32 : i32, i32
  }
  func.func @transform_1(%arg0: i32) -> (i32, i32) {
    %c0_i32 = arith.constant 0 : i32
    %c0_i32_0 = arith.constant 0 : i32
    %c0_i32_1 = arith.constant 0 : i32
    return %c0_i32, %c0_i32_0 : i32, i32
  }
  func.func @transform_2(%arg0: i32) -> (i32, i32) {
    %c0_i32 = arith.constant 0 : i32
    %c0_i32_0 = arith.constant 0 : i32
    %c0_i32_1 = arith.constant 0 : i32
    return %c0_i32, %c0_i32_0 : i32, i32
  }
  func.func @transform_3(%arg0: i32) -> (i32, i32) {
    %c0_i32 = arith.constant 0 : i32
    %c0_i32_0 = arith.constant 0 : i32
    %c0_i32_1 = arith.constant 0 : i32
    return %c0_i32, %c0_i32_0 : i32, i32
  }
  func.func @transform_4(%arg0: i32) -> (i32, i32) {
    %c0_i32 = arith.constant 0 : i32
    %c0_i32_0 = arith.constant 0 : i32
    %c0_i32_1 = arith.constant 0 : i32
    return %c0_i32, %c0_i32_0 : i32, i32
  }
  func.func @transform_5(%arg0: i32) -> (i32, i32) {
    %c0_i32 = arith.constant 0 : i32
    %c0_i32_0 = arith.constant 0 : i32
    %c0_i32_1 = arith.constant 0 : i32
    return %c0_i32, %c0_i32_0 : i32, i32
  }
  func.func @transform_6(%arg0: i32) -> (i32, i32) {
    %c0_i32 = arith.constant 0 : i32
    %c0_i32_0 = arith.constant 0 : i32
    %c0_i32_1 = arith.constant 0 : i32
    return %c0_i32, %c0_i32_0 : i32, i32
  }
  func.func @transform_7(%arg0: i32) -> (i32, i32) {
    %c0_i32 = arith.constant 0 : i32
    %c0_i32_0 = arith.constant 0 : i32
    return %arg0, %c0_i32 : i32, i32
  }
}

module attributes {stable_mosaic.version = 11 : i64} {
  func.func @kernel(%arg0: i32, %arg1: memref<512x136xbf16, #tpu.memory_space<vmem>>, %arg2: memref<136x64xbf16, #tpu.memory_space<vmem>>, %arg3: memref<1x64xf32, #tpu.memory_space<vmem>>, %arg4: memref<64x64xbf16, #tpu.memory_space<vmem>>, %arg5: memref<1x64xf32, #tpu.memory_space<vmem>>, %arg6: memref<64x128xbf16, #tpu.memory_space<vmem>>, %arg7: memref<1x128xf32, #tpu.memory_space<vmem>>, %arg8: memref<16x128xf32, #tpu.memory_space<vmem>>) attributes {dimension_semantics = [#tpu.dimension_semantics<parallel>], iteration_bounds = array<i64: 1>, scalar_prefetch = 0 : i64, scratch_operands = 0 : i64, tpu.core_type = #tpu.core_type<tc>, window_params = [{transform_indices = @transform_0, window_bounds = array<i64: 512, 136>}, {pipeline_mode = #tpu.pipeline_mode<synchronous>, transform_indices = @transform_1, window_bounds = array<i64: 136, 64>}, {pipeline_mode = #tpu.pipeline_mode<synchronous>, transform_indices = @transform_2, window_bounds = array<i64: 1, 64>}, {pipeline_mode = #tpu.pipeline_mode<synchronous>, transform_indices = @transform_3, window_bounds = array<i64: 64, 64>}, {pipeline_mode = #tpu.pipeline_mode<synchronous>, transform_indices = @transform_4, window_bounds = array<i64: 1, 64>}, {pipeline_mode = #tpu.pipeline_mode<synchronous>, transform_indices = @transform_5, window_bounds = array<i64: 64, 128>}, {pipeline_mode = #tpu.pipeline_mode<synchronous>, transform_indices = @transform_6, window_bounds = array<i64: 1, 128>}, {transform_indices = @transform_7, window_bounds = array<i64: 16, 128>}]} {
    %c0 = arith.constant 0 : index
    %c0_0 = arith.constant 0 : index
    %0 = vector.load %arg1[%c0, %c0_0] : memref<512x136xbf16, #tpu.memory_space<vmem>>, vector<512x136xbf16>
    %c0_1 = arith.constant 0 : index
    %c0_2 = arith.constant 0 : index
    %1 = vector.load %arg2[%c0_1, %c0_2] : memref<136x64xbf16, #tpu.memory_space<vmem>>, vector<136x64xbf16>
    %c0_3 = arith.constant 0 : index
    %c0_4 = arith.constant 0 : index
    %2 = vector.load %arg3[%c0_3, %c0_4] : memref<1x64xf32, #tpu.memory_space<vmem>>, vector<1x64xf32>
    %cst = arith.constant dense<0.000000e+00> : vector<512x64xf32>
    %3 = tpu.matmul %0, %1, %cst {dimension_numbers = #tpu.dot_dimension_numbers<[1], [0], [0], [1], [0, 0, 1, 1], [], []>} : vector<512x136xbf16>, vector<136x64xbf16>, vector<512x64xf32> -> vector<512x64xf32>
    %4 = vector.broadcast %2 : vector<1x64xf32> to vector<512x64xf32>
    %5 = arith.addf %3, %4 : vector<512x64xf32>
    %cst_5 = arith.constant 0.000000e+00 : f32
    %6 = vector.broadcast %cst_5 : f32 to vector<512x64xf32>
    %7 = arith.maximumf %5, %6 : vector<512x64xf32>
    %8 = arith.truncf %7 : vector<512x64xf32> to vector<512x64xbf16>
    %c0_6 = arith.constant 0 : index
    %c0_7 = arith.constant 0 : index
    %9 = vector.load %arg4[%c0_6, %c0_7] : memref<64x64xbf16, #tpu.memory_space<vmem>>, vector<64x64xbf16>
    %c0_8 = arith.constant 0 : index
    %c0_9 = arith.constant 0 : index
    %10 = vector.load %arg5[%c0_8, %c0_9] : memref<1x64xf32, #tpu.memory_space<vmem>>, vector<1x64xf32>
    %cst_10 = arith.constant dense<0.000000e+00> : vector<512x64xf32>
    %11 = tpu.matmul %8, %9, %cst_10 {dimension_numbers = #tpu.dot_dimension_numbers<[1], [0], [0], [1], [0, 0, 1, 1], [], []>} : vector<512x64xbf16>, vector<64x64xbf16>, vector<512x64xf32> -> vector<512x64xf32>
    %12 = vector.broadcast %10 : vector<1x64xf32> to vector<512x64xf32>
    %13 = arith.addf %11, %12 : vector<512x64xf32>
    %cst_11 = arith.constant 0.000000e+00 : f32
    %14 = vector.broadcast %cst_11 : f32 to vector<512x64xf32>
    %15 = arith.maximumf %13, %14 : vector<512x64xf32>
    %16 = arith.truncf %15 : vector<512x64xf32> to vector<512x64xbf16>
    %c0_12 = arith.constant 0 : index
    %c0_13 = arith.constant 0 : index
    %17 = vector.load %arg6[%c0_12, %c0_13] : memref<64x128xbf16, #tpu.memory_space<vmem>>, vector<64x128xbf16>
    %c0_14 = arith.constant 0 : index
    %c0_15 = arith.constant 0 : index
    %18 = vector.load %arg7[%c0_14, %c0_15] : memref<1x128xf32, #tpu.memory_space<vmem>>, vector<1x128xf32>
    %cst_16 = arith.constant dense<0.000000e+00> : vector<512x128xf32>
    %19 = tpu.matmul %16, %17, %cst_16 {dimension_numbers = #tpu.dot_dimension_numbers<[1], [0], [0], [1], [0, 0, 1, 1], [], []>} : vector<512x64xbf16>, vector<64x128xbf16>, vector<512x128xf32> -> vector<512x128xf32>
    %20 = vector.broadcast %18 : vector<1x128xf32> to vector<512x128xf32>
    %21 = arith.addf %19, %20 : vector<512x128xf32>
    %cst_17 = arith.constant 0.000000e+00 : f32
    %22 = vector.broadcast %cst_17 : f32 to vector<512x128xf32>
    %23 = arith.maximumf %21, %22 : vector<512x128xf32>
    %24 = vector.extract_strided_slice %23 {offsets = [0, 0], sizes = [16, 128], strides = [1, 1]} : vector<512x128xf32> to vector<16x128xf32>
    %25 = vector.extract_strided_slice %23 {offsets = [16, 0], sizes = [16, 128], strides = [1, 1]} : vector<512x128xf32> to vector<16x128xf32>
    %26 = arith.maximumf %24, %25 : vector<16x128xf32>
    %27 = vector.extract_strided_slice %23 {offsets = [32, 0], sizes = [16, 128], strides = [1, 1]} : vector<512x128xf32> to vector<16x128xf32>
    %28 = arith.maximumf %26, %27 : vector<16x128xf32>
    %29 = vector.extract_strided_slice %23 {offsets = [48, 0], sizes = [16, 128], strides = [1, 1]} : vector<512x128xf32> to vector<16x128xf32>
    %30 = arith.maximumf %28, %29 : vector<16x128xf32>
    %31 = vector.extract_strided_slice %23 {offsets = [64, 0], sizes = [16, 128], strides = [1, 1]} : vector<512x128xf32> to vector<16x128xf32>
    %32 = arith.maximumf %30, %31 : vector<16x128xf32>
    %33 = vector.extract_strided_slice %23 {offsets = [80, 0], sizes = [16, 128], strides = [1, 1]} : vector<512x128xf32> to vector<16x128xf32>
    %34 = arith.maximumf %32, %33 : vector<16x128xf32>
    %35 = vector.extract_strided_slice %23 {offsets = [96, 0], sizes = [16, 128], strides = [1, 1]} : vector<512x128xf32> to vector<16x128xf32>
    %36 = arith.maximumf %34, %35 : vector<16x128xf32>
    %37 = vector.extract_strided_slice %23 {offsets = [112, 0], sizes = [16, 128], strides = [1, 1]} : vector<512x128xf32> to vector<16x128xf32>
    %38 = arith.maximumf %36, %37 : vector<16x128xf32>
    %39 = vector.extract_strided_slice %23 {offsets = [128, 0], sizes = [16, 128], strides = [1, 1]} : vector<512x128xf32> to vector<16x128xf32>
    %40 = arith.maximumf %38, %39 : vector<16x128xf32>
    %41 = vector.extract_strided_slice %23 {offsets = [144, 0], sizes = [16, 128], strides = [1, 1]} : vector<512x128xf32> to vector<16x128xf32>
    %42 = arith.maximumf %40, %41 : vector<16x128xf32>
    %43 = vector.extract_strided_slice %23 {offsets = [160, 0], sizes = [16, 128], strides = [1, 1]} : vector<512x128xf32> to vector<16x128xf32>
    %44 = arith.maximumf %42, %43 : vector<16x128xf32>
    %45 = vector.extract_strided_slice %23 {offsets = [176, 0], sizes = [16, 128], strides = [1, 1]} : vector<512x128xf32> to vector<16x128xf32>
    %46 = arith.maximumf %44, %45 : vector<16x128xf32>
    %47 = vector.extract_strided_slice %23 {offsets = [192, 0], sizes = [16, 128], strides = [1, 1]} : vector<512x128xf32> to vector<16x128xf32>
    %48 = arith.maximumf %46, %47 : vector<16x128xf32>
    %49 = vector.extract_strided_slice %23 {offsets = [208, 0], sizes = [16, 128], strides = [1, 1]} : vector<512x128xf32> to vector<16x128xf32>
    %50 = arith.maximumf %48, %49 : vector<16x128xf32>
    %51 = vector.extract_strided_slice %23 {offsets = [224, 0], sizes = [16, 128], strides = [1, 1]} : vector<512x128xf32> to vector<16x128xf32>
    %52 = arith.maximumf %50, %51 : vector<16x128xf32>
    %53 = vector.extract_strided_slice %23 {offsets = [240, 0], sizes = [16, 128], strides = [1, 1]} : vector<512x128xf32> to vector<16x128xf32>
    %54 = arith.maximumf %52, %53 : vector<16x128xf32>
    %55 = vector.extract_strided_slice %23 {offsets = [256, 0], sizes = [16, 128], strides = [1, 1]} : vector<512x128xf32> to vector<16x128xf32>
    %56 = arith.maximumf %54, %55 : vector<16x128xf32>
    %57 = vector.extract_strided_slice %23 {offsets = [272, 0], sizes = [16, 128], strides = [1, 1]} : vector<512x128xf32> to vector<16x128xf32>
    %58 = arith.maximumf %56, %57 : vector<16x128xf32>
    %59 = vector.extract_strided_slice %23 {offsets = [288, 0], sizes = [16, 128], strides = [1, 1]} : vector<512x128xf32> to vector<16x128xf32>
    %60 = arith.maximumf %58, %59 : vector<16x128xf32>
    %61 = vector.extract_strided_slice %23 {offsets = [304, 0], sizes = [16, 128], strides = [1, 1]} : vector<512x128xf32> to vector<16x128xf32>
    %62 = arith.maximumf %60, %61 : vector<16x128xf32>
    %63 = vector.extract_strided_slice %23 {offsets = [320, 0], sizes = [16, 128], strides = [1, 1]} : vector<512x128xf32> to vector<16x128xf32>
    %64 = arith.maximumf %62, %63 : vector<16x128xf32>
    %65 = vector.extract_strided_slice %23 {offsets = [336, 0], sizes = [16, 128], strides = [1, 1]} : vector<512x128xf32> to vector<16x128xf32>
    %66 = arith.maximumf %64, %65 : vector<16x128xf32>
    %67 = vector.extract_strided_slice %23 {offsets = [352, 0], sizes = [16, 128], strides = [1, 1]} : vector<512x128xf32> to vector<16x128xf32>
    %68 = arith.maximumf %66, %67 : vector<16x128xf32>
    %69 = vector.extract_strided_slice %23 {offsets = [368, 0], sizes = [16, 128], strides = [1, 1]} : vector<512x128xf32> to vector<16x128xf32>
    %70 = arith.maximumf %68, %69 : vector<16x128xf32>
    %71 = vector.extract_strided_slice %23 {offsets = [384, 0], sizes = [16, 128], strides = [1, 1]} : vector<512x128xf32> to vector<16x128xf32>
    %72 = arith.maximumf %70, %71 : vector<16x128xf32>
    %73 = vector.extract_strided_slice %23 {offsets = [400, 0], sizes = [16, 128], strides = [1, 1]} : vector<512x128xf32> to vector<16x128xf32>
    %74 = arith.maximumf %72, %73 : vector<16x128xf32>
    %75 = vector.extract_strided_slice %23 {offsets = [416, 0], sizes = [16, 128], strides = [1, 1]} : vector<512x128xf32> to vector<16x128xf32>
    %76 = arith.maximumf %74, %75 : vector<16x128xf32>
    %77 = vector.extract_strided_slice %23 {offsets = [432, 0], sizes = [16, 128], strides = [1, 1]} : vector<512x128xf32> to vector<16x128xf32>
    %78 = arith.maximumf %76, %77 : vector<16x128xf32>
    %79 = vector.extract_strided_slice %23 {offsets = [448, 0], sizes = [16, 128], strides = [1, 1]} : vector<512x128xf32> to vector<16x128xf32>
    %80 = arith.maximumf %78, %79 : vector<16x128xf32>
    %81 = vector.extract_strided_slice %23 {offsets = [464, 0], sizes = [16, 128], strides = [1, 1]} : vector<512x128xf32> to vector<16x128xf32>
    %82 = arith.maximumf %80, %81 : vector<16x128xf32>
    %83 = vector.extract_strided_slice %23 {offsets = [480, 0], sizes = [16, 128], strides = [1, 1]} : vector<512x128xf32> to vector<16x128xf32>
    %84 = arith.maximumf %82, %83 : vector<16x128xf32>
    %85 = vector.extract_strided_slice %23 {offsets = [496, 0], sizes = [16, 128], strides = [1, 1]} : vector<512x128xf32> to vector<16x128xf32>
    %86 = arith.maximumf %84, %85 : vector<16x128xf32>
    %c0_18 = arith.constant 0 : index
    %c0_19 = arith.constant 0 : index
    %87 = vector.load %arg8[%c0_18, %c0_19] : memref<16x128xf32, #tpu.memory_space<vmem>>, vector<16x128xf32>
    tpu.vector_store %arg8[%c0_18, %c0_19], %86 {strides = array<i32>} : memref<16x128xf32, #tpu.memory_space<vmem>>, vector<16x128xf32>,
    return
  }
  func.func @transform_0(%arg0: i32) -> (i32, i32) {
    %c0_i32 = arith.constant 0 : i32
    %c0_i32_0 = arith.constant 0 : i32
    return %arg0, %c0_i32 : i32, i32
  }
  func.func @transform_1(%arg0: i32) -> (i32, i32) {
    %c0_i32 = arith.constant 0 : i32
    %c0_i32_0 = arith.constant 0 : i32
    %c0_i32_1 = arith.constant 0 : i32
    return %c0_i32, %c0_i32_0 : i32, i32
  }
  func.func @transform_2(%arg0: i32) -> (i32, i32) {
    %c0_i32 = arith.constant 0 : i32
    %c0_i32_0 = arith.constant 0 : i32
    %c0_i32_1 = arith.constant 0 : i32
    return %c0_i32, %c0_i32_0 : i32, i32
  }
  func.func @transform_3(%arg0: i32) -> (i32, i32) {
    %c0_i32 = arith.constant 0 : i32
    %c0_i32_0 = arith.constant 0 : i32
    %c0_i32_1 = arith.constant 0 : i32
    return %c0_i32, %c0_i32_0 : i32, i32
  }
  func.func @transform_4(%arg0: i32) -> (i32, i32) {
    %c0_i32 = arith.constant 0 : i32
    %c0_i32_0 = arith.constant 0 : i32
    %c0_i32_1 = arith.constant 0 : i32
    return %c0_i32, %c0_i32_0 : i32, i32
  }
  func.func @transform_5(%arg0: i32) -> (i32, i32) {
    %c0_i32 = arith.constant 0 : i32
    %c0_i32_0 = arith.constant 0 : i32
    %c0_i32_1 = arith.constant 0 : i32
    return %c0_i32, %c0_i32_0 : i32, i32
  }
  func.func @transform_6(%arg0: i32) -> (i32, i32) {
    %c0_i32 = arith.constant 0 : i32
    %c0_i32_0 = arith.constant 0 : i32
    %c0_i32_1 = arith.constant 0 : i32
    return %c0_i32, %c0_i32_0 : i32, i32
  }
  func.func @transform_7(%arg0: i32) -> (i32, i32) {
    %c0_i32 = arith.constant 0 : i32
    %c0_i32_0 = arith.constant 0 : i32
    return %arg0, %c0_i32 : i32, i32
  }
}

module attributes {stable_mosaic.version = 11 : i64} {
  func.func @kernel(%arg0: i32, %arg1: memref<32x384xbf16, #tpu.memory_space<vmem>>, %arg2: memref<384x256xbf16, #tpu.memory_space<vmem>>, %arg3: memref<1x256xf32, #tpu.memory_space<vmem>>, %arg4: memref<256x128xbf16, #tpu.memory_space<vmem>>, %arg5: memref<1x128xf32, #tpu.memory_space<vmem>>, %arg6: memref<32x128xf32, #tpu.memory_space<vmem>>) attributes {dimension_semantics = [#tpu.dimension_semantics<parallel>], iteration_bounds = array<i64: 1>, scalar_prefetch = 0 : i64, scratch_operands = 0 : i64, tpu.core_type = #tpu.core_type<tc>, window_params = [{transform_indices = @transform_0, window_bounds = array<i64: 32, 384>}, {pipeline_mode = #tpu.pipeline_mode<synchronous>, transform_indices = @transform_1, window_bounds = array<i64: 384, 256>}, {pipeline_mode = #tpu.pipeline_mode<synchronous>, transform_indices = @transform_2, window_bounds = array<i64: 1, 256>}, {pipeline_mode = #tpu.pipeline_mode<synchronous>, transform_indices = @transform_3, window_bounds = array<i64: 256, 128>}, {pipeline_mode = #tpu.pipeline_mode<synchronous>, transform_indices = @transform_4, window_bounds = array<i64: 1, 128>}, {transform_indices = @transform_5, window_bounds = array<i64: 32, 128>}]} {
    %c0 = arith.constant 0 : index
    %c0_0 = arith.constant 0 : index
    %0 = vector.load %arg1[%c0, %c0_0] : memref<32x384xbf16, #tpu.memory_space<vmem>>, vector<32x384xbf16>
    %c0_1 = arith.constant 0 : index
    %c0_2 = arith.constant 0 : index
    %1 = vector.load %arg2[%c0_1, %c0_2] : memref<384x256xbf16, #tpu.memory_space<vmem>>, vector<384x256xbf16>
    %c0_3 = arith.constant 0 : index
    %c0_4 = arith.constant 0 : index
    %2 = vector.load %arg3[%c0_3, %c0_4] : memref<1x256xf32, #tpu.memory_space<vmem>>, vector<1x256xf32>
    %cst = arith.constant dense<0.000000e+00> : vector<32x256xf32>
    %3 = tpu.matmul %0, %1, %cst {dimension_numbers = #tpu.dot_dimension_numbers<[1], [0], [0], [1], [0, 0, 1, 1], [], []>} : vector<32x384xbf16>, vector<384x256xbf16>, vector<32x256xf32> -> vector<32x256xf32>
    %4 = vector.broadcast %2 : vector<1x256xf32> to vector<32x256xf32>
    %5 = arith.addf %3, %4 : vector<32x256xf32>
    %cst_5 = arith.constant 0.000000e+00 : f32
    %6 = vector.broadcast %cst_5 : f32 to vector<32x256xf32>
    %7 = arith.maximumf %5, %6 : vector<32x256xf32>
    %8 = arith.truncf %7 : vector<32x256xf32> to vector<32x256xbf16>
    %c0_6 = arith.constant 0 : index
    %c0_7 = arith.constant 0 : index
    %9 = vector.load %arg4[%c0_6, %c0_7] : memref<256x128xbf16, #tpu.memory_space<vmem>>, vector<256x128xbf16>
    %c0_8 = arith.constant 0 : index
    %c0_9 = arith.constant 0 : index
    %10 = vector.load %arg5[%c0_8, %c0_9] : memref<1x128xf32, #tpu.memory_space<vmem>>, vector<1x128xf32>
    %cst_10 = arith.constant dense<0.000000e+00> : vector<32x128xf32>
    %11 = tpu.matmul %8, %9, %cst_10 {dimension_numbers = #tpu.dot_dimension_numbers<[1], [0], [0], [1], [0, 0, 1, 1], [], []>} : vector<32x256xbf16>, vector<256x128xbf16>, vector<32x128xf32> -> vector<32x128xf32>
    %12 = vector.broadcast %10 : vector<1x128xf32> to vector<32x128xf32>
    %13 = arith.addf %11, %12 : vector<32x128xf32>
    %cst_11 = arith.constant 0.000000e+00 : f32
    %14 = vector.broadcast %cst_11 : f32 to vector<32x128xf32>
    %15 = arith.maximumf %13, %14 : vector<32x128xf32>
    %c0_12 = arith.constant 0 : index
    %c0_13 = arith.constant 0 : index
    %16 = vector.load %arg6[%c0_12, %c0_13] : memref<32x128xf32, #tpu.memory_space<vmem>>, vector<32x128xf32>
    tpu.vector_store %arg6[%c0_12, %c0_13], %15 {strides = array<i32>} : memref<32x128xf32, #tpu.memory_space<vmem>>, vector<32x128xf32>,
    return
  }
  func.func @transform_0(%arg0: i32) -> (i32, i32) {
    %c0_i32 = arith.constant 0 : i32
    %c0_i32_0 = arith.constant 0 : i32
    return %arg0, %c0_i32 : i32, i32
  }
  func.func @transform_1(%arg0: i32) -> (i32, i32) {
    %c0_i32 = arith.constant 0 : i32
    %c0_i32_0 = arith.constant 0 : i32
    %c0_i32_1 = arith.constant 0 : i32
    return %c0_i32, %c0_i32_0 : i32, i32
  }
  func.func @transform_2(%arg0: i32) -> (i32, i32) {
    %c0_i32 = arith.constant 0 : i32
    %c0_i32_0 = arith.constant 0 : i32
    %c0_i32_1 = arith.constant 0 : i32
    return %c0_i32, %c0_i32_0 : i32, i32
  }
  func.func @transform_3(%arg0: i32) -> (i32, i32) {
    %c0_i32 = arith.constant 0 : i32
    %c0_i32_0 = arith.constant 0 : i32
    %c0_i32_1 = arith.constant 0 : i32
    return %c0_i32, %c0_i32_0 : i32, i32
  }
  func.func @transform_4(%arg0: i32) -> (i32, i32) {
    %c0_i32 = arith.constant 0 : i32
    %c0_i32_0 = arith.constant 0 : i32
    %c0_i32_1 = arith.constant 0 : i32
    return %c0_i32, %c0_i32_0 : i32, i32
  }
  func.func @transform_5(%arg0: i32) -> (i32, i32) {
    %c0_i32 = arith.constant 0 : i32
    %c0_i32_0 = arith.constant 0 : i32
    return %arg0, %c0_i32 : i32, i32
  }
}

module attributes {stable_mosaic.version = 11 : i64} {
  func.func @kernel(%arg0: i32, %arg1: memref<128x128xbf16, #tpu.memory_space<vmem>>, %arg2: memref<128x128xbf16, #tpu.memory_space<vmem>>, %arg3: memref<1x128xf32, #tpu.memory_space<vmem>>, %arg4: memref<128x128xbf16, #tpu.memory_space<vmem>>, %arg5: memref<1x128xf32, #tpu.memory_space<vmem>>, %arg6: memref<128x128xbf16, #tpu.memory_space<vmem>>, %arg7: memref<1x128xf32, #tpu.memory_space<vmem>>, %arg8: memref<128x128xf32, #tpu.memory_space<vmem>>) attributes {dimension_semantics = [#tpu.dimension_semantics<parallel>], iteration_bounds = array<i64: 1>, scalar_prefetch = 0 : i64, scratch_operands = 0 : i64, tpu.core_type = #tpu.core_type<tc>, window_params = [{transform_indices = @transform_0, window_bounds = array<i64: 128, 128>}, {pipeline_mode = #tpu.pipeline_mode<synchronous>, transform_indices = @transform_1, window_bounds = array<i64: 128, 128>}, {pipeline_mode = #tpu.pipeline_mode<synchronous>, transform_indices = @transform_2, window_bounds = array<i64: 1, 128>}, {pipeline_mode = #tpu.pipeline_mode<synchronous>, transform_indices = @transform_3, window_bounds = array<i64: 128, 128>}, {pipeline_mode = #tpu.pipeline_mode<synchronous>, transform_indices = @transform_4, window_bounds = array<i64: 1, 128>}, {pipeline_mode = #tpu.pipeline_mode<synchronous>, transform_indices = @transform_5, window_bounds = array<i64: 128, 128>}, {pipeline_mode = #tpu.pipeline_mode<synchronous>, transform_indices = @transform_6, window_bounds = array<i64: 1, 128>}, {transform_indices = @transform_7, window_bounds = array<i64: 128, 128>}]} {
    %c0 = arith.constant 0 : index
    %c0_0 = arith.constant 0 : index
    %0 = vector.load %arg1[%c0, %c0_0] : memref<128x128xbf16, #tpu.memory_space<vmem>>, vector<128x128xbf16>
    %c0_1 = arith.constant 0 : index
    %c0_2 = arith.constant 0 : index
    %1 = vector.load %arg2[%c0_1, %c0_2] : memref<128x128xbf16, #tpu.memory_space<vmem>>, vector<128x128xbf16>
    %c0_3 = arith.constant 0 : index
    %c0_4 = arith.constant 0 : index
    %2 = vector.load %arg3[%c0_3, %c0_4] : memref<1x128xf32, #tpu.memory_space<vmem>>, vector<1x128xf32>
    %cst = arith.constant dense<0.000000e+00> : vector<128x128xf32>
    %3 = tpu.matmul %0, %1, %cst {dimension_numbers = #tpu.dot_dimension_numbers<[1], [0], [0], [1], [0, 0, 1, 1], [], []>} : vector<128x128xbf16>, vector<128x128xbf16>, vector<128x128xf32> -> vector<128x128xf32>
    %4 = vector.broadcast %2 : vector<1x128xf32> to vector<128x128xf32>
    %5 = arith.addf %3, %4 : vector<128x128xf32>
    %cst_5 = arith.constant 0.000000e+00 : f32
    %6 = vector.broadcast %cst_5 : f32 to vector<128x128xf32>
    %7 = arith.maximumf %5, %6 : vector<128x128xf32>
    %8 = arith.truncf %7 : vector<128x128xf32> to vector<128x128xbf16>
    %c0_6 = arith.constant 0 : index
    %c0_7 = arith.constant 0 : index
    %9 = vector.load %arg4[%c0_6, %c0_7] : memref<128x128xbf16, #tpu.memory_space<vmem>>, vector<128x128xbf16>
    %c0_8 = arith.constant 0 : index
    %c0_9 = arith.constant 0 : index
    %10 = vector.load %arg5[%c0_8, %c0_9] : memref<1x128xf32, #tpu.memory_space<vmem>>, vector<1x128xf32>
    %cst_10 = arith.constant dense<0.000000e+00> : vector<128x128xf32>
    %11 = tpu.matmul %8, %9, %cst_10 {dimension_numbers = #tpu.dot_dimension_numbers<[1], [0], [0], [1], [0, 0, 1, 1], [], []>} : vector<128x128xbf16>, vector<128x128xbf16>, vector<128x128xf32> -> vector<128x128xf32>
    %12 = vector.broadcast %10 : vector<1x128xf32> to vector<128x128xf32>
    %13 = arith.addf %11, %12 : vector<128x128xf32>
    %cst_11 = arith.constant 0.000000e+00 : f32
    %14 = vector.broadcast %cst_11 : f32 to vector<128x128xf32>
    %15 = arith.maximumf %13, %14 : vector<128x128xf32>
    %16 = arith.truncf %15 : vector<128x128xf32> to vector<128x128xbf16>
    %c0_12 = arith.constant 0 : index
    %c0_13 = arith.constant 0 : index
    %17 = vector.load %arg6[%c0_12, %c0_13] : memref<128x128xbf16, #tpu.memory_space<vmem>>, vector<128x128xbf16>
    %c0_14 = arith.constant 0 : index
    %c0_15 = arith.constant 0 : index
    %18 = vector.load %arg7[%c0_14, %c0_15] : memref<1x128xf32, #tpu.memory_space<vmem>>, vector<1x128xf32>
    %cst_16 = arith.constant dense<0.000000e+00> : vector<128x128xf32>
    %19 = tpu.matmul %16, %17, %cst_16 {dimension_numbers = #tpu.dot_dimension_numbers<[1], [0], [0], [1], [0, 0, 1, 1], [], []>} : vector<128x128xbf16>, vector<128x128xbf16>, vector<128x128xf32> -> vector<128x128xf32>
    %20 = vector.broadcast %18 : vector<1x128xf32> to vector<128x128xf32>
    %21 = arith.addf %19, %20 : vector<128x128xf32>
    %cst_17 = arith.constant 0.000000e+00 : f32
    %22 = vector.broadcast %cst_17 : f32 to vector<128x128xf32>
    %23 = arith.maximumf %21, %22 : vector<128x128xf32>
    %c0_18 = arith.constant 0 : index
    %c0_19 = arith.constant 0 : index
    %24 = vector.load %arg8[%c0_18, %c0_19] : memref<128x128xf32, #tpu.memory_space<vmem>>, vector<128x128xf32>
    tpu.vector_store %arg8[%c0_18, %c0_19], %23 {strides = array<i32>} : memref<128x128xf32, #tpu.memory_space<vmem>>, vector<128x128xf32>,
    return
  }
  func.func @transform_0(%arg0: i32) -> (i32, i32) {
    %c0_i32 = arith.constant 0 : i32
    %c0_i32_0 = arith.constant 0 : i32
    return %arg0, %c0_i32 : i32, i32
  }
  func.func @transform_1(%arg0: i32) -> (i32, i32) {
    %c0_i32 = arith.constant 0 : i32
    %c0_i32_0 = arith.constant 0 : i32
    %c0_i32_1 = arith.constant 0 : i32
    return %c0_i32, %c0_i32_0 : i32, i32
  }
  func.func @transform_2(%arg0: i32) -> (i32, i32) {
    %c0_i32 = arith.constant 0 : i32
    %c0_i32_0 = arith.constant 0 : i32
    %c0_i32_1 = arith.constant 0 : i32
    return %c0_i32, %c0_i32_0 : i32, i32
  }
  func.func @transform_3(%arg0: i32) -> (i32, i32) {
    %c0_i32 = arith.constant 0 : i32
    %c0_i32_0 = arith.constant 0 : i32
    %c0_i32_1 = arith.constant 0 : i32
    return %c0_i32, %c0_i32_0 : i32, i32
  }
  func.func @transform_4(%arg0: i32) -> (i32, i32) {
    %c0_i32 = arith.constant 0 : i32
    %c0_i32_0 = arith.constant 0 : i32
    %c0_i32_1 = arith.constant 0 : i32
    return %c0_i32, %c0_i32_0 : i32, i32
  }
  func.func @transform_5(%arg0: i32) -> (i32, i32) {
    %c0_i32 = arith.constant 0 : i32
    %c0_i32_0 = arith.constant 0 : i32
    %c0_i32_1 = arith.constant 0 : i32
    return %c0_i32, %c0_i32_0 : i32, i32
  }
  func.func @transform_6(%arg0: i32) -> (i32, i32) {
    %c0_i32 = arith.constant 0 : i32
    %c0_i32_0 = arith.constant 0 : i32
    %c0_i32_1 = arith.constant 0 : i32
    return %c0_i32, %c0_i32_0 : i32, i32
  }
  func.func @transform_7(%arg0: i32) -> (i32, i32) {
    %c0_i32 = arith.constant 0 : i32
    %c0_i32_0 = arith.constant 0 : i32
    return %arg0, %c0_i32 : i32, i32
  }
}

</mosaic_0001>

<bundles_post_ra>
// kernel: custom-call.24
= control target key start
LH: loop header
LB: loop body
LE: loop exit
PB: predicated region body
PF: predicated region fallthrough
CT: control target
= control target key end

     0   :  { %s6_s0 = inlined_call_operand.vmem [shape: f32[2,64], index: 0, kind: output, shape index: {}]  }

// kernel: custom-call.25
= control target key start
LH: loop header
LB: loop body
LE: loop exit
PB: predicated region body
PF: predicated region fallthrough
CT: control target
= control target key end

     0   :  { %s6_s0 = inlined_call_operand.vmem [shape: f32[2,16], index: 0, kind: output, shape index: {}]  }

// kernel: pointnet2_backbone_forward.6
= control target key start
LH: loop header
LB: loop body
LE: loop exit
PB: predicated region body
PF: predicated region fallthrough
CT: control target
= control target key end

     0   :  { %vm676_vm0 = vcmask 1043456   ;;  %vm483_vm1 = vcmask 64512   ;;  %vm1440_vm2 = vcmask 261120   ;;  %s5400_s1 = inlined_call_operand.vmem [shape: bf16[8,32], index: 1, kind: input, shape index: {}]   ;;  %s5401_s0 = inlined_call_operand.vmem [shape: bf16[1024,8], index: 0, kind: input, shape index: {}]   ;;  %s5402_s3 = inlined_call_operand.vmem [shape: bf16[32,32], index: 3, kind: input, shape index: {}]   ;;  %s5403_s5 = inlined_call_operand.vmem [shape: bf16[32,128], index: 5, kind: input, shape index: {}]   ;;  %s5404_s2 = inlined_call_operand.vmem [shape: f32[1,32], index: 2, kind: input, shape index: {}]   ;;  %s5405_s4 = inlined_call_operand.vmem [shape: f32[1,32], index: 4, kind: input, shape index: {}]   ;;  %s5406_s6 = inlined_call_operand.vmem [shape: f32[1,128], index: 6, kind: input, shape index: {}]   ;;  %s5407_s7 = inlined_call_operand.vmem [shape: f32[32,128], index: 7, kind: output, shape index: {}]  }
   0x1   :  { %v155_v0 = vld [vmem:[%s5400_s1] sm:$0xf]  ;;  %v4249_v3 = vld [vmem:[%s5401_s0 + $0x8] sm:$0xff]   ;;  %v4250_v4 = vld [vmem:[%s5401_s0 + $0x10] sm:$0xff]  }
   0x2   :  { %4246 = vmatprep.subr.msk.bf16.mxu0 %vm676_vm0, %v155_v0  ;;  %v678_v1 = vsel %vm676_vm0, %v155_v0, 0  ;;  %v4248_v2 = vld [vmem:[%s5401_s0] sm:$0xff]   ;;  %4247 = vmatprep.subr.msk.bf16.mxu1 %vm676_vm0, %v155_v0  ;;  %v4251_v5 = vld [vmem:[%s5401_s0 + $0x18] sm:$0xff]   ;;  %v4253_v7 = vld [vmem:[%s5401_s0 + $0x28] sm:$0xff]  }
   0x3   :  { %3851 = vmatpush3.bf16.msra.mxu0 %v678_v1  ;;  %4245 = vmatpush3.bf16.msra.mxu1 %v678_v1  ;;  %v4252_v6 = vld [vmem:[%s5401_s0 + $0x20] sm:$0xff]   ;;  %v4254_v8 = vld [vmem:[%s5401_s0 + $0x30] sm:$0xff]   ;;  %v4269_v10 = vld [vmem:[%s5401_s0 + $0x108] sm:$0xff]  }
   0x4   :  { %3852 = vmatprep.mubr.msk.bf16.mxu0 %vm483_vm1, %v4248_v2  ;;  %v4267_v9 = vld [vmem:[%s5401_s0 + $0x100] sm:$0xff]   ;;  %v4270_v11 = vld [vmem:[%s5402_s3 + $0x8] sm:$0xff]   ;;  %v4255_v12 = vld [vmem:[%s5401_s0 + $0x38] sm:$0xff]  }
   0x5   :  { %3916 = vmatprep.mubr.msk.bf16.mxu1 %vm483_vm1, %v4267_v9  ;;  %3980 = vmatprep.subr.bf16.mxu1 %v4270_v11  ;;  %v4272_v13 = vld [vmem:[%s5401_s0 + $0x110] sm:$0xff]   ;;  %v4256_v14 = vld [vmem:[%s5401_s0 + $0x40] sm:$0xff]   ;;  %v4274_v15 = vld [vmem:[%s5401_s0 + $0x118] sm:$0xff]  }
   0x6   :  { %3853 = vmatmul.mubr.msk.bf16.vlgmr.msra.gmra.mxu0 %vm483_vm1, %v4249_v3  ;;  %3917 = vmatmul.mubr.msk.bf16.vlgmr.msra.gmra.mxu1 %vm483_vm1, %v4269_v10  ;;  %v4276_v16 = vld [vmem:[%s5401_s0 + $0x120] sm:$0xff]   ;;  %v4257_v17 = vld [vmem:[%s5401_s0 + $0x48] sm:$0xff]   ;;  %v4258_v18 = vld [vmem:[%s5401_s0 + $0x50] sm:$0xff]  }
   0x7   :  { %3856 = vmatprep.mubr.msk.bf16.mxu0 %vm483_vm1, %v4250_v4  ;;  %3981 = vmatpush3.bf16.msra.mxu1 %v4270_v11  ;;  %v4278_v19 = vld [vmem:[%s5401_s0 + $0x128] sm:$0xff]   ;;  %v4280_v20 = vld [vmem:[%s5401_s0 + $0x130] sm:$0xff]   ;;  %v4259_v21 = vld [vmem:[%s5401_s0 + $0x58] sm:$0xff]  }
   0x8   :  { %3920 = vmatprep.mubr.msk.bf16.mxu1 %vm483_vm1, %v4272_v13  ;;  %v4260_v22 = vld [vmem:[%s5401_s0 + $0x60] sm:$0xff]   ;;  %v4282_v23 = vld [vmem:[%s5401_s0 + $0x138] sm:$0xff]   ;;  %v4261_v25 = vld [vmem:[%s5401_s0 + $0x68] sm:$0xff]  }
   0x9   :  { %v4284_v24 = vld [vmem:[%s5401_s0 + $0x140] sm:$0xff]   ;;  %v4262_v26 = vld [vmem:[%s5401_s0 + $0x70] sm:$0xff]   ;;  %v4286_v27 = vld [vmem:[%s5401_s0 + $0x148] sm:$0xff]  }
   0xa   :  { %v4299_v28 = vld [vmem:[%s5402_s3] sm:$0xff]   ;;  %v4288_v29 = vld [vmem:[%s5401_s0 + $0x150] sm:$0xff]   ;;  %v4263_v30 = vld [vmem:[%s5401_s0 + $0x78] sm:$0xff]  }
   0xb   :  { %3982 = vmatprep.subr.bf16.mxu1 %v4299_v28  ;;  %v4264_v31 = vld [vmem:[%s5401_s0 + $0x80] sm:$0xff]   ;;  %v4290_v32 = vld [vmem:[%s5401_s0 + $0x158] sm:$0xff]   ;;  %v4265_v34 = vld [vmem:[%s5401_s0 + $0x88] sm:$0xff]  }
   0xc   :  { %3983 = vmatpush3.bf16.msra.mxu1 %v4299_v28  ;;  %v4292_v33 = vld [vmem:[%s5401_s0 + $0x160] sm:$0xff]   ;;  %v4266_v35 = vld [vmem:[%s5401_s0 + $0x90] sm:$0xff]   ;;  %v4294_v36 = vld [vmem:[%s5401_s0 + $0x168] sm:$0xff]  }
   0xd   :  { %v4295_v37 = vld [vmem:[%s5401_s0 + $0x170] sm:$0xff]   ;;  %v4268_v38 = vld [vmem:[%s5401_s0 + $0x98] sm:$0xff]   ;;  %v4271_v39 = vld [vmem:[%s5401_s0 + $0xa0] sm:$0xff]  }
   0xe   :  { %3857 = vmatmul.mubr.msk.bf16.gmra.mxu0 %vm483_vm1, %v4251_v5  ;;  %3921 = vmatmul.mubr.msk.bf16.gmra.mxu1 %vm483_vm1, %v4274_v15  ;;  %v4296_v40 = vld [vmem:[%s5401_s0 + $0x178] sm:$0xff]   ;;  %v4297_v41 = vld [vmem:[%s5401_s0 + $0x180] sm:$0xff]   ;;  %v4273_v42 = vld [vmem:[%s5401_s0 + $0xa8] sm:$0xff]  }
   0xf   :  { %3860 = vmatprep.mubr.msk.bf16.mxu0 %vm483_vm1, %v4252_v6  ;;  %3924 = vmatprep.mubr.msk.bf16.mxu1 %vm483_vm1, %v4276_v16  ;;  %v4275_v43 = vld [vmem:[%s5401_s0 + $0xb0] sm:$0xff]   ;;  %v4298_v44 = vld [vmem:[%s5401_s0 + $0x188] sm:$0xff]   ;;  %v4277_v46 = vld [vmem:[%s5401_s0 + $0xb8] sm:$0xff]  }
  0x10   :  { %v4300_v45 = vld [vmem:[%s5401_s0 + $0x190] sm:$0xff]   ;;  %v4279_v47 = vld [vmem:[%s5401_s0 + $0xc0] sm:$0xff]   ;;  %v4301_v48 = vld [vmem:[%s5401_s0 + $0x198] sm:$0xff]  }
  0x11   :  { %v4302_v49 = vld [vmem:[%s5401_s0 + $0x1a0] sm:$0xff]   ;;  %v4281_v50 = vld [vmem:[%s5401_s0 + $0xc8] sm:$0xff]   ;;  %v4283_v51 = vld [vmem:[%s5401_s0 + $0xd0] sm:$0xff]  }
  0x12   :  { %v4303_v52 = vld [vmem:[%s5401_s0 + $0x1a8] sm:$0xff]   ;;  %v4304_v53 = vld [vmem:[%s5401_s0 + $0x1b0] sm:$0xff]   ;;  %v4285_v54 = vld [vmem:[%s5401_s0 + $0xd8] sm:$0xff]  }
  0x13   :  { %v4287_v55 = vld [vmem:[%s5401_s0 + $0xe0] sm:$0xff]   ;;  %v4305_v56 = vld [vmem:[%s5401_s0 + $0x1b8] sm:$0xff]   ;;  %v4289_v58 = vld [vmem:[%s5401_s0 + $0xe8] sm:$0xff]  }
  0x14   :  { %v4306_v57 = vld [vmem:[%s5401_s0 + $0x1c0] sm:$0xff]   ;;  %v4291_v59 = vld [vmem:[%s5401_s0 + $0xf0] sm:$0xff]   ;;  %v4307_v60 = vld [vmem:[%s5401_s0 + $0x1c8] sm:$0xff]  }
  0x15   :  { %v4308_v61 = vld [vmem:[%s5401_s0 + $0x1d0] sm:$0xff]   ;;  %v4293_v62 = vld [vmem:[%s5401_s0 + $0xf8] sm:$0xff]   ;;  %v4310_v0 = vld [vmem:[%s5401_s0 + $0x1e0] sm:$0xff]  }
  0x16   :  { %3861 = vmatmul.mubr.msk.bf16.gmra.mxu0 %vm483_vm1, %v4253_v7  ;;  %3925 = vmatmul.mubr.msk.bf16.gmra.mxu1 %vm483_vm1, %v4278_v19  ;;  %v4309_v63 = vld [vmem:[%s5401_s0 + $0x1d8] sm:$0xff]   ;;  %v4311_v1 = vld [vmem:[%s5401_s0 + $0x1e8] sm:$0xff]   ;;  %v4312_v2 = vld [vmem:[%s5401_s0 + $0x1f0] sm:$0xff]  }
  0x17   :  { %3864 = vmatprep.mubr.msk.bf16.mxu0 %vm483_vm1, %v4254_v8  ;;  %3928 = vmatprep.mubr.msk.bf16.mxu1 %vm483_vm1, %v4280_v20  ;;  %v4313_v3 = vld [vmem:[%s5401_s0 + $0x1f8] sm:$0xff]   ;;  %v4314_v4 = vld [vmem:[%s5403_s5 + $0x8] sm:$0xff]   ;;  %v4630_v7 = vld [vmem:[%s5404_s2] ss:$0 sm:$0xff] }
  0x18   :  { %4112 = vmatprep.subr.bf16.mxu0 %v4314_v4 }
  0x19   :  { %4113 = vmatpush3.bf16.msra.mxu0 %v4314_v4 }
  0x1e   :  { %3865 = vmatmul.mubr.msk.bf16.gmra.mxu0 %vm483_vm1, %v4255_v12  ;;  %3929 = vmatmul.mubr.msk.bf16.gmra.mxu1 %vm483_vm1, %v4282_v23 }
  0x1f   :  { %3868 = vmatprep.mubr.msk.bf16.mxu0 %vm483_vm1, %v4256_v14  ;;  %3932 = vmatprep.mubr.msk.bf16.mxu1 %vm483_vm1, %v4284_v24 }
  0x26   :  { %3869 = vmatmul.mubr.msk.bf16.gmra.mxu0 %vm483_vm1, %v4257_v17  ;;  %3933 = vmatmul.mubr.msk.bf16.gmra.mxu1 %vm483_vm1, %v4286_v27 }
  0x27   :  { %3872 = vmatprep.mubr.msk.bf16.mxu0 %vm483_vm1, %v4258_v18  ;;  %3936 = vmatprep.mubr.msk.bf16.mxu1 %vm483_vm1, %v4288_v29 }
  0x2e   :  { %3873 = vmatmul.mubr.msk.bf16.gmra.mxu0 %vm483_vm1, %v4259_v21  ;;  %3937 = vmatmul.mubr.msk.bf16.gmra.mxu1 %vm483_vm1, %v4290_v32 }
  0x2f   :  { %3876 = vmatprep.mubr.msk.bf16.mxu0 %vm483_vm1, %v4260_v22  ;;  %3940 = vmatprep.mubr.msk.bf16.mxu1 %vm483_vm1, %v4292_v33 }
  0x36   :  { %3877 = vmatmul.mubr.msk.bf16.gmra.mxu0 %vm483_vm1, %v4261_v25  ;;  %3941 = vmatmul.mubr.msk.bf16.gmra.mxu1 %vm483_vm1, %v4294_v36 }
  0x37   :  { %3880 = vmatprep.mubr.msk.bf16.mxu0 %vm483_vm1, %v4262_v26  ;;  %3944 = vmatprep.mubr.msk.bf16.mxu1 %vm483_vm1, %v4295_v37 }
  0x3e   :  { %3881 = vmatmul.mubr.msk.bf16.gmra.mxu0 %vm483_vm1, %v4263_v30  ;;  %3945 = vmatmul.mubr.msk.bf16.gmra.mxu1 %vm483_vm1, %v4296_v40 }
  0x3f   :  { %3884 = vmatprep.mubr.msk.bf16.mxu0 %vm483_vm1, %v4264_v31  ;;  %3948 = vmatprep.mubr.msk.bf16.mxu1 %vm483_vm1, %v4297_v41 }
  0x46   :  { %3885 = vmatmul.mubr.msk.bf16.gmra.mxu0 %vm483_vm1, %v4265_v34  ;;  %3949 = vmatmul.mubr.msk.bf16.gmra.mxu1 %vm483_vm1, %v4298_v44 }
  0x47   :  { %3888 = vmatprep.mubr.msk.bf16.mxu0 %vm483_vm1, %v4266_v35  ;;  %3952 = vmatprep.mubr.msk.bf16.mxu1 %vm483_vm1, %v4300_v45  ;;  %v4315_v45 = vld [vmem:[%s5403_s5] sm:$0xff]  }
  0x48   :  { %4114 = vmatprep.subr.bf16.mxu0 %v4315_v45 }
  0x49   :  { %4115 = vmatpush3.bf16.msra.mxu0 %v4315_v45 }
  0x4e   :  { %3889 = vmatmul.mubr.msk.bf16.gmra.mxu0 %vm483_vm1, %v4268_v38  ;;  %3953 = vmatmul.mubr.msk.bf16.gmra.mxu1 %vm483_vm1, %v4301_v48 }
  0x4f   :  { %3892 = vmatprep.mubr.msk.bf16.mxu0 %vm483_vm1, %v4271_v39  ;;  %3956 = vmatprep.mubr.msk.bf16.mxu1 %vm483_vm1, %v4302_v49 }
  0x56   :  { %3893 = vmatmul.mubr.msk.bf16.gmra.mxu0 %vm483_vm1, %v4273_v42  ;;  %3957 = vmatmul.mubr.msk.bf16.gmra.mxu1 %vm483_vm1, %v4303_v52 }
  0x57   :  { %3896 = vmatprep.mubr.msk.bf16.mxu0 %vm483_vm1, %v4275_v43  ;;  %3960 = vmatprep.mubr.msk.bf16.mxu1 %vm483_vm1, %v4304_v53 }
  0x5e   :  { %3897 = vmatmul.mubr.msk.bf16.gmra.mxu0 %vm483_vm1, %v4277_v46  ;;  %3961 = vmatmul.mubr.msk.bf16.gmra.mxu1 %vm483_vm1, %v4305_v56 }
  0x5f   :  { %3900 = vmatprep.mubr.msk.bf16.mxu0 %vm483_vm1, %v4279_v47  ;;  %3964 = vmatprep.mubr.msk.bf16.mxu1 %vm483_vm1, %v4306_v57 }
  0x66   :  { %3901 = vmatmul.mubr.msk.bf16.gmra.mxu0 %vm483_vm1, %v4281_v50  ;;  %3965 = vmatmul.mubr.msk.bf16.gmra.mxu1 %vm483_vm1, %v4307_v60 }
  0x67   :  { %3904 = vmatprep.mubr.msk.bf16.mxu0 %vm483_vm1, %v4283_v51  ;;  %3968 = vmatprep.mubr.msk.bf16.mxu1 %vm483_vm1, %v4308_v61 }
  0x6e   :  { %3905 = vmatmul.mubr.msk.bf16.gmra.mxu0 %vm483_vm1, %v4285_v54  ;;  %3969 = vmatmul.mubr.msk.bf16.gmra.mxu1 %vm483_vm1, %v4309_v63 }
  0x6f   :  { %3908 = vmatprep.mubr.msk.bf16.mxu0 %vm483_vm1, %v4287_v55  ;;  %3972 = vmatprep.mubr.msk.bf16.mxu1 %vm483_vm1, %v4310_v0 }
  0x76   :  { %3909 = vmatmul.mubr.msk.bf16.gmra.mxu0 %vm483_vm1, %v4289_v58  ;;  %3973 = vmatmul.mubr.msk.bf16.gmra.mxu1 %vm483_vm1, %v4311_v1 }
  0x77   :  { %3912 = vmatprep.mubr.msk.bf16.mxu0 %vm483_vm1, %v4291_v59  ;;  %3976 = vmatprep.mubr.msk.bf16.mxu1 %vm483_vm1, %v4312_v2 }
  0x7e   :  { %3913 = vmatmul.mubr.msk.bf16.gmra.mxu0 %vm483_vm1, %v4293_v62  ;;  %3977 = vmatmul.mubr.msk.bf16.gmra.mxu1 %vm483_vm1, %v4313_v3 }
  0xc6   :  { %v3854_v5 = vpop.f32.mrf.mxu0  ;;  %v4642_v35 = vpop.f32.mrf.mxu1 }
  0xc7   :  { %v723_v11 = vadd.f32 %v3854_v5, %v4630_v7 }
  0xc8   :  { %v714_v6 = vpop.f32.mrf.mxu0  ;;  %v4647_v40 = vpop.f32.mrf.mxu1 }
  0xc9   :  { %v715_v9 = vadd.f32 %v4630_v7, %v714_v6  ;;  %v1227_v18 = vmax.f32 %v723_v11, 0.0 }
  0xca   :  { %v3855_v8 = vpop.f32.mrf.mxu0  ;;  %v4652_v44 = vpop.f32.mrf.mxu1 }
  0xcb   :  { %v726_v10 = vadd.f32 %v3855_v8, %v4630_v7  ;;  %v1225_v16 = vmax.f32 %v715_v9, 0.0 }
  0xcc   :  { %v717_v12 = vpop.f32.mrf.mxu0  ;;  %v4657_v50 = vpop.f32.mrf.mxu1 }
  0xcd   :  { %v718_v13 = vadd.f32 %v4630_v7, %v717_v12  ;;  %v1228_v14 = vmax.f32 %v726_v10, 0.0 }
  0xce   :  { %v3858_v15 = vpop.f32.mrf.mxu0  ;;  %v4659_v54 = vpop.f32.mrf.mxu1 }
  0xcf   :  { %v1226_v17 = vmax.f32 %v718_v13, 0.0  ;;  %v1354_v21 = vpack.c.bf16 %v1228_v14, %v1227_v18  ;;  %v739_v25 = vadd.f32 %v3858_v15, %v4630_v7 }
  0xd0   :  { %v730_v19 = vpop.f32.mrf.mxu0  ;;  %v4664_v59 = vpop.f32.mrf.mxu1 }
  0xd1   :  { %v1353_v20 = vpack.c.bf16 %v1226_v17, %v1225_v16  ;;  %v731_v23 = vadd.f32 %v4630_v7, %v730_v19  ;;  %v1231_v32 = vmax.f32 %v739_v25, 0.0 }
  0xd2   :  { %v3859_v22 = vpop.f32.mrf.mxu0  ;;  %v4669_v63 = vpop.f32.mrf.mxu1 }
  0xd3   :  { %v742_v24 = vadd.f32 %v3859_v22, %v4630_v7  ;;  %3984 = vmatprep.mubr.msk.bf16.mxu1 %vm1440_vm2, %v1353_v20  ;;  %v1229_v30 = vmax.f32 %v731_v23, 0.0 }
  0xd4   :  { %v733_v26 = vpop.f32.mrf.mxu0  ;;  %3985 = vmatmul.mubr.msk.bf16.vlgmr.msra.gmra.mxu1 %vm1440_vm2, %v1354_v21  ;;  %v4671_v4 = vpop.f32.mrf.mxu1 }
  0xd5   :  { %v734_v27 = vadd.f32 %v4630_v7, %v733_v26  ;;  %v1232_v28 = vmax.f32 %v742_v24, 0.0 }
  0xd6   :  { %v3862_v29 = vpop.f32.mrf.mxu0  ;;  %v4673_v9 = vpop.f32.mrf.mxu1 }
  0xd7   :  { %v1230_v31 = vmax.f32 %v734_v27, 0.0  ;;  %v1356_v36 = vpack.c.bf16 %v1232_v28, %v1231_v32  ;;  %v755_v41 = vadd.f32 %v3862_v29, %v4630_v7 }
  0xd8   :  { %v746_v33 = vpop.f32.mrf.mxu0  ;;  %v4678_v14 = vpop.f32.mrf.mxu1 }
  0xd9   :  { %v1355_v34 = vpack.c.bf16 %v1230_v31, %v1229_v30  ;;  %v747_v38 = vadd.f32 %v4630_v7, %v746_v33  ;;  %v1235_v51 = vmax.f32 %v755_v41, 0.0 }
  0xda   :  { %v3863_v37 = vpop.f32.mrf.mxu0  ;;  %v4683_v18 = vpop.f32.mrf.mxu1 }
  0xdb   :  { %v758_v39 = vadd.f32 %v3863_v37, %v4630_v7  ;;  %3988 = vmatprep.mubr.msk.bf16.mxu1 %vm1440_vm2, %v1355_v34  ;;  %v1233_v48 = vmax.f32 %v747_v38, 0.0 }
  0xdc   :  { %v749_v42 = vpop.f32.mrf.mxu0  ;;  %3989 = vmatmul.mubr.msk.bf16.gmra.mxu1 %vm1440_vm2, %v1356_v36  ;;  %v4685_v23 = vpop.f32.mrf.mxu1 }
  0xdd   :  { %v750_v43 = vadd.f32 %v4630_v7, %v749_v42  ;;  %v1236_v46 = vmax.f32 %v758_v39, 0.0 }
  0xde   :  { %v3866_v47 = vpop.f32.mrf.mxu0  ;;  %v4687_v27 = vpop.f32.mrf.mxu1 }
  0xdf   :  { %v1234_v49 = vmax.f32 %v750_v43, 0.0  ;;  %v1358_v55 = vpack.c.bf16 %v1236_v46, %v1235_v51  ;;  %v771_v60 = vadd.f32 %v3866_v47, %v4630_v7 }
  0xe0   :  { %v762_v52 = vpop.f32.mrf.mxu0  ;;  %v4692_v32 = vpop.f32.mrf.mxu1 }
  0xe1   :  { %v1357_v53 = vpack.c.bf16 %v1234_v49, %v1233_v48  ;;  %v763_v57 = vadd.f32 %v4630_v7, %v762_v52  ;;  %v1239_v5 = vmax.f32 %v771_v60, 0.0 }
  0xe2   :  { %v3867_v56 = vpop.f32.mrf.mxu0  ;;  %v4697_v37 = vpop.f32.mrf.mxu1 }
  0xe3   :  { %v774_v58 = vadd.f32 %v3867_v56, %v4630_v7  ;;  %3992 = vmatprep.mubr.msk.bf16.mxu1 %vm1440_vm2, %v1357_v53  ;;  %v1237_v2 = vmax.f32 %v763_v57, 0.0 }
  0xe4   :  { %v765_v61 = vpop.f32.mrf.mxu0  ;;  %3993 = vmatmul.mubr.msk.bf16.gmra.mxu1 %vm1440_vm2, %v1358_v55  ;;  %v4699_v43 = vpop.f32.mrf.mxu1 }
  0xe5   :  { %v766_v62 = vadd.f32 %v4630_v7, %v765_v61  ;;  %v1240_v0 = vmax.f32 %v774_v58, 0.0 }
  0xe6   :  { %v3870_v1 = vpop.f32.mrf.mxu0  ;;  %v4701_v48 = vpop.f32.mrf.mxu1 }
  0xe7   :  { %v1238_v3 = vmax.f32 %v766_v62, 0.0  ;;  %v1360_v10 = vpack.c.bf16 %v1240_v0, %v1239_v5  ;;  %v787_v15 = vadd.f32 %v3870_v1, %v4630_v7 }
  0xe8   :  { %v778_v6 = vpop.f32.mrf.mxu0  ;;  %v4706_v55 = vpop.f32.mrf.mxu1 }
  0xe9   :  { %v1359_v8 = vpack.c.bf16 %v1238_v3, %v1237_v2  ;;  %v779_v12 = vadd.f32 %v4630_v7, %v778_v6  ;;  %v1243_v24 = vmax.f32 %v787_v15, 0.0 }
  0xea   :  { %v3871_v11 = vpop.f32.mrf.mxu0  ;;  %v4711_v60 = vpop.f32.mrf.mxu1 }
  0xeb   :  { %v790_v13 = vadd.f32 %v3871_v11, %v4630_v7  ;;  %3996 = vmatprep.mubr.msk.bf16.mxu1 %vm1440_vm2, %v1359_v8  ;;  %v1241_v21 = vmax.f32 %v779_v12, 0.0 }
  0xec   :  { %v781_v16 = vpop.f32.mrf.mxu0  ;;  %3997 = vmatmul.mubr.msk.bf16.gmra.mxu1 %vm1440_vm2, %v1360_v10  ;;  %v4713_v2 = vpop.f32.mrf.mxu1 }
  0xed   :  { %v782_v17 = vadd.f32 %v4630_v7, %v781_v16  ;;  %v1244_v19 = vmax.f32 %v790_v13, 0.0 }
  0xee   :  { %v3874_v20 = vpop.f32.mrf.mxu0  ;;  %v4715_v8 = vpop.f32.mrf.mxu1 }
  0xef   :  { %v1242_v22 = vmax.f32 %v782_v17, 0.0  ;;  %v1362_v28 = vpack.c.bf16 %v1244_v19, %v1243_v24  ;;  %v803_v33 = vadd.f32 %v3874_v20, %v4630_v7 }
  0xf0   :  { %v794_v25 = vpop.f32.mrf.mxu0  ;;  %v4720_v15 = vpop.f32.mrf.mxu1 }
  0xf1   :  { %v1361_v26 = vpack.c.bf16 %v1242_v22, %v1241_v21  ;;  %v795_v30 = vadd.f32 %v4630_v7, %v794_v25  ;;  %v1247_v45 = vmax.f32 %v803_v33, 0.0 }
  0xf2   :  { %v3875_v29 = vpop.f32.mrf.mxu0  ;;  %v4725_v20 = vpop.f32.mrf.mxu1 }
  0xf3   :  { %v806_v31 = vadd.f32 %v3875_v29, %v4630_v7  ;;  %4000 = vmatprep.mubr.msk.bf16.mxu1 %vm1440_vm2, %v1361_v26  ;;  %v1245_v41 = vmax.f32 %v795_v30, 0.0 }
  0xf4   :  { %v797_v34 = vpop.f32.mrf.mxu0  ;;  %4001 = vmatmul.mubr.msk.bf16.gmra.mxu1 %vm1440_vm2, %v1362_v28  ;;  %v4727_v26 = vpop.f32.mrf.mxu1 }
  0xf5   :  { %v798_v36 = vadd.f32 %v4630_v7, %v797_v34  ;;  %v1248_v38 = vmax.f32 %v806_v31, 0.0 }
  0xf6   :  { %v3878_v39 = vpop.f32.mrf.mxu0  ;;  %v4729_v31 = vpop.f32.mrf.mxu1 }
  0xf7   :  { %v1246_v42 = vmax.f32 %v798_v36, 0.0  ;;  %v1364_v49 = vpack.c.bf16 %v1248_v38, %v1247_v45  ;;  %v819_v56 = vadd.f32 %v3878_v39, %v4630_v7 }
  0xf8   :  { %v810_v46 = vpop.f32.mrf.mxu0  ;;  %v4734_v39 = vpop.f32.mrf.mxu1 }
  0xf9   :  { %v1363_v47 = vpack.c.bf16 %v1246_v42, %v1245_v41  ;;  %v811_v52 = vadd.f32 %v4630_v7, %v810_v46  ;;  %v1251_v3 = vmax.f32 %v819_v56, 0.0 }
  0xfa   :  { %v3879_v51 = vpop.f32.mrf.mxu0  ;;  %v4739_v46 = vpop.f32.mrf.mxu1 }
  0xfb   :  { %v822_v53 = vadd.f32 %v3879_v51, %v4630_v7  ;;  %4004 = vmatprep.mubr.msk.bf16.mxu1 %vm1440_vm2, %v1363_v47  ;;  %v1249_v0 = vmax.f32 %v811_v52, 0.0 }
  0xfc   :  { %v813_v57 = vpop.f32.mrf.mxu0  ;;  %4005 = vmatmul.mubr.msk.bf16.gmra.mxu1 %vm1440_vm2, %v1364_v49 }
  0xfd   :  { %v814_v58 = vadd.f32 %v4630_v7, %v813_v57  ;;  %v1252_v61 = vmax.f32 %v822_v53, 0.0  ;;  %v4741_v53 = vpop.f32.mrf.mxu1 }
  0xfe   :  { %v3882_v62 = vpop.f32.mrf.mxu0 }
  0xff   :  { %v1250_v1 = vmax.f32 %v814_v58, 0.0  ;;  %v1366_v10 = vpack.c.bf16 %v1252_v61, %v1251_v3  ;;  %v835_v16 = vadd.f32 %v3882_v62, %v4630_v7  ;;  %v4743_v61 = vpop.f32.mrf.mxu1 }
 0x100   :  { %v826_v5 = vpop.f32.mrf.mxu0 }
 0x101   :  { %v1365_v6 = vpack.c.bf16 %v1250_v1, %v1249_v0  ;;  %v827_v12 = vadd.f32 %v4630_v7, %v826_v5  ;;  %v1255_v28 = vmax.f32 %v835_v16, 0.0  ;;  %v4748_v5 = vpop.f32.mrf.mxu1 }
 0x102   :  { %v3883_v11 = vpop.f32.mrf.mxu0 }
 0x103   :  { %v838_v13 = vadd.f32 %v3883_v11, %v4630_v7  ;;  %4008 = vmatprep.mubr.msk.bf16.mxu1 %vm1440_vm2, %v1365_v6  ;;  %v1253_v24 = vmax.f32 %v827_v12, 0.0  ;;  %v4753_v12 = vpop.f32.mrf.mxu1 }
 0x104   :  { %v829_v17 = vpop.f32.mrf.mxu0  ;;  %4009 = vmatmul.mubr.msk.bf16.gmra.mxu1 %vm1440_vm2, %v1366_v10 }
 0x105   :  { %v830_v19 = vadd.f32 %v4630_v7, %v829_v17  ;;  %v1256_v21 = vmax.f32 %v838_v13, 0.0 }
 0x106   :  { %v3886_v22 = vpop.f32.mrf.mxu0 }
 0x107   :  { %v1254_v25 = vmax.f32 %v830_v19, 0.0  ;;  %v1368_v33 = vpack.c.bf16 %v1256_v21, %v1255_v28  ;;  %v851_v41 = vadd.f32 %v3886_v22, %v4630_v7  ;;  %v4755_v21 = vpop.f32.mrf.mxu1 }
 0x108   :  { %v842_v29 = vpop.f32.mrf.mxu0 }
 0x109   :  { %v1367_v30 = vpack.c.bf16 %v1254_v25, %v1253_v24  ;;  %v843_v36 = vadd.f32 %v4630_v7, %v842_v29  ;;  %v1259_v56 = vmax.f32 %v851_v41, 0.0  ;;  %v4757_v28 = vpop.f32.mrf.mxu1 }
 0x10a   :  { %v3887_v34 = vpop.f32.mrf.mxu0 }
 0x10b   :  { %v854_v38 = vadd.f32 %v3887_v34, %v4630_v7  ;;  %4012 = vmatprep.mubr.msk.bf16.mxu1 %vm1440_vm2, %v1367_v30  ;;  %v1257_v51 = vmax.f32 %v843_v36, 0.0  ;;  %v4762_v36 = vpop.f32.mrf.mxu1 }
 0x10c   :  { %v845_v42 = vpop.f32.mrf.mxu0  ;;  %4013 = vmatmul.mubr.msk.bf16.gmra.mxu1 %vm1440_vm2, %v1368_v33 }
 0x10d   :  { %v846_v45 = vadd.f32 %v4630_v7, %v845_v42  ;;  %v1260_v47 = vmax.f32 %v854_v38, 0.0 }
 0x10e   :  { %v3890_v49 = vpop.f32.mrf.mxu0 }
 0x10f   :  { %v1258_v52 = vmax.f32 %v846_v45, 0.0  ;;  %v1370_v62 = vpack.c.bf16 %v1260_v47, %v1259_v56  ;;  %v867_v6 = vadd.f32 %v3890_v49, %v4630_v7  ;;  %v4767_v49 = vpop.f32.mrf.mxu1 }
 0x110   :  { %v858_v57 = vpop.f32.mrf.mxu0 }
 0x111   :  { %v1369_v58 = vpack.c.bf16 %v1258_v52, %v1257_v51  ;;  %v859_v1 = vadd.f32 %v4630_v7, %v858_v57  ;;  %v1263_v22 = vmax.f32 %v867_v6, 0.0 }
 0x112   :  { %v3891_v0 = vpop.f32.mrf.mxu0 }
 0x113   :  { %v870_v3 = vadd.f32 %v3891_v0, %v4630_v7  ;;  %4016 = vmatprep.mubr.msk.bf16.mxu1 %vm1440_vm2, %v1369_v58  ;;  %v1261_v17 = vmax.f32 %v859_v1, 0.0  ;;  %v4769_v1 = vpop.f32.mrf.mxu1 }
 0x114   :  { %v861_v10 = vpop.f32.mrf.mxu0  ;;  %4017 = vmatmul.mubr.msk.bf16.gmra.mxu1 %vm1440_vm2, %v1370_v62 }
 0x115   :  { %v862_v11 = vadd.f32 %v4630_v7, %v861_v10  ;;  %v1264_v13 = vmax.f32 %v870_v3, 0.0 }
 0x116   :  { %v3894_v16 = vpop.f32.mrf.mxu0 }
 0x117   :  { %v1262_v19 = vmax.f32 %v862_v11, 0.0  ;;  %v1372_v29 = vpack.c.bf16 %v1264_v13, %v1263_v22  ;;  %v883_v38 = vadd.f32 %v3894_v16, %v4630_v7 }
 0x118   :  { %v874_v24 = vpop.f32.mrf.mxu0 }
 0x119   :  { %v1371_v25 = vpack.c.bf16 %v1262_v19, %v1261_v17  ;;  %v875_v33 = vadd.f32 %v4630_v7, %v874_v24  ;;  %v1267_v56 = vmax.f32 %v883_v38, 0.0  ;;  %v4777_v19 = vpop.f32.mrf.mxu1 }
 0x11a   :  { %v3895_v30 = vpop.f32.mrf.mxu0 }
 0x11b   :  { %v886_v34 = vadd.f32 %v3895_v30, %v4630_v7  ;;  %4020 = vmatprep.mubr.msk.bf16.mxu1 %vm1440_vm2, %v1371_v25  ;;  %v1265_v51 = vmax.f32 %v875_v33, 0.0  ;;  %v4779_v38 = vpop.f32.mrf.mxu1 }
 0x11c   :  { %v877_v41 = vpop.f32.mrf.mxu0  ;;  %4021 = vmatmul.mubr.msk.bf16.gmra.mxu1 %vm1440_vm2, %v1372_v29 }
 0x11d   :  { %v878_v42 = vadd.f32 %v4630_v7, %v877_v41  ;;  %v1268_v45 = vmax.f32 %v886_v34, 0.0 }
 0x11e   :  { %v3898_v47 = vpop.f32.mrf.mxu0 }
 0x11f   :  { %v1266_v52 = vmax.f32 %v878_v42, 0.0  ;;  %v1374_v62 = vpack.c.bf16 %v1268_v45, %v1267_v56  ;;  %v899_v10 = vadd.f32 %v3898_v47, %v4630_v7 }
 0x120   :  { %v890_v57 = vpop.f32.mrf.mxu0 }
 0x121   :  { %v1373_v58 = vpack.c.bf16 %v1266_v52, %v1265_v51  ;;  %v891_v3 = vadd.f32 %v4630_v7, %v890_v57  ;;  %v1271_v25 = vmax.f32 %v899_v10, 0.0  ;;  %v4787_v57 = vpop.f32.mrf.mxu1 }
 0x122   :  { %v3899_v0 = vpop.f32.mrf.mxu0 }
 0x123   :  { %v902_v6 = vadd.f32 %v3899_v0, %v4630_v7  ;;  %4024 = vmatprep.mubr.msk.bf16.mxu1 %vm1440_vm2, %v1373_v58  ;;  %v1269_v22 = vmax.f32 %v891_v3, 0.0 }
 0x124   :  { %v893_v11 = vpop.f32.mrf.mxu0  ;;  %4025 = vmatmul.mubr.msk.bf16.gmra.mxu1 %vm1440_vm2, %v1374_v62 }
 0x125   :  { %v894_v13 = vadd.f32 %v4630_v7, %v893_v11  ;;  %v1272_v16 = vmax.f32 %v902_v6, 0.0 }
 0x126   :  { %v3902_v17 = vpop.f32.mrf.mxu0 }
 0x127   :  { %v1270_v24 = vmax.f32 %v894_v13, 0.0  ;;  %v1376_v33 = vpack.c.bf16 %v1272_v16, %v1271_v25  ;;  %v915_v45 = vadd.f32 %v3902_v17, %v4630_v7  ;;  %v4789_v13 = vpop.f32.mrf.mxu1 }
 0x128   :  { %v906_v29 = vpop.f32.mrf.mxu0 }
 0x129   :  { %v1375_v30 = vpack.c.bf16 %v1270_v24, %v1269_v22  ;;  %v907_v41 = vadd.f32 %v4630_v7, %v906_v29  ;;  %v1275_v0 = vmax.f32 %v915_v45, 0.0 }
 0x12a   :  { %v3903_v34 = vpop.f32.mrf.mxu0 }
 0x12b   :  { %v918_v42 = vadd.f32 %v3903_v34, %v4630_v7  ;;  %4028 = vmatprep.mubr.msk.bf16.mxu1 %vm1440_vm2, %v1375_v30  ;;  %v1273_v58 = vmax.f32 %v907_v41, 0.0 }
 0x12c   :  { %v909_v47 = vpop.f32.mrf.mxu0  ;;  %4029 = vmatmul.mubr.msk.bf16.gmra.mxu1 %vm1440_vm2, %v1376_v33  ;;  %v4797_v33 = vpop.f32.mrf.mxu1 }
 0x12d   :  { %v910_v51 = vadd.f32 %v4630_v7, %v909_v47  ;;  %v1276_v52 = vmax.f32 %v918_v42, 0.0 }
 0x12e   :  { %v3906_v56 = vpop.f32.mrf.mxu0 }
 0x12f   :  { %v1274_v62 = vmax.f32 %v910_v51, 0.0  ;;  %v1378_v10 = vpack.c.bf16 %v1276_v52, %v1275_v0  ;;  %v931_v22 = vadd.f32 %v3906_v56, %v4630_v7 }
 0x130   :  { %v922_v3 = vpop.f32.mrf.mxu0 }
 0x131   :  { %v1377_v6 = vpack.c.bf16 %v1274_v62, %v1273_v58  ;;  %v923_v16 = vadd.f32 %v4630_v7, %v922_v3  ;;  %v1279_v42 = vmax.f32 %v931_v22, 0.0  ;;  %v4799_v58 = vpop.f32.mrf.mxu1 }
 0x132   :  { %v3907_v11 = vpop.f32.mrf.mxu0 }
 0x133   :  { %v934_v17 = vadd.f32 %v3907_v11, %v4630_v7  ;;  %4032 = vmatprep.mubr.msk.bf16.mxu1 %vm1440_vm2, %v1377_v6  ;;  %v1277_v34 = vmax.f32 %v923_v16, 0.0  ;;  %v4807_v16 = vpop.f32.mrf.mxu1 }
 0x134   :  { %v925_v24 = vpop.f32.mrf.mxu0  ;;  %4033 = vmatmul.mubr.msk.bf16.gmra.mxu1 %vm1440_vm2, %v1378_v10 }
 0x135   :  { %v926_v25 = vadd.f32 %v4630_v7, %v925_v24  ;;  %v1280_v29 = vmax.f32 %v934_v17, 0.0 }
 0x136   :  { %v3910_v30 = vpop.f32.mrf.mxu0 }
 0x137   :  { %v1278_v41 = vmax.f32 %v926_v25, 0.0  ;;  %v1380_v51 = vpack.c.bf16 %v1280_v29, %v1279_v42  ;;  %v947_v0 = vadd.f32 %v3910_v30, %v4630_v7  ;;  %v4809_v42 = vpop.f32.mrf.mxu1  ;;  %v971_v30 = vadd.f32 %v4630_v7, %v4647_v40 }
 0x138   :  { %v938_v45 = vpop.f32.mrf.mxu0 }
 0x139   :  { %v1379_v47 = vpack.c.bf16 %v1278_v41, %v1277_v34  ;;  %v939_v56 = vadd.f32 %v4630_v7, %v938_v45  ;;  %v1283_v24 = vmax.f32 %v947_v0, 0.0  ;;  %v974_v45 = vadd.f32 %v4630_v7, %v4657_v50 }
 0x13a   :  { %v3911_v52 = vpop.f32.mrf.mxu0  ;;  %v1289_v40 = vmax.f32 %v971_v30, 0.0  ;;  %v990_v30 = vadd.f32 %v4630_v7, %v4671_v4 }
 0x13b   :  { %v950_v62 = vadd.f32 %v3911_v52, %v4630_v7  ;;  %4036 = vmatprep.mubr.msk.bf16.mxu1 %vm1440_vm2, %v1379_v47  ;;  %v1281_v17 = vmax.f32 %v939_v56, 0.0 }
 0x13c   :  { %v941_v3 = vpop.f32.mrf.mxu0  ;;  %4037 = vmatmul.mubr.msk.bf16.gmra.mxu1 %vm1440_vm2, %v1380_v51 }
 0x13d   :  { %v942_v6 = vadd.f32 %v4630_v7, %v941_v3  ;;  %v1284_v10 = vmax.f32 %v950_v62, 0.0  ;;  %v4821_v3 = vpop.f32.mrf.mxu1 }
 0x13e   :  { %v3914_v11 = vpop.f32.mrf.mxu0 }
 0x13f   :  { %v1282_v22 = vmax.f32 %v942_v6, 0.0  ;;  %v1382_v34 = vpack.c.bf16 %v1284_v10, %v1283_v24  ;;  %v963_v52 = vadd.f32 %v3914_v11, %v4630_v7  ;;  %v1290_v6 = vmax.f32 %v974_v45, 0.0 }
 0x140   :  { %v954_v25 = vpop.f32.mrf.mxu0  ;;  %v979_v24 = vadd.f32 %v4642_v35, %v4630_v7  ;;  %v982_v11 = vadd.f32 %v4652_v44, %v4630_v7 }
 0x141   :  { %v1381_v29 = vpack.c.bf16 %v1282_v22, %v1281_v17  ;;  %v955_v47 = vadd.f32 %v4630_v7, %v954_v25  ;;  %v1287_v17 = vmax.f32 %v963_v52, 0.0 }
 0x142   :  { %v3915_v41 = vpop.f32.mrf.mxu0  ;;  %v1291_v35 = vmax.f32 %v979_v24, 0.0  ;;  %v1292_v45 = vmax.f32 %v982_v11, 0.0  ;;  %v1019_v11 = vadd.f32 %v4630_v7, %v4692_v32  ;;  %v1030_v32 = vadd.f32 %v4697_v37, %v4630_v7 }
 0x143   :  { %v966_v51 = vadd.f32 %v3915_v41, %v4630_v7  ;;  %4040 = vmatprep.mubr.msk.bf16.mxu1 %vm1440_vm2, %v1381_v29  ;;  %v1285_v10 = vmax.f32 %v955_v47, 0.0  ;;  %v4827_v29 = vpop.f32.mrf.mxu1  ;;  %v987_v41 = vadd.f32 %v4630_v7, %v4664_v59  ;;  %v998_v59 = vadd.f32 %v4669_v63, %v4630_v7 }
 0x144   :  { %v957_v56 = vpop.f32.mrf.mxu0  ;;  %4041 = vmatmul.mubr.msk.bf16.gmra.mxu1 %vm1440_vm2, %v1382_v34  ;;  %v1385_v34 = vpack.c.bf16 %v1290_v6, %v1289_v40  ;;  %v1386_v52 = vpack.c.bf16 %v1292_v45, %v1291_v35  ;;  %v1006_v40 = vadd.f32 %v4630_v7, %v4685_v23  ;;  %v1027_v45 = vadd.f32 %v4687_v27, %v4630_v7 }
 0x145   :  { %v958_v62 = vadd.f32 %v4630_v7, %v957_v56  ;;  %v1288_v0 = vmax.f32 %v966_v51, 0.0  ;;  %v4836_v47 = vpop.f32.mrf.mxu1  ;;  %v1293_v44 = vmax.f32 %v987_v41, 0.0  ;;  %v1294_v51 = vmax.f32 %v990_v30, 0.0 }
 0x146   :  { %v995_v56 = vadd.f32 %v4659_v54, %v4630_v7 }
 0x147   :  { %v1286_v50 = vmax.f32 %v958_v62, 0.0  ;;  %v1384_v25 = vpack.c.bf16 %v1288_v0, %v1287_v17  ;;  %v4842_v4 = vpop.f32.mrf.mxu1  ;;  %v1387_v62 = vpack.c.bf16 %v1294_v51, %v1293_v44  ;;  %v1003_v0 = vadd.f32 %v4630_v7, %v4678_v14 }
 0x148   :  { %v1295_v6 = vmax.f32 %v995_v56, 0.0  ;;  %v1298_v17 = vmax.f32 %v1006_v40, 0.0  ;;  %v1014_v14 = vadd.f32 %v4683_v18, %v4630_v7  ;;  %v1035_v51 = vadd.f32 %v4630_v7, %v4706_v55 }
 0x149   :  { %v1383_v22 = vpack.c.bf16 %v1286_v50, %v1285_v10  ;;  %v1296_v10 = vmax.f32 %v998_v59, 0.0  ;;  %v4850_v50 = vpop.f32.mrf.mxu1  ;;  %v1297_v54 = vmax.f32 %v1003_v0, 0.0  ;;  %v1303_v56 = vmax.f32 %v1027_v45, 0.0 }
 0x14a   :  { %v1300_v41 = vmax.f32 %v1014_v14, 0.0  ;;  %v1304_v59 = vmax.f32 %v1030_v32, 0.0  ;;  %v1305_v27 = vmax.f32 %v1035_v51, 0.0  ;;  %v1043_v40 = vadd.f32 %v4701_v48, %v4630_v7 }
 0x14b   :  { %4044 = vmatprep.mubr.msk.bf16.mxu1 %vm1440_vm2, %v1383_v22  ;;  %v1388_v63 = vpack.c.bf16 %v1296_v10, %v1295_v6  ;;  %v1011_v22 = vadd.f32 %v4673_v9, %v4630_v7  ;;  %v4856_v24 = vpop.f32.mrf.mxu1  ;;  %v1389_v23 = vpack.c.bf16 %v1298_v17, %v1297_v54  ;;  %v1301_v9 = vmax.f32 %v1019_v11, 0.0 }
 0x14c   :  { %4045 = vmatmul.mubr.msk.bf16.gmra.mxu1 %vm1440_vm2, %v1384_v25  ;;  %v1022_v25 = vadd.f32 %v4630_v7, %v4699_v43  ;;  %v1392_v37 = vpack.c.bf16 %v1304_v59, %v1303_v56  ;;  %v1046_v55 = vadd.f32 %v4711_v60, %v4630_v7  ;;  %v1051_v10 = vadd.f32 %v4630_v7, %v4720_v15 }
 0x14d   :  { %4048 = vmatprep.mubr.msk.bf16.mxu1 %vm1440_vm2, %v1385_v34  ;;  %v1299_v34 = vmax.f32 %v1011_v22, 0.0  ;;  %v4864_v30 = vpop.f32.mrf.mxu1  ;;  %v1054_v54 = vadd.f32 %v4630_v7, %v4727_v26  ;;  %v1307_v17 = vmax.f32 %v1043_v40, 0.0  ;;  %v1062_v15 = vadd.f32 %v4725_v20, %v4630_v7 }
 0x14e   :  { %v1302_v35 = vmax.f32 %v1022_v25, 0.0  ;;  %v1309_v48 = vmax.f32 %v1051_v10, 0.0  ;;  %v1067_v25 = vadd.f32 %v4630_v7, %v4734_v39  ;;  %v1075_v45 = vadd.f32 %v4729_v31, %v4630_v7 }
 0x14f   :  { %v1390_v18 = vpack.c.bf16 %v1300_v41, %v1299_v34  ;;  %v4870_v44 = vpop.f32.mrf.mxu1  ;;  %v1310_v14 = vmax.f32 %v1054_v54, 0.0  ;;  %v1070_v34 = vadd.f32 %v4630_v7, %v4741_v53  ;;  %v1078_v39 = vadd.f32 %v4739_v46, %v4630_v7 }
 0x150   :  { %v1391_v43 = vpack.c.bf16 %v1302_v35, %v1301_v9  ;;  %v1312_v9 = vmax.f32 %v1062_v15, 0.0  ;;  %v1086_v51 = vadd.f32 %v4630_v7, %v4755_v21  ;;  %v1099_v40 = vadd.f32 %v4630_v7, %v4762_v36 }
 0x151   :  { %v1395_v26 = vpack.c.bf16 %v1310_v14, %v1309_v48  ;;  %v1316_v56 = vmax.f32 %v1078_v39, 0.0  ;;  %v1110_v36 = vadd.f32 %v4767_v49, %v4630_v7  ;;  %v1115_v14 = vadd.f32 %v4630_v7, %v4779_v38 }
 0x152   :  { %v1126_v38 = vadd.f32 %v4787_v57, %v4630_v7  ;;  %v4965_v57 = vld [vmem:[%s5405_s4] ss:$0 sm:$0xff] }
 0x153   :  { %v1324_v15 = vmax.f32 %v1110_v36, 0.0 }
 0x154   :  { %4049 = vmatmul.mubr.msk.bf16.gmra.mxu1 %vm1440_vm2, %v1386_v52  ;;  %v1038_v52 = vadd.f32 %v4630_v7, %v4713_v2 }
 0x155   :  { %4052 = vmatprep.mubr.msk.bf16.mxu1 %vm1440_vm2, %v1387_v62  ;;  %v4878_v62 = vpop.f32.mrf.mxu1 }
 0x156   :  { %v1306_v0 = vmax.f32 %v1038_v52, 0.0  ;;  %v1315_v52 = vmax.f32 %v1075_v45, 0.0  ;;  %v1328_v45 = vmax.f32 %v1126_v38, 0.0  ;;  %v1166_v38 = vadd.f32 %v4630_v7, %v4870_v44 }
 0x157   :  { %v4884_v6 = vpop.f32.mrf.mxu1 }
 0x158   :  { %v1393_v2 = vpack.c.bf16 %v1306_v0, %v1305_v27  ;;  %v1318_v27 = vmax.f32 %v1086_v51, 0.0  ;;  %v1398_v46 = vpack.c.bf16 %v1316_v56, %v1315_v52  ;;  %v1091_v0 = vadd.f32 %v4743_v61, %v4630_v7 }
 0x159   :  { %v4892_v22 = vpop.f32.mrf.mxu1  ;;  %v1321_v61 = vmax.f32 %v1099_v40, 0.0  ;;  %v1139_v52 = vadd.f32 %v4797_v33, %v4630_v7  ;;  %v1142_v56 = vadd.f32 %v4807_v16, %v4630_v7 }
 0x15b   :  { %v4898_v11 = vpop.f32.mrf.mxu1  ;;  %v1331_v16 = vmax.f32 %v1139_v52, 0.0  ;;  %v1171_v52 = vadd.f32 %v4850_v50, %v4630_v7 }
 0x15c   :  { %4053 = vmatmul.mubr.msk.bf16.gmra.mxu1 %vm1440_vm2, %v1388_v63  ;;  %v1308_v63 = vmax.f32 %v1046_v55, 0.0  ;;  %v1102_v55 = vadd.f32 %v4630_v7, %v4769_v1 }
 0x15d   :  { %4056 = vmatprep.mubr.msk.bf16.mxu1 %vm1440_vm2, %v1389_v23  ;;  %v1059_v23 = vadd.f32 %v4715_v8, %v4630_v7  ;;  %v4906_v35 = vpop.f32.mrf.mxu1  ;;  %v1313_v8 = vmax.f32 %v1067_v25, 0.0 }
 0x15e   :  { %v1394_v60 = vpack.c.bf16 %v1308_v63, %v1307_v17  ;;  %v1322_v17 = vmax.f32 %v1102_v55, 0.0  ;;  %v1107_v63 = vadd.f32 %v4757_v28, %v4630_v7  ;;  %v1325_v28 = vmax.f32 %v1115_v14, 0.0 }
 0x15f   :  { %v1311_v41 = vmax.f32 %v1059_v23, 0.0  ;;  %v4912_v32 = vpop.f32.mrf.mxu1 }
 0x160   :  { %v1401_v1 = vpack.c.bf16 %v1322_v17, %v1321_v61  ;;  %v1323_v23 = vmax.f32 %v1107_v63, 0.0 }
 0x161   :  { %v1396_v20 = vpack.c.bf16 %v1312_v9, %v1311_v41  ;;  %v4920_v59 = vpop.f32.mrf.mxu1  ;;  %v1131_v9 = vadd.f32 %v4630_v7, %v4799_v58 }
 0x162   :  { %v1402_v49 = vpack.c.bf16 %v1324_v15, %v1323_v23  ;;  %v1155_v23 = vadd.f32 %v4821_v3, %v4630_v7  ;;  %v1158_v15 = vadd.f32 %v4836_v47, %v4630_v7 }
 0x163   :  { %v1329_v39 = vmax.f32 %v1131_v9, 0.0 }
 0x164   :  { %4057 = vmatmul.mubr.msk.bf16.gmra.mxu1 %vm1440_vm2, %v1390_v18  ;;  %v1314_v18 = vmax.f32 %v1070_v34, 0.0  ;;  %v1123_v34 = vadd.f32 %v4777_v19, %v4630_v7 }
 0x165   :  { %4060 = vmatprep.mubr.msk.bf16.mxu1 %vm1440_vm2, %v1391_v43  ;;  %v1083_v43 = vadd.f32 %v4630_v7, %v4748_v5  ;;  %v1094_v5 = vadd.f32 %v4753_v12, %v4630_v7 }
 0x166   :  { %v1397_v53 = vpack.c.bf16 %v1314_v18, %v1313_v8  ;;  %v1134_v8 = vadd.f32 %v4630_v7, %v4809_v42 }
 0x167   :  { %v1317_v31 = vmax.f32 %v1083_v43, 0.0  ;;  %v1320_v10 = vmax.f32 %v1094_v5, 0.0  ;;  %v1150_v5 = vadd.f32 %v4630_v7, %v4842_v4 }
 0x169   :  { %v1399_v21 = vpack.c.bf16 %v1318_v27, %v1317_v31  ;;  %v1334_v63 = vmax.f32 %v1150_v5, 0.0 }
 0x16c   :  { %4061 = vmatmul.mubr.msk.bf16.gmra.mxu1 %vm1440_vm2, %v1392_v37  ;;  %v4926_v37 = vpop.f32.mrf.mxu1 }
 0x16d   :  { %4064 = vmatprep.mubr.msk.bf16.mxu1 %vm1440_vm2, %v1393_v2  ;;  %v1319_v2 = vmax.f32 %v1091_v0, 0.0  ;;  %v1147_v0 = vadd.f32 %v4630_v7, %v4827_v29 }
 0x16e   :  { %v4934_v54 = vpop.f32.mrf.mxu1 }
 0x16f   :  { %v1400_v12 = vpack.c.bf16 %v1320_v10, %v1319_v2  ;;  %v1332_v10 = vmax.f32 %v1142_v56, 0.0  ;;  %v1174_v56 = vadd.f32 %v4864_v30, %v4630_v7 }
 0x170   :  { %v4940_v48 = vpop.f32.mrf.mxu1 }
 0x174   :  { %4065 = vmatmul.mubr.msk.bf16.gmra.mxu1 %vm1440_vm2, %v1394_v60  ;;  %v1118_v60 = vadd.f32 %v4630_v7, %v4789_v13 }
 0x175   :  { %4068 = vmatprep.mubr.msk.bf16.mxu1 %vm1440_vm2, %v1395_v26  ;;  %v4948_v26 = vpop.f32.mrf.mxu1 }
 0x176   :  { %v1326_v25 = vmax.f32 %v1118_v60, 0.0  ;;  %v1406_v60 = vpack.c.bf16 %v1332_v10, %v1331_v16 }
 0x177   :  { %v4954_v41 = vpop.f32.mrf.mxu1 }
 0x178   :  { %v1403_v13 = vpack.c.bf16 %v1326_v25, %v1325_v28 }
 0x17c   :  { %4069 = vmatmul.mubr.msk.bf16.gmra.mxu1 %vm1440_vm2, %v1396_v20  ;;  %v1327_v20 = vmax.f32 %v1123_v34, 0.0  ;;  %v1163_v34 = vadd.f32 %v4630_v7, %v4856_v24 }
 0x17d   :  { %4072 = vmatprep.mubr.msk.bf16.mxu1 %vm1440_vm2, %v1397_v53  ;;  %v1330_v53 = vmax.f32 %v1134_v8, 0.0 }
 0x17e   :  { %v1404_v51 = vpack.c.bf16 %v1328_v45, %v1327_v20  ;;  %v1336_v20 = vmax.f32 %v1158_v15, 0.0 }
 0x184   :  { %4073 = vmatmul.mubr.msk.bf16.gmra.mxu1 %vm1440_vm2, %v1398_v46  ;;  %v1405_v46 = vpack.c.bf16 %v1330_v53, %v1329_v39  ;;  %v1337_v39 = vmax.f32 %v1163_v34, 0.0  ;;  %v1338_v53 = vmax.f32 %v1166_v38, 0.0 }
 0x185   :  { %4076 = vmatprep.mubr.msk.bf16.mxu1 %vm1440_vm2, %v1399_v21 }
 0x18c   :  { %4077 = vmatmul.mubr.msk.bf16.gmra.mxu1 %vm1440_vm2, %v1400_v12  ;;  %v1333_v12 = vmax.f32 %v1147_v0, 0.0  ;;  %v5009_v0 = vld [vmem:[%s5404_s2] ss:$0 sm:$0xff] }
 0x18d   :  { %4080 = vmatprep.mubr.msk.bf16.mxu1 %vm1440_vm2, %v1401_v1  ;;  %v1179_v5 = vadd.f32 %v5009_v0, %v4884_v6  ;;  %v1182_v50 = vadd.f32 %v5009_v0, %v4898_v11  ;;  %v1195_v15 = vadd.f32 %v5009_v0, %v4912_v32 }
 0x194   :  { %v3986_v18 = vpop.f32.mrf.mxu1  ;;  %4081 = vmatmul.mubr.msk.bf16.gmra.mxu1 %vm1440_vm2, %v1402_v49  ;;  %v1407_v49 = vpack.c.bf16 %v1334_v63, %v1333_v12 }
 0x195   :  { %4084 = vmatprep.mubr.msk.bf16.mxu1 %vm1440_vm2, %v1403_v13  ;;  %v1676_v31 = vadd.f32 %v3986_v18, %v4965_v57  ;;  %v1335_v18 = vmax.f32 %v1155_v23, 0.0 }
 0x196   :  { %v1667_v19 = vpop.f32.mrf.mxu1 }
 0x197   :  { %v1668_v58 = vadd.f32 %v4965_v57, %v1667_v19  ;;  %v2180_v61 = vmax.f32 %v1676_v31, 0.0 }
 0x198   :  { %v3987_v43 = vpop.f32.mrf.mxu1 }
 0x199   :  { %v1679_v42 = vadd.f32 %v3987_v43, %v4965_v57  ;;  %v2178_v33 = vmax.f32 %v1668_v58, 0.0 }
 0x19a   :  { %v1670_v27 = vpop.f32.mrf.mxu1 }
 0x19b   :  { %v1671_v21 = vadd.f32 %v4965_v57, %v1670_v27  ;;  %v2181_v40 = vmax.f32 %v1679_v42, 0.0 }
 0x19c   :  { %v3990_v55 = vpop.f32.mrf.mxu1  ;;  %4085 = vmatmul.mubr.msk.bf16.gmra.mxu1 %vm1440_vm2, %v1404_v51  ;;  %v1408_v51 = vpack.c.bf16 %v1336_v20, %v1335_v18 }
 0x19d   :  { %v2179_v2 = vmax.f32 %v1671_v21, 0.0  ;;  %4088 = vmatprep.mubr.msk.bf16.mxu1 %vm1440_vm2, %v1405_v46  ;;  %v2307_v36 = vpack.c.bf16 %v2181_v40, %v2180_v61  ;;  %v1692_v28 = vadd.f32 %v3990_v55, %v4965_v57  ;;  %v1409_v46 = vpack.c.bf16 %v1338_v53, %v1337_v39 }
 0x19e   :  { %v1683_v17 = vpop.f32.mrf.mxu1  ;;  %v1341_v61 = vmax.f32 %v1179_v5, 0.0  ;;  %v1203_v39 = vadd.f32 %v5009_v0, %v4906_v35  ;;  %v1206_v53 = vadd.f32 %v5009_v0, %v4920_v59 }
 0x19f   :  { %v2306_v29 = vpack.c.bf16 %v2179_v2, %v2178_v33  ;;  %v1684_v4 = vadd.f32 %v4965_v57, %v1683_v17  ;;  %v2184_v45 = vmax.f32 %v1692_v28, 0.0  ;;  %v1339_v33 = vmax.f32 %v1171_v52, 0.0 }
 0x1a0   :  { %v3991_v1 = vpop.f32.mrf.mxu1  ;;  %v1340_v2 = vmax.f32 %v1174_v56, 0.0  ;;  %v1342_v17 = vmax.f32 %v1182_v50, 0.0  ;;  %v1198_v28 = vadd.f32 %v5009_v0, %v4926_v37 }
 0x1a1   :  { %v1695_v14 = vadd.f32 %v3991_v1, %v4965_v57  ;;  %4116 = vmatprep.mubr.msk.bf16.mxu0 %vm1440_vm2, %v2306_v29  ;;  %v2182_v3 = vmax.f32 %v1684_v4, 0.0  ;;  %v1187_v1 = vadd.f32 %v5009_v0, %v4878_v62  ;;  %v1190_v4 = vadd.f32 %v5009_v0, %v4892_v22 }
 0x1a2   :  { %v1686_v25 = vpop.f32.mrf.mxu1  ;;  %4117 = vmatmul.mubr.msk.bf16.vlgmr.msra.gmra.mxu0 %vm1440_vm2, %v2307_v36  ;;  %v1410_v36 = vpack.c.bf16 %v1340_v2, %v1339_v33  ;;  %v1411_v23 = vpack.c.bf16 %v1342_v17, %v1341_v61  ;;  %v1219_v33 = vadd.f32 %v5009_v0, %v4934_v54  ;;  %v1222_v2 = vadd.f32 %v5009_v0, %v4948_v26 }
 0x1a3   :  { %v1687_v13 = vadd.f32 %v4965_v57, %v1686_v25  ;;  %v2185_v9 = vmax.f32 %v1695_v14, 0.0  ;;  %v1343_v38 = vmax.f32 %v1187_v1, 0.0 }
 0x1a4   :  { %v3994_v8 = vpop.f32.mrf.mxu1  ;;  %4089 = vmatmul.mubr.msk.bf16.gmra.mxu1 %vm1440_vm2, %v1406_v60  ;;  %v1351_v54 = vmax.f32 %v1219_v33, 0.0 }
 0x1a5   :  { %v2183_v47 = vmax.f32 %v1687_v13, 0.0  ;;  %4092 = vmatprep.mubr.msk.bf16.mxu1 %vm1440_vm2, %v1407_v49  ;;  %v2309_v43 = vpack.c.bf16 %v2185_v9, %v2184_v45  ;;  %v1708_v31 = vadd.f32 %v3994_v8, %v4965_v57  ;;  %v1344_v13 = vmax.f32 %v1190_v4, 0.0 }
 0x1a6   :  { %v1699_v19 = vpop.f32.mrf.mxu1 }
 0x1a7   :  { %v2308_v24 = vpack.c.bf16 %v2183_v47, %v2182_v3  ;;  %v1700_v44 = vadd.f32 %v4965_v57, %v1699_v19  ;;  %v2188_v16 = vmax.f32 %v1708_v31, 0.0  ;;  %v1345_v3 = vmax.f32 %v1195_v15, 0.0 }
 0x1a8   :  { %v3995_v58 = vpop.f32.mrf.mxu1  ;;  %v1346_v47 = vmax.f32 %v1198_v28, 0.0  ;;  %v1412_v19 = vpack.c.bf16 %v1344_v13, %v1343_v38  ;;  %v1347_v31 = vmax.f32 %v1203_v39, 0.0 }
 0x1a9   :  { %v1711_v42 = vadd.f32 %v3995_v58, %v4965_v57  ;;  %4120 = vmatprep.mubr.msk.bf16.mxu0 %vm1440_vm2, %v2308_v24  ;;  %v2186_v40 = vmax.f32 %v1700_v44, 0.0  ;;  %v1211_v44 = vadd.f32 %v5009_v0, %v4940_v48 }
 0x1aa   :  { %v1702_v27 = vpop.f32.mrf.mxu1  ;;  %4121 = vmatmul.mubr.msk.bf16.gmra.mxu0 %vm1440_vm2, %v2309_v43  ;;  %v1413_v58 = vpack.c.bf16 %v1346_v47, %v1345_v3 }
 0x1ab   :  { %v1703_v21 = vadd.f32 %v4965_v57, %v1702_v27  ;;  %v2189_v7 = vmax.f32 %v1711_v42, 0.0  ;;  %v1214_v42 = vadd.f32 %v5009_v0, %v4954_v41  ;;  %v1348_v27 = vmax.f32 %v1206_v53, 0.0 }
 0x1ac   :  { %v3998_v30 = vpop.f32.mrf.mxu1  ;;  %4093 = vmatmul.mubr.msk.bf16.gmra.mxu1 %vm1440_vm2, %v1408_v51  ;;  %v1349_v50 = vmax.f32 %v1211_v44, 0.0 }
 0x1ad   :  { %v2187_v55 = vmax.f32 %v1703_v21, 0.0  ;;  %4096 = vmatprep.mubr.msk.bf16.mxu1 %vm1440_vm2, %v1409_v46  ;;  %v2311_v12 = vpack.c.bf16 %v2189_v7, %v2188_v16  ;;  %v1724_v14 = vadd.f32 %v3998_v30, %v4965_v57  ;;  %v1350_v21 = vmax.f32 %v1214_v42, 0.0 }
 0x1ae   :  { %v1715_v10 = vpop.f32.mrf.mxu1 }
 0x1af   :  { %v2310_v6 = vpack.c.bf16 %v2187_v55, %v2186_v40  ;;  %v1716_v11 = vadd.f32 %v4965_v57, %v1715_v10  ;;  %v2192_v9 = vmax.f32 %v1724_v14, 0.0  ;;  %v1414_v55 = vpack.c.bf16 %v1348_v27, %v1347_v31 }
 0x1b0   :  { %v3999_v63 = vpop.f32.mrf.mxu1  ;;  %v1415_v61 = vpack.c.bf16 %v1350_v21, %v1349_v50 }
 0x1b1   :  { %v1727_v29 = vadd.f32 %v3999_v63, %v4965_v57  ;;  %4124 = vmatprep.mubr.msk.bf16.mxu0 %vm1440_vm2, %v2310_v6  ;;  %v2190_v62 = vmax.f32 %v1716_v11, 0.0 }
 0x1b2   :  { %v1718_v60 = vpop.f32.mrf.mxu1  ;;  %4125 = vmatmul.mubr.msk.bf16.gmra.mxu0 %vm1440_vm2, %v2311_v12 }
 0x1b3   :  { %v1719_v25 = vadd.f32 %v4965_v57, %v1718_v60  ;;  %v2193_v49 = vmax.f32 %v1727_v29, 0.0  ;;  %v1352_v29 = vmax.f32 %v1222_v2, 0.0 }
 0x1b4   :  { %v4002_v34 = vpop.f32.mrf.mxu1  ;;  %4097 = vmatmul.mubr.msk.bf16.gmra.mxu1 %vm1440_vm2, %v1410_v36 }
 0x1b5   :  { %v2191_v22 = vmax.f32 %v1719_v25, 0.0  ;;  %4100 = vmatprep.mubr.msk.bf16.mxu1 %vm1440_vm2, %v1411_v23  ;;  %v2313_v18 = vpack.c.bf16 %v2193_v49, %v2192_v9  ;;  %v1740_v24 = vadd.f32 %v4002_v34, %v4965_v57  ;;  %v1416_v23 = vpack.c.bf16 %v1352_v29, %v1351_v54 }
 0x1b6   :  { %v1731_v8 = vpop.f32.mrf.mxu1 }
 0x1b7   :  { %v2312_v32 = vpack.c.bf16 %v2191_v22, %v2190_v62  ;;  %v1732_v37 = vadd.f32 %v4965_v57, %v1731_v8  ;;  %v2196_v46 = vmax.f32 %v1740_v24, 0.0 }
 0x1b8   :  { %v4003_v20 = vpop.f32.mrf.mxu1 }
 0x1b9   :  { %v1743_v45 = vadd.f32 %v4003_v20, %v4965_v57  ;;  %4128 = vmatprep.mubr.msk.bf16.mxu0 %vm1440_vm2, %v2312_v32  ;;  %v2194_v35 = vmax.f32 %v1732_v37, 0.0 }
 0x1ba   :  { %v1734_v43 = vpop.f32.mrf.mxu1  ;;  %4129 = vmatmul.mubr.msk.bf16.gmra.mxu0 %vm1440_vm2, %v2313_v18 }
 0x1bb   :  { %v1735_v51 = vadd.f32 %v4965_v57, %v1734_v43  ;;  %v2197_v52 = vmax.f32 %v1743_v45, 0.0 }
 0x1bc   :  { %v4006_v56 = vpop.f32.mrf.mxu1  ;;  %4101 = vmatmul.mubr.msk.bf16.gmra.mxu1 %vm1440_vm2, %v1412_v19 }
 0x1bd   :  { %v2195_v59 = vmax.f32 %v1735_v51, 0.0  ;;  %4104 = vmatprep.mubr.msk.bf16.mxu1 %vm1440_vm2, %v1413_v58  ;;  %v2315_v7 = vpack.c.bf16 %v2197_v52, %v2196_v46  ;;  %v1756_v16 = vadd.f32 %v4006_v56, %v4965_v57 }
 0x1be   :  { %v1747_v5 = vpop.f32.mrf.mxu1 }
 0x1bf   :  { %v2314_v48 = vpack.c.bf16 %v2195_v59, %v2194_v35  ;;  %v1748_v41 = vadd.f32 %v4965_v57, %v1747_v5  ;;  %v2200_v36 = vmax.f32 %v1756_v16, 0.0 }
 0x1c0   :  { %v4007_v30 = vpop.f32.mrf.mxu1 }
 0x1c1   :  { %v1759_v40 = vadd.f32 %v4007_v30, %v4965_v57  ;;  %4132 = vmatprep.mubr.msk.bf16.mxu0 %vm1440_vm2, %v2314_v48  ;;  %v2198_v63 = vmax.f32 %v1748_v41, 0.0 }
 0x1c2   :  { %v1750_v10 = vpop.f32.mrf.mxu1  ;;  %4133 = vmatmul.mubr.msk.bf16.gmra.mxu0 %vm1440_vm2, %v2315_v7 }
 0x1c3   :  { %v1751_v17 = vadd.f32 %v4965_v57, %v1750_v10  ;;  %v2201_v6 = vmax.f32 %v1759_v40, 0.0 }
 0x1c4   :  { %v4010_v12 = vpop.f32.mrf.mxu1  ;;  %4105 = vmatmul.mubr.msk.bf16.gmra.mxu1 %vm1440_vm2, %v1414_v55 }
 0x1c5   :  { %v2199_v11 = vmax.f32 %v1751_v17, 0.0  ;;  %4108 = vmatprep.mubr.msk.bf16.mxu1 %vm1440_vm2, %v1415_v61  ;;  %v2317_v1 = vpack.c.bf16 %v2201_v6, %v2200_v36  ;;  %v1772_v15 = vadd.f32 %v4010_v12, %v4965_v57 }
 0x1c6   :  { %v1763_v26 = vpop.f32.mrf.mxu1 }
 0x1c7   :  { %v2316_v0 = vpack.c.bf16 %v2199_v11, %v2198_v63  ;;  %v1764_v14 = vadd.f32 %v4965_v57, %v1763_v26  ;;  %v2204_v38 = vmax.f32 %v1772_v15, 0.0 }
 0x1c8   :  { %v4011_v4 = vpop.f32.mrf.mxu1 }
 0x1c9   :  { %v1775_v60 = vadd.f32 %v4011_v4, %v4965_v57  ;;  %4136 = vmatprep.mubr.msk.bf16.mxu0 %vm1440_vm2, %v2316_v0  ;;  %v2202_v62 = vmax.f32 %v1764_v14, 0.0 }
 0x1ca   :  { %v1766_v28 = vpop.f32.mrf.mxu1  ;;  %4137 = vmatmul.mubr.msk.bf16.gmra.mxu0 %vm1440_vm2, %v2317_v1 }
 0x1cb   :  { %v1767_v25 = vadd.f32 %v4965_v57, %v1766_v28  ;;  %v2205_v49 = vmax.f32 %v1775_v60, 0.0 }
 0x1cc   :  { %v4014_v34 = vpop.f32.mrf.mxu1  ;;  %4109 = vmatmul.mubr.msk.bf16.gmra.mxu1 %vm1440_vm2, %v1416_v23 }
 0x1cd   :  { %v2203_v22 = vmax.f32 %v1767_v25, 0.0  ;;  %v2319_v8 = vpack.c.bf16 %v2205_v49, %v2204_v38  ;;  %v1788_v18 = vadd.f32 %v4014_v34, %v4965_v57 }
 0x1ce   :  { %v1779_v13 = vpop.f32.mrf.mxu1 }
 0x1cf   :  { %v2318_v9 = vpack.c.bf16 %v2203_v22, %v2202_v62  ;;  %v1780_v47 = vadd.f32 %v4965_v57, %v1779_v13  ;;  %v2208_v24 = vmax.f32 %v1788_v18, 0.0 }
 0x1d0   :  { %v4015_v3 = vpop.f32.mrf.mxu1 }
 0x1d1   :  { %v1791_v32 = vadd.f32 %v4015_v3, %v4965_v57  ;;  %4140 = vmatprep.mubr.msk.bf16.mxu0 %vm1440_vm2, %v2318_v9  ;;  %v2206_v39 = vmax.f32 %v1780_v47, 0.0 }
 0x1d2   :  { %v1782_v20 = vpop.f32.mrf.mxu1  ;;  %4141 = vmatmul.mubr.msk.bf16.gmra.mxu0 %vm1440_vm2, %v2319_v8 }
 0x1d3   :  { %v1783_v37 = vadd.f32 %v4965_v57, %v1782_v20  ;;  %v2209_v45 = vmax.f32 %v1791_v32, 0.0 }
 0x1d4   :  { %v4018_v19 = vpop.f32.mrf.mxu1 }
 0x1d5   :  { %v2207_v53 = vmax.f32 %v1783_v37, 0.0  ;;  %v2321_v44 = vpack.c.bf16 %v2209_v45, %v2208_v24  ;;  %v1804_v56 = vadd.f32 %v4018_v19, %v4965_v57 }
 0x1d6   :  { %v1795_v43 = vpop.f32.mrf.mxu1 }
 0x1d7   :  { %v2320_v58 = vpack.c.bf16 %v2207_v53, %v2206_v39  ;;  %v1796_v51 = vadd.f32 %v4965_v57, %v1795_v43  ;;  %v2212_v50 = vmax.f32 %v1804_v56, 0.0 }
 0x1d8   :  { %v4019_v42 = vpop.f32.mrf.mxu1 }
 0x1d9   :  { %v1807_v52 = vadd.f32 %v4019_v42, %v4965_v57  ;;  %4144 = vmatprep.mubr.msk.bf16.mxu0 %vm1440_vm2, %v2320_v58  ;;  %v2210_v46 = vmax.f32 %v1796_v51, 0.0 }
 0x1da   :  { %v1798_v35 = vpop.f32.mrf.mxu1  ;;  %4145 = vmatmul.mubr.msk.bf16.gmra.mxu0 %vm1440_vm2, %v2321_v44 }
 0x1db   :  { %v1799_v59 = vadd.f32 %v4965_v57, %v1798_v35  ;;  %v2213_v31 = vmax.f32 %v1807_v52, 0.0 }
 0x1dc   :  { %v4022_v27 = vpop.f32.mrf.mxu1 }
 0x1dd   :  { %v2211_v5 = vmax.f32 %v1799_v59, 0.0  ;;  %v2323_v7 = vpack.c.bf16 %v2213_v31, %v2212_v50  ;;  %v1820_v55 = vadd.f32 %v4022_v27, %v4965_v57 }
 0x1de   :  { %v1811_v21 = vpop.f32.mrf.mxu1 }
 0x1df   :  { %v2322_v48 = vpack.c.bf16 %v2211_v5, %v2210_v46  ;;  %v1812_v41 = vadd.f32 %v4965_v57, %v1811_v21  ;;  %v2216_v6 = vmax.f32 %v1820_v55, 0.0 }
 0x1e0   :  { %v4023_v30 = vpop.f32.mrf.mxu1 }
 0x1e1   :  { %v1823_v40 = vadd.f32 %v4023_v30, %v4965_v57  ;;  %4148 = vmatprep.mubr.msk.bf16.mxu0 %vm1440_vm2, %v2322_v48  ;;  %v2214_v61 = vmax.f32 %v1812_v41, 0.0 }
 0x1e2   :  { %v1814_v33 = vpop.f32.mrf.mxu1  ;;  %4149 = vmatmul.mubr.msk.bf16.gmra.mxu0 %vm1440_vm2, %v2323_v7 }
 0x1e3   :  { %v1815_v2 = vadd.f32 %v4965_v57, %v1814_v33  ;;  %v2217_v16 = vmax.f32 %v1823_v40, 0.0 }
 0x1e4   :  { %v4026_v10 = vpop.f32.mrf.mxu1 }
 0x1e5   :  { %v2215_v17 = vmax.f32 %v1815_v2, 0.0  ;;  %v2325_v11 = vpack.c.bf16 %v2217_v16, %v2216_v6  ;;  %v1836_v26 = vadd.f32 %v4026_v10, %v4965_v57 }
 0x1e6   :  { %v1827_v12 = vpop.f32.mrf.mxu1 }
 0x1e7   :  { %v2324_v63 = vpack.c.bf16 %v2215_v17, %v2214_v61  ;;  %v1828_v29 = vadd.f32 %v4965_v57, %v1827_v12  ;;  %v2220_v15 = vmax.f32 %v1836_v26, 0.0 }
 0x1e8   :  { %v4027_v54 = vpop.f32.mrf.mxu1 }
 0x1e9   :  { %v1839_v36 = vadd.f32 %v4027_v54, %v4965_v57  ;;  %4152 = vmatprep.mubr.msk.bf16.mxu0 %vm1440_vm2, %v2324_v63  ;;  %v2218_v60 = vmax.f32 %v1828_v29, 0.0 }
 0x1ea   :  { %v1830_v0 = vpop.f32.mrf.mxu1  ;;  %4153 = vmatmul.mubr.msk.bf16.gmra.mxu0 %vm1440_vm2, %v2325_v11 }
 0x1eb   :  { %v1831_v1 = vadd.f32 %v4965_v57, %v1830_v0  ;;  %v2221_v4 = vmax.f32 %v1839_v36, 0.0 }
 0x1ec   :  { %v4030_v14 = vpop.f32.mrf.mxu1 }
 0x1ed   :  { %v2219_v23 = vmax.f32 %v1831_v1, 0.0  ;;  %v2327_v49 = vpack.c.bf16 %v2221_v4, %v2220_v15  ;;  %v1852_v38 = vadd.f32 %v4030_v14, %v4965_v57 }
 0x1ee   :  { %v1843_v28 = vpop.f32.mrf.mxu1 }
 0x1ef   :  { %v2326_v25 = vpack.c.bf16 %v2219_v23, %v2218_v60  ;;  %v1844_v62 = vadd.f32 %v4965_v57, %v1843_v28  ;;  %v2224_v18 = vmax.f32 %v1852_v38, 0.0 }
 0x1f0   :  { %v4031_v34 = vpop.f32.mrf.mxu1 }
 0x1f1   :  { %v1855_v22 = vadd.f32 %v4031_v34, %v4965_v57  ;;  %4156 = vmatprep.mubr.msk.bf16.mxu0 %vm1440_vm2, %v2326_v25  ;;  %v2222_v47 = vmax.f32 %v1844_v62, 0.0 }
 0x1f2   :  { %v1846_v13 = vpop.f32.mrf.mxu1  ;;  %4157 = vmatmul.mubr.msk.bf16.gmra.mxu0 %vm1440_vm2, %v2327_v49 }
 0x1f3   :  { %v1847_v9 = vadd.f32 %v4965_v57, %v1846_v13  ;;  %v2225_v8 = vmax.f32 %v1855_v22, 0.0 }
 0x1f4   :  { %v4034_v3 = vpop.f32.mrf.mxu1 }
 0x1f5   :  { %v2223_v32 = vmax.f32 %v1847_v9, 0.0  ;;  %v2329_v45 = vpack.c.bf16 %v2225_v8, %v2224_v18  ;;  %v1868_v24 = vadd.f32 %v4034_v3, %v4965_v57 }
 0x1f6   :  { %v1859_v20 = vpop.f32.mrf.mxu1 }
 0x1f7   :  { %v2328_v37 = vpack.c.bf16 %v2223_v32, %v2222_v47  ;;  %v1860_v39 = vadd.f32 %v4965_v57, %v1859_v20  ;;  %v2228_v56 = vmax.f32 %v1868_v24, 0.0 }
 0x1f8   :  { %v4035_v19 = vpop.f32.mrf.mxu1 }
 0x1f9   :  { %v1871_v53 = vadd.f32 %v4035_v19, %v4965_v57  ;;  %4160 = vmatprep.mubr.msk.bf16.mxu0 %vm1440_vm2, %v2328_v37  ;;  %v2226_v51 = vmax.f32 %v1860_v39, 0.0 }
 0x1fa   :  { %v1862_v43 = vpop.f32.mrf.mxu1  ;;  %4161 = vmatmul.mubr.msk.bf16.gmra.mxu0 %vm1440_vm2, %v2329_v45 }
 0x1fb   :  { %v1863_v58 = vadd.f32 %v4965_v57, %v1862_v43  ;;  %v2229_v44 = vmax.f32 %v1871_v53, 0.0 }
 0x1fc   :  { %v4038_v42 = vpop.f32.mrf.mxu1 }
 0x1fd   :  { %v2227_v52 = vmax.f32 %v1863_v58, 0.0  ;;  %v2331_v31 = vpack.c.bf16 %v2229_v44, %v2228_v56  ;;  %v1884_v50 = vadd.f32 %v4038_v42, %v4965_v57 }
 0x1fe   :  { %v1875_v35 = vpop.f32.mrf.mxu1 }
 0x1ff   :  { %v2330_v59 = vpack.c.bf16 %v2227_v52, %v2226_v51  ;;  %v1876_v46 = vadd.f32 %v4965_v57, %v1875_v35  ;;  %v2232_v55 = vmax.f32 %v1884_v50, 0.0 }
 0x200   :  { %v4039_v27 = vpop.f32.mrf.mxu1 }
 0x201   :  { %v1887_v5 = vadd.f32 %v4039_v27, %v4965_v57  ;;  %4164 = vmatprep.mubr.msk.bf16.mxu0 %vm1440_vm2, %v2330_v59  ;;  %v2230_v41 = vmax.f32 %v1876_v46, 0.0 }
 0x202   :  { %v1878_v21 = vpop.f32.mrf.mxu1  ;;  %4165 = vmatmul.mubr.msk.bf16.gmra.mxu0 %vm1440_vm2, %v2331_v31 }
 0x203   :  { %v1879_v48 = vadd.f32 %v4965_v57, %v1878_v21  ;;  %v2233_v7 = vmax.f32 %v1887_v5, 0.0 }
 0x204   :  { %v4042_v30 = vpop.f32.mrf.mxu1 }
 0x205   :  { %v2231_v40 = vmax.f32 %v1879_v48, 0.0  ;;  %v2333_v16 = vpack.c.bf16 %v2233_v7, %v2232_v55  ;;  %v1900_v6 = vadd.f32 %v4042_v30, %v4965_v57 }
 0x206   :  { %v1891_v33 = vpop.f32.mrf.mxu1 }
 0x207   :  { %v2332_v2 = vpack.c.bf16 %v2231_v40, %v2230_v41  ;;  %v1892_v61 = vadd.f32 %v4965_v57, %v1891_v33  ;;  %v2236_v26 = vmax.f32 %v1900_v6, 0.0 }
 0x208   :  { %v4043_v10 = vpop.f32.mrf.mxu1 }
 0x209   :  { %v1903_v17 = vadd.f32 %v4043_v10, %v4965_v57  ;;  %4168 = vmatprep.mubr.msk.bf16.mxu0 %vm1440_vm2, %v2332_v2  ;;  %v2234_v29 = vmax.f32 %v1892_v61, 0.0 }
 0x20a   :  { %v1894_v12 = vpop.f32.mrf.mxu1  ;;  %4169 = vmatmul.mubr.msk.bf16.gmra.mxu0 %vm1440_vm2, %v2333_v16 }
 0x20b   :  { %v1895_v63 = vadd.f32 %v4965_v57, %v1894_v12  ;;  %v2237_v11 = vmax.f32 %v1903_v17, 0.0 }
 0x20c   :  { %v4046_v54 = vpop.f32.mrf.mxu1 }
 0x20d   :  { %v2235_v36 = vmax.f32 %v1895_v63, 0.0  ;;  %v2335_v4 = vpack.c.bf16 %v2237_v11, %v2236_v26  ;;  %v1916_v15 = vadd.f32 %v4046_v54, %v4965_v57 }
 0x20e   :  { %v1907_v0 = vpop.f32.mrf.mxu1 }
 0x20f   :  { %v2334_v1 = vpack.c.bf16 %v2235_v36, %v2234_v29  ;;  %v1908_v60 = vadd.f32 %v4965_v57, %v1907_v0  ;;  %v2240_v38 = vmax.f32 %v1916_v15, 0.0 }
 0x210   :  { %v4047_v14 = vpop.f32.mrf.mxu1 }
 0x211   :  { %v1919_v23 = vadd.f32 %v4047_v14, %v4965_v57  ;;  %4172 = vmatprep.mubr.msk.bf16.mxu0 %vm1440_vm2, %v2334_v1  ;;  %v2238_v62 = vmax.f32 %v1908_v60, 0.0 }
 0x212   :  { %v1910_v28 = vpop.f32.mrf.mxu1  ;;  %4173 = vmatmul.mubr.msk.bf16.gmra.mxu0 %vm1440_vm2, %v2335_v4 }
 0x213   :  { %v1911_v25 = vadd.f32 %v4965_v57, %v1910_v28  ;;  %v2241_v49 = vmax.f32 %v1919_v23, 0.0 }
 0x214   :  { %v4050_v34 = vpop.f32.mrf.mxu1 }
 0x215   :  { %v2239_v22 = vmax.f32 %v1911_v25, 0.0  ;;  %v2337_v8 = vpack.c.bf16 %v2241_v49, %v2240_v38  ;;  %v1932_v18 = vadd.f32 %v4050_v34, %v4965_v57 }
 0x216   :  { %v1923_v13 = vpop.f32.mrf.mxu1 }
 0x217   :  { %v2336_v9 = vpack.c.bf16 %v2239_v22, %v2238_v62  ;;  %v1924_v47 = vadd.f32 %v4965_v57, %v1923_v13  ;;  %v2244_v24 = vmax.f32 %v1932_v18, 0.0 }
 0x218   :  { %v4051_v3 = vpop.f32.mrf.mxu1 }
 0x219   :  { %v1935_v32 = vadd.f32 %v4051_v3, %v4965_v57  ;;  %4176 = vmatprep.mubr.msk.bf16.mxu0 %vm1440_vm2, %v2336_v9  ;;  %v2242_v39 = vmax.f32 %v1924_v47, 0.0 }
 0x21a   :  { %v1926_v20 = vpop.f32.mrf.mxu1  ;;  %4177 = vmatmul.mubr.msk.bf16.gmra.mxu0 %vm1440_vm2, %v2337_v8 }
 0x21b   :  { %v1927_v37 = vadd.f32 %v4965_v57, %v1926_v20  ;;  %v2245_v45 = vmax.f32 %v1935_v32, 0.0 }
 0x21c   :  { %v4054_v19 = vpop.f32.mrf.mxu1 }
 0x21d   :  { %v2243_v53 = vmax.f32 %v1927_v37, 0.0  ;;  %v2339_v44 = vpack.c.bf16 %v2245_v45, %v2244_v24  ;;  %v1948_v56 = vadd.f32 %v4054_v19, %v4965_v57 }
 0x21e   :  { %v1939_v43 = vpop.f32.mrf.mxu1 }
 0x21f   :  { %v2338_v58 = vpack.c.bf16 %v2243_v53, %v2242_v39  ;;  %v1940_v51 = vadd.f32 %v4965_v57, %v1939_v43  ;;  %v2248_v50 = vmax.f32 %v1948_v56, 0.0 }
 0x220   :  { %v4055_v42 = vpop.f32.mrf.mxu1 }
 0x221   :  { %v1951_v52 = vadd.f32 %v4055_v42, %v4965_v57  ;;  %4180 = vmatprep.mubr.msk.bf16.mxu0 %vm1440_vm2, %v2338_v58  ;;  %v2246_v46 = vmax.f32 %v1940_v51, 0.0 }
 0x222   :  { %v1942_v35 = vpop.f32.mrf.mxu1  ;;  %4181 = vmatmul.mubr.msk.bf16.gmra.mxu0 %vm1440_vm2, %v2339_v44 }
 0x223   :  { %v1943_v59 = vadd.f32 %v4965_v57, %v1942_v35  ;;  %v2249_v31 = vmax.f32 %v1951_v52, 0.0 }
 0x224   :  { %v4058_v27 = vpop.f32.mrf.mxu1 }
 0x225   :  { %v2247_v5 = vmax.f32 %v1943_v59, 0.0  ;;  %v2341_v7 = vpack.c.bf16 %v2249_v31, %v2248_v50  ;;  %v1964_v55 = vadd.f32 %v4058_v27, %v4965_v57 }
 0x226   :  { %v1955_v21 = vpop.f32.mrf.mxu1 }
 0x227   :  { %v2340_v48 = vpack.c.bf16 %v2247_v5, %v2246_v46  ;;  %v1956_v41 = vadd.f32 %v4965_v57, %v1955_v21  ;;  %v2252_v6 = vmax.f32 %v1964_v55, 0.0 }
 0x228   :  { %v4059_v30 = vpop.f32.mrf.mxu1 }
 0x229   :  { %v1967_v40 = vadd.f32 %v4059_v30, %v4965_v57  ;;  %4184 = vmatprep.mubr.msk.bf16.mxu0 %vm1440_vm2, %v2340_v48  ;;  %v2250_v61 = vmax.f32 %v1956_v41, 0.0 }
 0x22a   :  { %v1958_v33 = vpop.f32.mrf.mxu1  ;;  %4185 = vmatmul.mubr.msk.bf16.gmra.mxu0 %vm1440_vm2, %v2341_v7 }
 0x22b   :  { %v1959_v2 = vadd.f32 %v4965_v57, %v1958_v33  ;;  %v2253_v16 = vmax.f32 %v1967_v40, 0.0 }
 0x22c   :  { %v4062_v10 = vpop.f32.mrf.mxu1 }
 0x22d   :  { %v2251_v17 = vmax.f32 %v1959_v2, 0.0  ;;  %v2343_v11 = vpack.c.bf16 %v2253_v16, %v2252_v6  ;;  %v1980_v26 = vadd.f32 %v4062_v10, %v4965_v57 }
 0x22e   :  { %v1971_v12 = vpop.f32.mrf.mxu1 }
 0x22f   :  { %v2342_v63 = vpack.c.bf16 %v2251_v17, %v2250_v61  ;;  %v1972_v29 = vadd.f32 %v4965_v57, %v1971_v12  ;;  %v2256_v15 = vmax.f32 %v1980_v26, 0.0 }
 0x230   :  { %v4063_v54 = vpop.f32.mrf.mxu1 }
 0x231   :  { %v1983_v36 = vadd.f32 %v4063_v54, %v4965_v57  ;;  %4188 = vmatprep.mubr.msk.bf16.mxu0 %vm1440_vm2, %v2342_v63  ;;  %v2254_v60 = vmax.f32 %v1972_v29, 0.0 }
 0x232   :  { %v1974_v0 = vpop.f32.mrf.mxu1  ;;  %4189 = vmatmul.mubr.msk.bf16.gmra.mxu0 %vm1440_vm2, %v2343_v11 }
 0x233   :  { %v1975_v1 = vadd.f32 %v4965_v57, %v1974_v0  ;;  %v2257_v4 = vmax.f32 %v1983_v36, 0.0 }
 0x234   :  { %v4066_v14 = vpop.f32.mrf.mxu1 }
 0x235   :  { %v2255_v23 = vmax.f32 %v1975_v1, 0.0  ;;  %v2345_v49 = vpack.c.bf16 %v2257_v4, %v2256_v15  ;;  %v1996_v38 = vadd.f32 %v4066_v14, %v4965_v57 }
 0x236   :  { %v1987_v28 = vpop.f32.mrf.mxu1 }
 0x237   :  { %v2344_v25 = vpack.c.bf16 %v2255_v23, %v2254_v60  ;;  %v1988_v62 = vadd.f32 %v4965_v57, %v1987_v28  ;;  %v2260_v18 = vmax.f32 %v1996_v38, 0.0 }
 0x238   :  { %v4067_v34 = vpop.f32.mrf.mxu1 }
 0x239   :  { %v1999_v22 = vadd.f32 %v4067_v34, %v4965_v57  ;;  %4192 = vmatprep.mubr.msk.bf16.mxu0 %vm1440_vm2, %v2344_v25  ;;  %v2258_v47 = vmax.f32 %v1988_v62, 0.0 }
 0x23a   :  { %v1990_v13 = vpop.f32.mrf.mxu1  ;;  %4193 = vmatmul.mubr.msk.bf16.gmra.mxu0 %vm1440_vm2, %v2345_v49 }
 0x23b   :  { %v1991_v9 = vadd.f32 %v4965_v57, %v1990_v13  ;;  %v2261_v8 = vmax.f32 %v1999_v22, 0.0 }
 0x23c   :  { %v4070_v3 = vpop.f32.mrf.mxu1 }
 0x23d   :  { %v2259_v32 = vmax.f32 %v1991_v9, 0.0  ;;  %v2347_v45 = vpack.c.bf16 %v2261_v8, %v2260_v18  ;;  %v2012_v24 = vadd.f32 %v4070_v3, %v4965_v57 }
 0x23e   :  { %v2003_v20 = vpop.f32.mrf.mxu1 }
 0x23f   :  { %v2346_v37 = vpack.c.bf16 %v2259_v32, %v2258_v47  ;;  %v2004_v39 = vadd.f32 %v4965_v57, %v2003_v20  ;;  %v2264_v56 = vmax.f32 %v2012_v24, 0.0 }
 0x240   :  { %v4071_v19 = vpop.f32.mrf.mxu1 }
 0x241   :  { %v2015_v53 = vadd.f32 %v4071_v19, %v4965_v57  ;;  %4196 = vmatprep.mubr.msk.bf16.mxu0 %vm1440_vm2, %v2346_v37  ;;  %v2262_v51 = vmax.f32 %v2004_v39, 0.0 }
 0x242   :  { %v2006_v43 = vpop.f32.mrf.mxu1  ;;  %4197 = vmatmul.mubr.msk.bf16.gmra.mxu0 %vm1440_vm2, %v2347_v45 }
 0x243   :  { %v2007_v58 = vadd.f32 %v4965_v57, %v2006_v43  ;;  %v2265_v44 = vmax.f32 %v2015_v53, 0.0 }
 0x244   :  { %v4074_v42 = vpop.f32.mrf.mxu1 }
 0x245   :  { %v2263_v52 = vmax.f32 %v2007_v58, 0.0  ;;  %v2349_v31 = vpack.c.bf16 %v2265_v44, %v2264_v56  ;;  %v2028_v50 = vadd.f32 %v4074_v42, %v4965_v57  ;;  %v5186_v44 = vld [vmem:[%s5406_s6] ss:$0 sm:$0xff] }
 0x246   :  { %v2019_v35 = vpop.f32.mrf.mxu1 }
 0x247   :  { %v2348_v59 = vpack.c.bf16 %v2263_v52, %v2262_v51  ;;  %v2020_v46 = vadd.f32 %v4965_v57, %v2019_v35  ;;  %v2268_v55 = vmax.f32 %v2028_v50, 0.0 }
 0x248   :  { %v4075_v27 = vpop.f32.mrf.mxu1 }
 0x249   :  { %v2031_v5 = vadd.f32 %v4075_v27, %v4965_v57  ;;  %4200 = vmatprep.mubr.msk.bf16.mxu0 %vm1440_vm2, %v2348_v59  ;;  %v2266_v41 = vmax.f32 %v2020_v46, 0.0 }
 0x24a   :  { %v2022_v21 = vpop.f32.mrf.mxu1  ;;  %4201 = vmatmul.mubr.msk.bf16.gmra.mxu0 %vm1440_vm2, %v2349_v31 }
 0x24b   :  { %v2023_v48 = vadd.f32 %v4965_v57, %v2022_v21  ;;  %v2269_v7 = vmax.f32 %v2031_v5, 0.0 }
 0x24c   :  { %v4078_v30 = vpop.f32.mrf.mxu1 }
 0x24d   :  { %v2267_v40 = vmax.f32 %v2023_v48, 0.0  ;;  %v2351_v16 = vpack.c.bf16 %v2269_v7, %v2268_v55  ;;  %v2044_v6 = vadd.f32 %v4078_v30, %v4965_v57 }
 0x24e   :  { %v2035_v33 = vpop.f32.mrf.mxu1 }
 0x24f   :  { %v2350_v2 = vpack.c.bf16 %v2267_v40, %v2266_v41  ;;  %v2036_v61 = vadd.f32 %v4965_v57, %v2035_v33  ;;  %v2272_v26 = vmax.f32 %v2044_v6, 0.0 }
 0x250   :  { %v4079_v10 = vpop.f32.mrf.mxu1 }
 0x251   :  { %v2047_v17 = vadd.f32 %v4079_v10, %v4965_v57  ;;  %4204 = vmatprep.mubr.msk.bf16.mxu0 %vm1440_vm2, %v2350_v2  ;;  %v2270_v29 = vmax.f32 %v2036_v61, 0.0 }
 0x252   :  { %v2038_v12 = vpop.f32.mrf.mxu1  ;;  %4205 = vmatmul.mubr.msk.bf16.gmra.mxu0 %vm1440_vm2, %v2351_v16 }
 0x253   :  { %v2039_v63 = vadd.f32 %v4965_v57, %v2038_v12  ;;  %v2273_v11 = vmax.f32 %v2047_v17, 0.0 }
 0x254   :  { %v4082_v54 = vpop.f32.mrf.mxu1 }
 0x255   :  { %v2271_v36 = vmax.f32 %v2039_v63, 0.0  ;;  %v2353_v4 = vpack.c.bf16 %v2273_v11, %v2272_v26  ;;  %v2060_v15 = vadd.f32 %v4082_v54, %v4965_v57 }
 0x256   :  { %v2051_v0 = vpop.f32.mrf.mxu1 }
 0x257   :  { %v2352_v1 = vpack.c.bf16 %v2271_v36, %v2270_v29  ;;  %v2052_v60 = vadd.f32 %v4965_v57, %v2051_v0  ;;  %v2276_v38 = vmax.f32 %v2060_v15, 0.0 }
 0x258   :  { %v4083_v14 = vpop.f32.mrf.mxu1 }
 0x259   :  { %v2063_v23 = vadd.f32 %v4083_v14, %v4965_v57  ;;  %4208 = vmatprep.mubr.msk.bf16.mxu0 %vm1440_vm2, %v2352_v1  ;;  %v2274_v62 = vmax.f32 %v2052_v60, 0.0  ;;  %v5204_v14 = vld [vmem:[%s5405_s4] ss:$0 sm:$0xff] }
 0x25a   :  { %v2054_v28 = vpop.f32.mrf.mxu1  ;;  %4209 = vmatmul.mubr.msk.bf16.gmra.mxu0 %vm1440_vm2, %v2353_v4 }
 0x25b   :  { %v2055_v25 = vadd.f32 %v4965_v57, %v2054_v28  ;;  %v2277_v49 = vmax.f32 %v2063_v23, 0.0 }
 0x25c   :  { %v4086_v34 = vpop.f32.mrf.mxu1 }
 0x25d   :  { %v2275_v22 = vmax.f32 %v2055_v25, 0.0  ;;  %v2355_v8 = vpack.c.bf16 %v2277_v49, %v2276_v38  ;;  %v2076_v18 = vadd.f32 %v4086_v34, %v4965_v57 }
 0x25e   :  { %v2067_v13 = vpop.f32.mrf.mxu1 }
 0x25f   :  { %v2354_v9 = vpack.c.bf16 %v2275_v22, %v2274_v62  ;;  %v2068_v47 = vadd.f32 %v4965_v57, %v2067_v13  ;;  %v2280_v58 = vmax.f32 %v2076_v18, 0.0 }
 0x260   :  { %v4087_v3 = vpop.f32.mrf.mxu1 }
 0x261   :  { %v2079_v32 = vadd.f32 %v4087_v3, %v4965_v57  ;;  %4212 = vmatprep.mubr.msk.bf16.mxu0 %vm1440_vm2, %v2354_v9  ;;  %v2278_v24 = vmax.f32 %v2068_v47, 0.0 }
 0x262   :  { %v2070_v20 = vpop.f32.mrf.mxu1  ;;  %v4118_v37 = vpop.f32.mrf.mxu0  ;;  %4213 = vmatmul.mubr.msk.bf16.gmra.mxu0 %vm1440_vm2, %v2355_v8 }
 0x263   :  { %v2071_v45 = vadd.f32 %v4965_v57, %v2070_v20  ;;  %v2281_v19 = vmax.f32 %v2079_v32, 0.0  ;;  %v2628_v31 = vadd.f32 %v4118_v37, %v5186_v44 }
 0x264   :  { %v4090_v39 = vpop.f32.mrf.mxu1  ;;  %v2619_v53 = vpop.f32.mrf.mxu0 }
 0x265   :  { %v2279_v43 = vmax.f32 %v2071_v45, 0.0  ;;  %v2357_v56 = vpack.c.bf16 %v2281_v19, %v2280_v58  ;;  %v2092_v5 = vadd.f32 %v4090_v39, %v4965_v57  ;;  %v2620_v30 = vadd.f32 %v5186_v44, %v2619_v53 }
 0x266   :  { %v2083_v42 = vpop.f32.mrf.mxu1  ;;  %v4119_v51 = vpop.f32.mrf.mxu0  ;;  %v3132_v33 = vmax.f32 %v2628_v31, 0.0 }
 0x267   :  { %v2356_v52 = vpack.c.bf16 %v2279_v43, %v2278_v24  ;;  %v2084_v27 = vadd.f32 %v4965_v57, %v2083_v42  ;;  %v2284_v61 = vmax.f32 %v2092_v5, 0.0  ;;  %v2631_v17 = vadd.f32 %v4119_v51, %v5186_v44 }
 0x268   :  { %v4091_v35 = vpop.f32.mrf.mxu1  ;;  %v2622_v59 = vpop.f32.mrf.mxu0  ;;  %v3130_v29 = vmax.f32 %v2620_v30, 0.0 }
 0x269   :  { %v2095_v46 = vadd.f32 %v4091_v35, %v4965_v57  ;;  %4216 = vmatprep.mubr.msk.bf16.mxu0 %vm1440_vm2, %v2356_v52  ;;  %v2282_v2 = vmax.f32 %v2084_v27, 0.0  ;;  %v3133_v28 = vmax.f32 %v2631_v17, 0.0 }
 0x26a   :  { %v2086_v50 = vpop.f32.mrf.mxu1  ;;  %v4122_v21 = vpop.f32.mrf.mxu0  ;;  %4217 = vmatmul.mubr.msk.bf16.gmra.mxu0 %vm1440_vm2, %v2357_v56 }
 0x26b   :  { %v2087_v48 = vadd.f32 %v4965_v57, %v2086_v50  ;;  %v2644_v7 = vadd.f32 %v4122_v21, %v5186_v44  ;;  %v2285_v41 = vmax.f32 %v2095_v46, 0.0  ;;  %v2623_v57 = vadd.f32 %v5186_v44, %v2622_v59 }
 0x26c   :  { %v4094_v40 = vpop.f32.mrf.mxu1  ;;  %v2635_v55 = vpop.f32.mrf.mxu0 }
 0x26d   :  { %v2283_v16 = vmax.f32 %v2087_v48, 0.0  ;;  %v3136_v10 = vmax.f32 %v2644_v7, 0.0  ;;  %v2636_v6 = vadd.f32 %v5186_v44, %v2635_v55  ;;  %v2359_v36 = vpack.c.bf16 %v2285_v41, %v2284_v61 }
 0x26e   :  { %v2099_v12 = vpop.f32.mrf.mxu1  ;;  %v4123_v63 = vpop.f32.mrf.mxu0  ;;  %v2108_v25 = vadd.f32 %v5204_v14, %v4094_v40  ;;  %v3131_v38 = vmax.f32 %v2623_v57, 0.0 }
 0x26f   :  { %v2358_v11 = vpack.c.bf16 %v2283_v16, %v2282_v2  ;;  %v3260_v54 = vmax.f32 %v3132_v33, %v3136_v10  ;;  %v3134_v26 = vmax.f32 %v2636_v6, 0.0  ;;  %v2647_v0 = vadd.f32 %v4123_v63, %v5186_v44 }
 0x270   :  { %v4095_v1 = vpop.f32.mrf.mxu1  ;;  %v2638_v4 = vpop.f32.mrf.mxu0  ;;  %v2100_v60 = vadd.f32 %v5204_v14, %v2099_v12  ;;  %v2288_v39 = vmax.f32 %v2108_v25, 0.0 }
 0x271   :  { %v2111_v23 = vadd.f32 %v5204_v14, %v4095_v1  ;;  %v2639_v15 = vadd.f32 %v5186_v44, %v2638_v4  ;;  %4220 = vmatprep.mubr.msk.bf16.mxu0 %vm1440_vm2, %v2358_v11  ;;  %v3258_v49 = vmax.f32 %v3130_v29, %v3134_v26  ;;  %v3137_v34 = vmax.f32 %v2647_v0, 0.0 }
 0x272   :  { %v2102_v62 = vpop.f32.mrf.mxu1  ;;  %v4126_v22 = vpop.f32.mrf.mxu0  ;;  %4221 = vmatmul.mubr.msk.bf16.gmra.mxu0 %vm1440_vm2, %v2359_v36  ;;  %v2286_v20 = vmax.f32 %v2100_v60, 0.0 }
 0x273   :  { %v3135_v13 = vmax.f32 %v2639_v15, 0.0  ;;  %v2103_v9 = vadd.f32 %v5204_v14, %v2102_v62  ;;  %v2660_v8 = vadd.f32 %v4126_v22, %v5186_v44  ;;  %v3261_v3 = vmax.f32 %v3133_v28, %v3137_v34 }
 0x274   :  { %v2289_v47 = vmax.f32 %v2111_v23, 0.0  ;;  %v4098_v32 = vpop.f32.mrf.mxu1  ;;  %v2651_v18 = vpop.f32.mrf.mxu0 }
 0x275   :  { %v3259_v37 = vmax.f32 %v3131_v38, %v3135_v13  ;;  %v2287_v45 = vmax.f32 %v2103_v9, 0.0  ;;  %v3140_v19 = vmax.f32 %v2660_v8, 0.0  ;;  %v2652_v53 = vadd.f32 %v5186_v44, %v2651_v18 }
 0x276   :  { %v2115_v24 = vpop.f32.mrf.mxu1  ;;  %v4127_v43 = vpop.f32.mrf.mxu0  ;;  %v2361_v52 = vpack.c.bf16 %v2289_v47, %v2288_v39  ;;  %v2124_v50 = vadd.f32 %v5204_v14, %v4098_v32 }
 0x277   :  { %v2360_v58 = vpack.c.bf16 %v2287_v45, %v2286_v20  ;;  %v3264_v42 = vmax.f32 %v3260_v54, %v3140_v19  ;;  %v2663_v51 = vadd.f32 %v4127_v43, %v5186_v44  ;;  %v3138_v56 = vmax.f32 %v2652_v53, 0.0 }
 0x278   :  { %v4099_v35 = vpop.f32.mrf.mxu1  ;;  %v2654_v59 = vpop.f32.mrf.mxu0  ;;  %v2116_v31 = vadd.f32 %v5204_v14, %v2115_v24  ;;  %v2292_v6 = vmax.f32 %v2124_v50, 0.0 }
 0x279   :  { %v3141_v27 = vmax.f32 %v2663_v51, 0.0  ;;  %v2127_v46 = vadd.f32 %v5204_v14, %v4099_v35  ;;  %v2655_v5 = vadd.f32 %v5186_v44, %v2654_v59  ;;  %4224 = vmatprep.mubr.msk.bf16.mxu0 %vm1440_vm2, %v2360_v58  ;;  %v3262_v21 = vmax.f32 %v3258_v49, %v3138_v56 }
 0x27a   :  { %v2118_v48 = vpop.f32.mrf.mxu1  ;;  %v4130_v7 = vpop.f32.mrf.mxu0  ;;  %4225 = vmatmul.mubr.msk.bf16.gmra.mxu0 %vm1440_vm2, %v2361_v52  ;;  %v2290_v10 = vmax.f32 %v2116_v31, 0.0 }
 0x27b   :  { %v3265_v30 = vmax.f32 %v3261_v3, %v3141_v27  ;;  %v3139_v41 = vmax.f32 %v2655_v5, 0.0  ;;  %v2119_v40 = vadd.f32 %v5204_v14, %v2118_v48  ;;  %v2293_v55 = vmax.f32 %v2127_v46, 0.0 }
 0x27c   :  { %v2676_v33 = vadd.f32 %v4130_v7, %v5186_v44  ;;  %v4102_v2 = vpop.f32.mrf.mxu1  ;;  %v2667_v16 = vpop.f32.mrf.mxu0 }
 0x27d   :  { %v3263_v61 = vmax.f32 %v3259_v37, %v3139_v41  ;;  %v2291_v17 = vmax.f32 %v2119_v40, 0.0  ;;  %v2668_v63 = vadd.f32 %v5186_v44, %v2667_v16  ;;  %v2363_v36 = vpack.c.bf16 %v2293_v55, %v2292_v6 }
 0x27e   :  { %v3144_v12 = vmax.f32 %v2676_v33, 0.0  ;;  %v2131_v57 = vpop.f32.mrf.mxu1  ;;  %v4131_v11 = vpop.f32.mrf.mxu0  ;;  %v2140_v25 = vadd.f32 %v5204_v14, %v4102_v2 }
 0x27f   :  { %v2362_v54 = vpack.c.bf16 %v2291_v17, %v2290_v10  ;;  %v2679_v29 = vadd.f32 %v4131_v11, %v5186_v44  ;;  %v3142_v0 = vmax.f32 %v2668_v63, 0.0  ;;  %v2132_v60 = vadd.f32 %v5204_v14, %v2131_v57 }
 0x280   :  { %v3268_v26 = vmax.f32 %v3264_v42, %v3144_v12  ;;  %v4103_v1 = vpop.f32.mrf.mxu1  ;;  %v2670_v4 = vpop.f32.mrf.mxu0  ;;  %v2296_v37 = vmax.f32 %v2140_v25, 0.0 }
 0x281   :  { %v3145_v23 = vmax.f32 %v2679_v29, 0.0  ;;  %v2143_v15 = vadd.f32 %v5204_v14, %v4103_v1  ;;  %v2671_v28 = vadd.f32 %v5186_v44, %v2670_v4  ;;  %4228 = vmatprep.mubr.msk.bf16.mxu0 %vm1440_vm2, %v2362_v54  ;;  %v3266_v49 = vmax.f32 %v3262_v21, %v3142_v0 }
 0x282   :  { %v2134_v34 = vpop.f32.mrf.mxu1  ;;  %v4134_v62 = vpop.f32.mrf.mxu0  ;;  %4229 = vmatmul.mubr.msk.bf16.gmra.mxu0 %vm1440_vm2, %v2363_v36  ;;  %v2294_v32 = vmax.f32 %v2132_v60, 0.0 }
 0x283   :  { %v3269_v22 = vmax.f32 %v3265_v30, %v3145_v23  ;;  %v3143_v38 = vmax.f32 %v2671_v28, 0.0  ;;  %v2135_v13 = vadd.f32 %v5204_v14, %v2134_v34  ;;  %v2297_v9 = vmax.f32 %v2143_v15, 0.0 }
 0x284   :  { %v2692_v8 = vadd.f32 %v4134_v62, %v5186_v44  ;;  %v4106_v3 = vpop.f32.mrf.mxu1  ;;  %v2683_v47 = vpop.f32.mrf.mxu0 }
 0x285   :  { %v3267_v18 = vmax.f32 %v3263_v61, %v3143_v38  ;;  %v2295_v20 = vmax.f32 %v2135_v13, 0.0  ;;  %v2684_v19 = vadd.f32 %v5186_v44, %v2683_v47  ;;  %v2365_v58 = vpack.c.bf16 %v2297_v9, %v2296_v37 }
 0x286   :  { %v3148_v45 = vmax.f32 %v2692_v8, 0.0  ;;  %v2147_v39 = vpop.f32.mrf.mxu1  ;;  %v4135_v53 = vpop.f32.mrf.mxu0  ;;  %v2156_v46 = vadd.f32 %v5204_v14, %v4106_v3 }
 0x287   :  { %v2364_v24 = vpack.c.bf16 %v2295_v20, %v2294_v32  ;;  %v2695_v43 = vadd.f32 %v4135_v53, %v5186_v44  ;;  %v3146_v51 = vmax.f32 %v2684_v19, 0.0  ;;  %v2148_v35 = vadd.f32 %v5204_v14, %v2147_v39 }
 0x288   :  { %v3272_v42 = vmax.f32 %v3268_v26, %v3148_v45  ;;  %v4107_v52 = vpop.f32.mrf.mxu1  ;;  %v2686_v56 = vpop.f32.mrf.mxu0  ;;  %v2300_v61 = vmax.f32 %v2156_v46, 0.0 }
 0x289   :  { %v3149_v59 = vmax.f32 %v2695_v43, 0.0  ;;  %v2159_v31 = vadd.f32 %v5204_v14, %v4107_v52  ;;  %v2687_v27 = vadd.f32 %v5186_v44, %v2686_v56  ;;  %4232 = vmatprep.mubr.msk.bf16.mxu0 %vm1440_vm2, %v2364_v24  ;;  %v3270_v5 = vmax.f32 %v3266_v49, %v3146_v51 }
 0x28a   :  { %v2150_v50 = vpop.f32.mrf.mxu1  ;;  %v4138_v21 = vpop.f32.mrf.mxu0  ;;  %4233 = vmatmul.mubr.msk.bf16.gmra.mxu0 %vm1440_vm2, %v2365_v58  ;;  %v2298_v2 = vmax.f32 %v2148_v35, 0.0 }
 0x28b   :  { %v3273_v48 = vmax.f32 %v3269_v22, %v3149_v59  ;;  %v3147_v7 = vmax.f32 %v2687_v27, 0.0  ;;  %v2151_v30 = vadd.f32 %v5204_v14, %v2150_v50  ;;  %v2301_v41 = vmax.f32 %v2159_v31, 0.0 }
 0x28c   :  { %v2708_v40 = vadd.f32 %v4138_v21, %v5186_v44  ;;  %v4110_v55 = vpop.f32.mrf.mxu1  ;;  %v2699_v33 = vpop.f32.mrf.mxu0 }
 0x28d   :  { %v3271_v16 = vmax.f32 %v3267_v18, %v3147_v7  ;;  %v2299_v10 = vmax.f32 %v2151_v30, 0.0  ;;  %v2700_v6 = vadd.f32 %v5186_v44, %v2699_v33  ;;  %v2367_v54 = vpack.c.bf16 %v2301_v41, %v2300_v61 }
 0x28e   :  { %v3152_v17 = vmax.f32 %v2708_v40, 0.0  ;;  %v2163_v12 = vpop.f32.mrf.mxu1  ;;  %v4139_v63 = vpop.f32.mrf.mxu0  ;;  %v2172_v15 = vadd.f32 %v5204_v14, %v4110_v55 }
 0x28f   :  { %v2366_v57 = vpack.c.bf16 %v2299_v10, %v2298_v2  ;;  %v2711_v11 = vadd.f32 %v4139_v63, %v5186_v44  ;;  %v3150_v36 = vmax.f32 %v2700_v6, 0.0  ;;  %v2164_v1 = vadd.f32 %v5204_v14, %v2163_v12 }
 0x290   :  { %v3276_v29 = vmax.f32 %v3272_v42, %v3152_v17  ;;  %v4111_v26 = vpop.f32.mrf.mxu1  ;;  %v2702_v0 = vpop.f32.mrf.mxu0  ;;  %v2304_v18 = vmax.f32 %v2172_v15, 0.0 }
 0x291   :  { %v3153_v4 = vmax.f32 %v2711_v11, 0.0  ;;  %v2175_v60 = vadd.f32 %v5204_v14, %v4111_v26  ;;  %v2703_v23 = vadd.f32 %v5186_v44, %v2702_v0  ;;  %4236 = vmatprep.mubr.msk.bf16.mxu0 %vm1440_vm2, %v2366_v57  ;;  %v3274_v28 = vmax.f32 %v3270_v5, %v3150_v36 }
 0x292   :  { %v2166_v25 = vpop.f32.mrf.mxu1  ;;  %v4142_v49 = vpop.f32.mrf.mxu0  ;;  %4237 = vmatmul.mubr.msk.bf16.gmra.mxu0 %vm1440_vm2, %v2367_v54  ;;  %v2302_v8 = vmax.f32 %v2164_v1, 0.0 }
 0x293   :  { %v3277_v34 = vmax.f32 %v3273_v48, %v3153_v4  ;;  %v3151_v62 = vmax.f32 %v2703_v23, 0.0  ;;  %v2167_v22 = vadd.f32 %v5204_v14, %v2166_v25  ;;  %v2305_v38 = vmax.f32 %v2175_v60, 0.0 }
 0x294   :  { %v2724_v13 = vadd.f32 %v4142_v49, %v5186_v44  ;;  %v2715_v9 = vpop.f32.mrf.mxu0 }
 0x295   :  { %v3275_v3 = vmax.f32 %v3271_v16, %v3151_v62  ;;  %v2303_v47 = vmax.f32 %v2167_v22, 0.0  ;;  %v2716_v32 = vadd.f32 %v5186_v44, %v2715_v9  ;;  %v2369_v53 = vpack.c.bf16 %v2305_v38, %v2304_v18 }
 0x296   :  { %v3156_v20 = vmax.f32 %v2724_v13, 0.0  ;;  %v4143_v37 = vpop.f32.mrf.mxu0 }
 0x297   :  { %v2368_v45 = vpack.c.bf16 %v2303_v47, %v2302_v8  ;;  %v3154_v19 = vmax.f32 %v2716_v32, 0.0  ;;  %v2727_v39 = vadd.f32 %v4143_v37, %v5186_v44 }
 0x298   :  { %v3280_v24 = vmax.f32 %v3276_v29, %v3156_v20  ;;  %v2718_v43 = vpop.f32.mrf.mxu0 }
 0x299   :  { %v3278_v14 = vmax.f32 %v3274_v28, %v3154_v19  ;;  %v3157_v58 = vmax.f32 %v2727_v39, 0.0  ;;  %v2719_v42 = vadd.f32 %v5186_v44, %v2718_v43  ;;  %4240 = vmatprep.mubr.msk.bf16.mxu0 %vm1440_vm2, %v2368_v45 }
 0x29a   :  { %v4146_v51 = vpop.f32.mrf.mxu0  ;;  %4241 = vmatmul.mubr.msk.bf16.gmra.mxu0 %vm1440_vm2, %v2369_v53 }
 0x29b   :  { %v3281_v52 = vmax.f32 %v3277_v34, %v3157_v58  ;;  %v3155_v56 = vmax.f32 %v2719_v42, 0.0  ;;  %v2740_v35 = vadd.f32 %v4146_v51, %v5186_v44 }
 0x29c   :  { %v2731_v59 = vpop.f32.mrf.mxu0 }
 0x29d   :  { %v3279_v31 = vmax.f32 %v3275_v3, %v3155_v56  ;;  %v3160_v27 = vmax.f32 %v2740_v35, 0.0  ;;  %v2732_v46 = vadd.f32 %v5186_v44, %v2731_v59 }
 0x29e   :  { %v4147_v5 = vpop.f32.mrf.mxu0 }
 0x29f   :  { %v3284_v50 = vmax.f32 %v3280_v24, %v3160_v27  ;;  %v3158_v21 = vmax.f32 %v2732_v46, 0.0  ;;  %v2743_v48 = vadd.f32 %v4147_v5, %v5186_v44 }
 0x2a0   :  { %v2734_v7 = vpop.f32.mrf.mxu0 }
 0x2a1   :  { %v3282_v30 = vmax.f32 %v3278_v14, %v3158_v21  ;;  %v3161_v41 = vmax.f32 %v2743_v48, 0.0  ;;  %v2735_v40 = vadd.f32 %v5186_v44, %v2734_v7 }
 0x2a2   :  { %v4150_v55 = vpop.f32.mrf.mxu0 }
 0x2a3   :  { %v3285_v33 = vmax.f32 %v3281_v52, %v3161_v41  ;;  %v3159_v2 = vmax.f32 %v2735_v40, 0.0  ;;  %v2756_v16 = vadd.f32 %v4150_v55, %v5186_v44 }
 0x2a4   :  { %v2747_v10 = vpop.f32.mrf.mxu0 }
 0x2a5   :  { %v3283_v61 = vmax.f32 %v3279_v31, %v3159_v2  ;;  %v3164_v17 = vmax.f32 %v2756_v16, 0.0  ;;  %v2748_v6 = vadd.f32 %v5186_v44, %v2747_v10 }
 0x2a6   :  { %v4151_v12 = vpop.f32.mrf.mxu0 }
 0x2a7   :  { %v3288_v63 = vmax.f32 %v3284_v50, %v3164_v17  ;;  %v3162_v57 = vmax.f32 %v2748_v6, 0.0  ;;  %v2759_v11 = vadd.f32 %v4151_v12, %v5186_v44 }
 0x2a8   :  { %v2750_v54 = vpop.f32.mrf.mxu0 }
 0x2a9   :  { %v3286_v29 = vmax.f32 %v3282_v30, %v3162_v57  ;;  %v3165_v36 = vmax.f32 %v2759_v11, 0.0  ;;  %v2751_v26 = vadd.f32 %v5186_v44, %v2750_v54 }
 0x2aa   :  { %v4154_v0 = vpop.f32.mrf.mxu0 }
 0x2ab   :  { %v3289_v1 = vmax.f32 %v3285_v33, %v3165_v36  ;;  %v3163_v4 = vmax.f32 %v2751_v26, 0.0  ;;  %v2772_v60 = vadd.f32 %v4154_v0, %v5186_v44 }
 0x2ac   :  { %v2763_v23 = vpop.f32.mrf.mxu0 }
 0x2ad   :  { %v3287_v15 = vmax.f32 %v3283_v61, %v3163_v4  ;;  %v3168_v28 = vmax.f32 %v2772_v60, 0.0  ;;  %v2764_v25 = vadd.f32 %v5186_v44, %v2763_v23 }
 0x2ae   :  { %v4155_v49 = vpop.f32.mrf.mxu0 }
 0x2af   :  { %v3292_v34 = vmax.f32 %v3288_v63, %v3168_v28  ;;  %v3166_v62 = vmax.f32 %v2764_v25, 0.0  ;;  %v2775_v22 = vadd.f32 %v4155_v49, %v5186_v44 }
 0x2b0   :  { %v2766_v38 = vpop.f32.mrf.mxu0 }
 0x2b1   :  { %v3290_v13 = vmax.f32 %v3286_v29, %v3166_v62  ;;  %v3169_v9 = vmax.f32 %v2775_v22, 0.0  ;;  %v2767_v8 = vadd.f32 %v5186_v44, %v2766_v38 }
 0x2b2   :  { %v4158_v3 = vpop.f32.mrf.mxu0 }
 0x2b3   :  { %v3293_v47 = vmax.f32 %v3289_v1, %v3169_v9  ;;  %v3167_v32 = vmax.f32 %v2767_v8, 0.0  ;;  %v2788_v18 = vadd.f32 %v4158_v3, %v5186_v44 }
 0x2b4   :  { %v2779_v20 = vpop.f32.mrf.mxu0 }
 0x2b5   :  { %v3291_v37 = vmax.f32 %v3287_v15, %v3167_v32  ;;  %v3172_v45 = vmax.f32 %v2788_v18, 0.0  ;;  %v2780_v19 = vadd.f32 %v5186_v44, %v2779_v20 }
 0x2b6   :  { %v4159_v39 = vpop.f32.mrf.mxu0 }
 0x2b7   :  { %v3296_v53 = vmax.f32 %v3292_v34, %v3172_v45  ;;  %v3170_v24 = vmax.f32 %v2780_v19, 0.0  ;;  %v2791_v43 = vadd.f32 %v4159_v39, %v5186_v44 }
 0x2b8   :  { %v2782_v14 = vpop.f32.mrf.mxu0 }
 0x2b9   :  { %v3294_v58 = vmax.f32 %v3290_v13, %v3170_v24  ;;  %v3173_v42 = vmax.f32 %v2791_v43, 0.0  ;;  %v2783_v51 = vadd.f32 %v5186_v44, %v2782_v14 }
 0x2ba   :  { %v4162_v52 = vpop.f32.mrf.mxu0 }
 0x2bb   :  { %v3297_v56 = vmax.f32 %v3293_v47, %v3173_v42  ;;  %v3171_v35 = vmax.f32 %v2783_v51, 0.0  ;;  %v2804_v59 = vadd.f32 %v4162_v52, %v5186_v44 }
 0x2bc   :  { %v2795_v31 = vpop.f32.mrf.mxu0 }
 0x2bd   :  { %v3295_v27 = vmax.f32 %v3291_v37, %v3171_v35  ;;  %v3176_v46 = vmax.f32 %v2804_v59, 0.0  ;;  %v2796_v5 = vadd.f32 %v5186_v44, %v2795_v31 }
 0x2be   :  { %v4163_v50 = vpop.f32.mrf.mxu0 }
 0x2bf   :  { %v3300_v21 = vmax.f32 %v3296_v53, %v3176_v46  ;;  %v3174_v48 = vmax.f32 %v2796_v5, 0.0  ;;  %v2807_v7 = vadd.f32 %v4163_v50, %v5186_v44 }
 0x2c0   :  { %v2798_v30 = vpop.f32.mrf.mxu0 }
 0x2c1   :  { %v3298_v41 = vmax.f32 %v3294_v58, %v3174_v48  ;;  %v3177_v40 = vmax.f32 %v2807_v7, 0.0  ;;  %v2799_v55 = vadd.f32 %v5186_v44, %v2798_v30 }
 0x2c2   :  { %v4166_v33 = vpop.f32.mrf.mxu0 }
 0x2c3   :  { %v3301_v2 = vmax.f32 %v3297_v56, %v3177_v40  ;;  %v3175_v16 = vmax.f32 %v2799_v55, 0.0  ;;  %v2820_v10 = vadd.f32 %v4166_v33, %v5186_v44 }
 0x2c4   :  { %v2811_v61 = vpop.f32.mrf.mxu0 }
 0x2c5   :  { %v3299_v17 = vmax.f32 %v3295_v27, %v3175_v16  ;;  %v3180_v6 = vmax.f32 %v2820_v10, 0.0  ;;  %v2812_v12 = vadd.f32 %v5186_v44, %v2811_v61 }
 0x2c6   :  { %v4167_v63 = vpop.f32.mrf.mxu0 }
 0x2c7   :  { %v3304_v57 = vmax.f32 %v3300_v21, %v3180_v6  ;;  %v3178_v11 = vmax.f32 %v2812_v12, 0.0  ;;  %v2823_v54 = vadd.f32 %v4167_v63, %v5186_v44 }
 0x2c8   :  { %v2814_v29 = vpop.f32.mrf.mxu0 }
 0x2c9   :  { %v3302_v36 = vmax.f32 %v3298_v41, %v3178_v11  ;;  %v3181_v26 = vmax.f32 %v2823_v54, 0.0  ;;  %v2815_v0 = vadd.f32 %v5186_v44, %v2814_v29 }
 0x2ca   :  { %v4170_v1 = vpop.f32.mrf.mxu0 }
 0x2cb   :  { %v3305_v4 = vmax.f32 %v3301_v2, %v3181_v26  ;;  %v3179_v60 = vmax.f32 %v2815_v0, 0.0  ;;  %v2836_v23 = vadd.f32 %v4170_v1, %v5186_v44 }
 0x2cc   :  { %v2827_v15 = vpop.f32.mrf.mxu0 }
 0x2cd   :  { %v3303_v28 = vmax.f32 %v3299_v17, %v3179_v60  ;;  %v3184_v25 = vmax.f32 %v2836_v23, 0.0  ;;  %v2828_v49 = vadd.f32 %v5186_v44, %v2827_v15 }
 0x2ce   :  { %v4171_v34 = vpop.f32.mrf.mxu0 }
 0x2cf   :  { %v3308_v62 = vmax.f32 %v3304_v57, %v3184_v25  ;;  %v3182_v22 = vmax.f32 %v2828_v49, 0.0  ;;  %v2839_v38 = vadd.f32 %v4171_v34, %v5186_v44 }
 0x2d0   :  { %v2830_v13 = vpop.f32.mrf.mxu0 }
 0x2d1   :  { %v3306_v9 = vmax.f32 %v3302_v36, %v3182_v22  ;;  %v3185_v8 = vmax.f32 %v2839_v38, 0.0  ;;  %v2831_v3 = vadd.f32 %v5186_v44, %v2830_v13 }
 0x2d2   :  { %v4174_v47 = vpop.f32.mrf.mxu0 }
 0x2d3   :  { %v3309_v32 = vmax.f32 %v3305_v4, %v3185_v8  ;;  %v3183_v18 = vmax.f32 %v2831_v3, 0.0  ;;  %v2852_v20 = vadd.f32 %v4174_v47, %v5186_v44 }
 0x2d4   :  { %v2843_v37 = vpop.f32.mrf.mxu0 }
 0x2d5   :  { %v3307_v45 = vmax.f32 %v3303_v28, %v3183_v18  ;;  %v3188_v19 = vmax.f32 %v2852_v20, 0.0  ;;  %v2844_v39 = vadd.f32 %v5186_v44, %v2843_v37 }
 0x2d6   :  { %v4175_v53 = vpop.f32.mrf.mxu0 }
 0x2d7   :  { %v3312_v24 = vmax.f32 %v3308_v62, %v3188_v19  ;;  %v3186_v43 = vmax.f32 %v2844_v39, 0.0  ;;  %v2855_v14 = vadd.f32 %v4175_v53, %v5186_v44 }
 0x2d8   :  { %v2846_v58 = vpop.f32.mrf.mxu0 }
 0x2d9   :  { %v3310_v42 = vmax.f32 %v3306_v9, %v3186_v43  ;;  %v3189_v51 = vmax.f32 %v2855_v14, 0.0  ;;  %v2847_v52 = vadd.f32 %v5186_v44, %v2846_v58 }
 0x2da   :  { %v4178_v56 = vpop.f32.mrf.mxu0 }
 0x2db   :  { %v3313_v35 = vmax.f32 %v3309_v32, %v3189_v51  ;;  %v3187_v59 = vmax.f32 %v2847_v52, 0.0  ;;  %v2868_v31 = vadd.f32 %v4178_v56, %v5186_v44 }
 0x2dc   :  { %v2859_v27 = vpop.f32.mrf.mxu0 }
 0x2dd   :  { %v3311_v46 = vmax.f32 %v3307_v45, %v3187_v59  ;;  %v3192_v5 = vmax.f32 %v2868_v31, 0.0  ;;  %v2860_v50 = vadd.f32 %v5186_v44, %v2859_v27 }
 0x2de   :  { %v4179_v21 = vpop.f32.mrf.mxu0 }
 0x2df   :  { %v3316_v48 = vmax.f32 %v3312_v24, %v3192_v5  ;;  %v3190_v7 = vmax.f32 %v2860_v50, 0.0  ;;  %v2871_v30 = vadd.f32 %v4179_v21, %v5186_v44 }
 0x2e0   :  { %v2862_v41 = vpop.f32.mrf.mxu0 }
 0x2e1   :  { %v3314_v40 = vmax.f32 %v3310_v42, %v3190_v7  ;;  %v3193_v55 = vmax.f32 %v2871_v30, 0.0  ;;  %v2863_v33 = vadd.f32 %v5186_v44, %v2862_v41 }
 0x2e2   :  { %v4182_v2 = vpop.f32.mrf.mxu0 }
 0x2e3   :  { %v3317_v16 = vmax.f32 %v3313_v35, %v3193_v55  ;;  %v3191_v10 = vmax.f32 %v2863_v33, 0.0  ;;  %v2884_v61 = vadd.f32 %v4182_v2, %v5186_v44 }
 0x2e4   :  { %v2875_v17 = vpop.f32.mrf.mxu0 }
 0x2e5   :  { %v3315_v6 = vmax.f32 %v3311_v46, %v3191_v10  ;;  %v3196_v12 = vmax.f32 %v2884_v61, 0.0  ;;  %v2876_v63 = vadd.f32 %v5186_v44, %v2875_v17 }
 0x2e6   :  { %v4183_v57 = vpop.f32.mrf.mxu0 }
 0x2e7   :  { %v3320_v11 = vmax.f32 %v3316_v48, %v3196_v12  ;;  %v3194_v54 = vmax.f32 %v2876_v63, 0.0  ;;  %v2887_v29 = vadd.f32 %v4183_v57, %v5186_v44 }
 0x2e8   :  { %v2878_v36 = vpop.f32.mrf.mxu0 }
 0x2e9   :  { %v3318_v26 = vmax.f32 %v3314_v40, %v3194_v54  ;;  %v3197_v0 = vmax.f32 %v2887_v29, 0.0  ;;  %v2879_v1 = vadd.f32 %v5186_v44, %v2878_v36 }
 0x2ea   :  { %v4186_v4 = vpop.f32.mrf.mxu0 }
 0x2eb   :  { %v3321_v60 = vmax.f32 %v3317_v16, %v3197_v0  ;;  %v3195_v23 = vmax.f32 %v2879_v1, 0.0  ;;  %v2900_v15 = vadd.f32 %v4186_v4, %v5186_v44 }
 0x2ec   :  { %v2891_v28 = vpop.f32.mrf.mxu0 }
 0x2ed   :  { %v3319_v25 = vmax.f32 %v3315_v6, %v3195_v23  ;;  %v3200_v49 = vmax.f32 %v2900_v15, 0.0  ;;  %v2892_v34 = vadd.f32 %v5186_v44, %v2891_v28 }
 0x2ee   :  { %v4187_v62 = vpop.f32.mrf.mxu0 }
 0x2ef   :  { %v3324_v22 = vmax.f32 %v3320_v11, %v3200_v49  ;;  %v3198_v38 = vmax.f32 %v2892_v34, 0.0  ;;  %v2903_v13 = vadd.f32 %v4187_v62, %v5186_v44 }
 0x2f0   :  { %v2894_v9 = vpop.f32.mrf.mxu0 }
 0x2f1   :  { %v3322_v8 = vmax.f32 %v3318_v26, %v3198_v38  ;;  %v3201_v3 = vmax.f32 %v2903_v13, 0.0  ;;  %v2895_v47 = vadd.f32 %v5186_v44, %v2894_v9 }
 0x2f2   :  { %v4190_v32 = vpop.f32.mrf.mxu0 }
 0x2f3   :  { %v3325_v18 = vmax.f32 %v3321_v60, %v3201_v3  ;;  %v3199_v20 = vmax.f32 %v2895_v47, 0.0  ;;  %v2916_v37 = vadd.f32 %v4190_v32, %v5186_v44 }
 0x2f4   :  { %v2907_v45 = vpop.f32.mrf.mxu0 }
 0x2f5   :  { %v3323_v19 = vmax.f32 %v3319_v25, %v3199_v20  ;;  %v3204_v39 = vmax.f32 %v2916_v37, 0.0  ;;  %v2908_v53 = vadd.f32 %v5186_v44, %v2907_v45 }
 0x2f6   :  { %v4191_v24 = vpop.f32.mrf.mxu0 }
 0x2f7   :  { %v3328_v43 = vmax.f32 %v3324_v22, %v3204_v39  ;;  %v3202_v14 = vmax.f32 %v2908_v53, 0.0  ;;  %v2919_v58 = vadd.f32 %v4191_v24, %v5186_v44 }
 0x2f8   :  { %v2910_v42 = vpop.f32.mrf.mxu0 }
 0x2f9   :  { %v3326_v51 = vmax.f32 %v3322_v8, %v3202_v14  ;;  %v3205_v52 = vmax.f32 %v2919_v58, 0.0  ;;  %v2911_v56 = vadd.f32 %v5186_v44, %v2910_v42 }
 0x2fa   :  { %v4194_v35 = vpop.f32.mrf.mxu0 }
 0x2fb   :  { %v3329_v59 = vmax.f32 %v3325_v18, %v3205_v52  ;;  %v3203_v31 = vmax.f32 %v2911_v56, 0.0  ;;  %v2932_v27 = vadd.f32 %v4194_v35, %v5186_v44 }
 0x2fc   :  { %v2923_v46 = vpop.f32.mrf.mxu0 }
 0x2fd   :  { %v3327_v5 = vmax.f32 %v3323_v19, %v3203_v31  ;;  %v3208_v50 = vmax.f32 %v2932_v27, 0.0  ;;  %v2924_v21 = vadd.f32 %v5186_v44, %v2923_v46 }
 0x2fe   :  { %v4195_v48 = vpop.f32.mrf.mxu0 }
 0x2ff   :  { %v3332_v7 = vmax.f32 %v3328_v43, %v3208_v50  ;;  %v3206_v30 = vmax.f32 %v2924_v21, 0.0  ;;  %v2935_v41 = vadd.f32 %v4195_v48, %v5186_v44 }
 0x300   :  { %v2926_v40 = vpop.f32.mrf.mxu0 }
 0x301   :  { %v3330_v55 = vmax.f32 %v3326_v51, %v3206_v30  ;;  %v3209_v33 = vmax.f32 %v2935_v41, 0.0  ;;  %v2927_v2 = vadd.f32 %v5186_v44, %v2926_v40 }
 0x302   :  { %v4198_v16 = vpop.f32.mrf.mxu0 }
 0x303   :  { %v3333_v10 = vmax.f32 %v3329_v59, %v3209_v33  ;;  %v3207_v61 = vmax.f32 %v2927_v2, 0.0  ;;  %v2948_v17 = vadd.f32 %v4198_v16, %v5186_v44 }
 0x304   :  { %v2939_v6 = vpop.f32.mrf.mxu0 }
 0x305   :  { %v3331_v12 = vmax.f32 %v3327_v5, %v3207_v61  ;;  %v3212_v63 = vmax.f32 %v2948_v17, 0.0  ;;  %v2940_v57 = vadd.f32 %v5186_v44, %v2939_v6 }
 0x306   :  { %v4199_v11 = vpop.f32.mrf.mxu0 }
 0x307   :  { %v3336_v54 = vmax.f32 %v3332_v7, %v3212_v63  ;;  %v3210_v29 = vmax.f32 %v2940_v57, 0.0  ;;  %v2951_v36 = vadd.f32 %v4199_v11, %v5186_v44 }
 0x308   :  { %v2942_v26 = vpop.f32.mrf.mxu0 }
 0x309   :  { %v3334_v0 = vmax.f32 %v3330_v55, %v3210_v29  ;;  %v3213_v1 = vmax.f32 %v2951_v36, 0.0  ;;  %v2943_v4 = vadd.f32 %v5186_v44, %v2942_v26 }
 0x30a   :  { %v4202_v60 = vpop.f32.mrf.mxu0 }
 0x30b   :  { %v3337_v23 = vmax.f32 %v3333_v10, %v3213_v1  ;;  %v3211_v15 = vmax.f32 %v2943_v4, 0.0  ;;  %v2964_v51 = vadd.f32 %v4202_v60, %v5186_v44 }
 0x30c   :  { %v2955_v28 = vpop.f32.mrf.mxu0 }
 0x30d   :  { %v3335_v25 = vmax.f32 %v3331_v12, %v3211_v15  ;;  %v2956_v56 = vadd.f32 %v5186_v44, %v2955_v28  ;;  %v3216_v46 = vmax.f32 %v2964_v51, 0.0 }
 0x30e   :  { %v4203_v49 = vpop.f32.mrf.mxu0 }
 0x30f   :  { %v2967_v35 = vadd.f32 %v4203_v49, %v5186_v44  ;;  %v3214_v21 = vmax.f32 %v2956_v56, 0.0  ;;  %v3340_v16 = vmax.f32 %v3336_v54, %v3216_v46 }
 0x310   :  { %v2958_v34 = vpop.f32.mrf.mxu0 }
 0x311   :  { %v2959_v59 = vadd.f32 %v5186_v44, %v2958_v34  ;;  %v3217_v7 = vmax.f32 %v2967_v35, 0.0  ;;  %v3338_v17 = vmax.f32 %v3334_v0, %v3214_v21 }
 0x312   :  { %v4206_v62 = vpop.f32.mrf.mxu0 }
 0x313   :  { %v2980_v31 = vadd.f32 %v4206_v62, %v5186_v44  ;;  %v3215_v30 = vmax.f32 %v2959_v59, 0.0  ;;  %v3341_v57 = vmax.f32 %v3337_v23, %v3217_v7 }
 0x314   :  { %v2971_v22 = vpop.f32.mrf.mxu0 }
 0x315   :  { %v2972_v5 = vadd.f32 %v5186_v44, %v2971_v22  ;;  %v3220_v41 = vmax.f32 %v2980_v31, 0.0  ;;  %v3339_v11 = vmax.f32 %v3335_v25, %v3215_v30 }
 0x316   :  { %v4207_v38 = vpop.f32.mrf.mxu0 }
 0x317   :  { %v2983_v48 = vadd.f32 %v4207_v38, %v5186_v44  ;;  %v3218_v10 = vmax.f32 %v2972_v5, 0.0  ;;  %v3344_v29 = vmax.f32 %v3340_v16, %v3220_v41 }
 0x318   :  { %v2974_v13 = vpop.f32.mrf.mxu0 }
 0x319   :  { %v2975_v55 = vadd.f32 %v5186_v44, %v2974_v13  ;;  %v3221_v6 = vmax.f32 %v2983_v48, 0.0  ;;  %v3342_v15 = vmax.f32 %v3338_v17, %v3218_v10 }
 0x31a   :  { %v4210_v9 = vpop.f32.mrf.mxu0 }
 0x31b   :  { %v2996_v33 = vadd.f32 %v4210_v9, %v5186_v44  ;;  %v3219_v1 = vmax.f32 %v2975_v55, 0.0  ;;  %v3345_v62 = vmax.f32 %v3341_v57, %v3221_v6 }
 0x31c   :  { %v2987_v8 = vpop.f32.mrf.mxu0 }
 0x31d   :  { %v2988_v2 = vadd.f32 %v5186_v44, %v2987_v8  ;;  %v3224_v4 = vmax.f32 %v2996_v33, 0.0 }
 0x31e   :  { %v4211_v3 = vpop.f32.mrf.mxu0 }
 0x31f   :  { %v2999_v12 = vadd.f32 %v4211_v3, %v5186_v44  ;;  %v3222_v60 = vmax.f32 %v2988_v2, 0.0 }
 0x320   :  { %v2990_v47 = vpop.f32.mrf.mxu0 }
 0x321   :  { %v2991_v63 = vadd.f32 %v5186_v44, %v2990_v47  ;;  %v3225_v23 = vmax.f32 %v2999_v12, 0.0  ;;  %v3343_v47 = vmax.f32 %v3339_v11, %v3219_v1 }
 0x322   :  { %v4214_v32 = vpop.f32.mrf.mxu0 }
 0x323   :  { %v3012_v36 = vadd.f32 %v4214_v32, %v5186_v44  ;;  %v3223_v25 = vmax.f32 %v2991_v63, 0.0  ;;  %v3348_v32 = vmax.f32 %v3344_v29, %v3224_v4  ;;  %v3349_v59 = vmax.f32 %v3345_v62, %v3225_v23 }
 0x324   :  { %v3003_v18 = vpop.f32.mrf.mxu0 }
 0x325   :  { %v3004_v54 = vadd.f32 %v5186_v44, %v3003_v18  ;;  %v3228_v38 = vmax.f32 %v3012_v36, 0.0  ;;  %v3346_v18 = vmax.f32 %v3342_v15, %v3222_v60 }
 0x326   :  { %v4215_v20 = vpop.f32.mrf.mxu0 }
 0x327   :  { %v3015_v28 = vadd.f32 %v4215_v20, %v5186_v44  ;;  %v3226_v20 = vmax.f32 %v3004_v54, 0.0 }
 0x328   :  { %v3006_v37 = vpop.f32.mrf.mxu0 }
 0x329   :  { %v3007_v0 = vadd.f32 %v5186_v44, %v3006_v37  ;;  %v3229_v37 = vmax.f32 %v3015_v28, 0.0  ;;  %v3350_v7 = vmax.f32 %v3346_v18, %v3226_v20 }
 0x32a   :  { %v4218_v45 = vpop.f32.mrf.mxu0 }
 0x32b   :  { %v3028_v49 = vadd.f32 %v4218_v45, %v5186_v44  ;;  %v3227_v45 = vmax.f32 %v3007_v0, 0.0  ;;  %v3353_v41 = vmax.f32 %v3349_v59, %v3229_v37 }
 0x32c   :  { %v3019_v19 = vpop.f32.mrf.mxu0 }
 0x32d   :  { %v3020_v22 = vadd.f32 %v5186_v44, %v3019_v19  ;;  %v3232_v51 = vmax.f32 %v3028_v49, 0.0  ;;  %v3347_v19 = vmax.f32 %v3343_v47, %v3223_v25 }
 0x32e   :  { %v4219_v39 = vpop.f32.mrf.mxu0 }
 0x32f   :  { %v3031_v13 = vadd.f32 %v4219_v39, %v5186_v44  ;;  %v3230_v31 = vmax.f32 %v3020_v22, 0.0  ;;  %v5356_v39 = vld [vmem:[%s5406_s6] ss:$0 sm:$0xff]  ;;  %v3351_v55 = vmax.f32 %v3347_v19, %v3227_v45 }
 0x330   :  { %v3022_v53 = vpop.f32.mrf.mxu0 }
 0x331   :  { %v3023_v9 = vadd.f32 %v5186_v44, %v3022_v53  ;;  %v3233_v46 = vmax.f32 %v3031_v13, 0.0  ;;  %v3354_v16 = vmax.f32 %v3350_v7, %v3230_v31 }
 0x332   :  { %v4222_v24 = vpop.f32.mrf.mxu0 }
 0x333   :  { %v3044_v8 = vadd.f32 %v4222_v24, %v5186_v44  ;;  %v3352_v24 = vmax.f32 %v3348_v32, %v3228_v38  ;;  %v3231_v5 = vmax.f32 %v3023_v9, 0.0 }
 0x334   :  { %v3035_v43 = vpop.f32.mrf.mxu0 }
 0x335   :  { %v3036_v56 = vadd.f32 %v5186_v44, %v3035_v43  ;;  %v3236_v21 = vmax.f32 %v3044_v8, 0.0  ;;  %v3356_v33 = vmax.f32 %v3352_v24, %v3232_v51  ;;  %v3355_v12 = vmax.f32 %v3351_v55, %v3231_v5 }
 0x336   :  { %v5315_v14 = vpop.f32.mrf.mxu0 }
 0x337   :  { %v3047_v53 = vadd.f32 %v5356_v39, %v5315_v14  ;;  %v3234_v2 = vmax.f32 %v3036_v56, 0.0  ;;  %v3360_v63 = vmax.f32 %v3356_v33, %v3236_v21 }
 0x338   :  { %v5317_v58 = vpop.f32.mrf.mxu0 }
 0x339   :  { %v3039_v44 = vadd.f32 %v5356_v39, %v5317_v58  ;;  %v3237_v10 = vmax.f32 %v3047_v53, 0.0  ;;  %v3357_v58 = vmax.f32 %v3353_v41, %v3233_v46  ;;  %v3358_v1 = vmax.f32 %v3354_v16, %v3234_v2 }
 0x33a   :  { %v5319_v42 = vpop.f32.mrf.mxu0 }
 0x33b   :  { %v3060_v43 = vadd.f32 %v5356_v39, %v5319_v42  ;;  %v3235_v57 = vmax.f32 %v3039_v44, 0.0  ;;  %v3361_v54 = vmax.f32 %v3357_v58, %v3237_v10 }
 0x33c   :  { %v5322_v52 = vpop.f32.mrf.mxu0 }
 0x33d   :  { %v3052_v30 = vadd.f32 %v5356_v39, %v5322_v52  ;;  %v3240_v11 = vmax.f32 %v3060_v43, 0.0  ;;  %v3359_v22 = vmax.f32 %v3355_v12, %v3235_v57 }
 0x33e   :  { %v5328_v27 = vpop.f32.mrf.mxu0 }
 0x33f   :  { %v3063_v17 = vadd.f32 %v5356_v39, %v5328_v27  ;;  %v3238_v29 = vmax.f32 %v3052_v30, 0.0 }
 0x340   :  { %v5331_v50 = vpop.f32.mrf.mxu0 }
 0x341   :  { %v3055_v4 = vadd.f32 %v5356_v39, %v5331_v50  ;;  %v3241_v15 = vmax.f32 %v3063_v17, 0.0  ;;  %v3364_v50 = vmax.f32 %v3360_v63, %v3240_v11  ;;  %v3362_v38 = vmax.f32 %v3358_v1, %v3238_v29 }
 0x342   :  { %v5334_v40 = vpop.f32.mrf.mxu0 }
 0x343   :  { %v3076_v6 = vadd.f32 %v5356_v39, %v5334_v40  ;;  %v3239_v13 = vmax.f32 %v3055_v4, 0.0  ;;  %v3365_v32 = vmax.f32 %v3361_v54, %v3241_v15 }
 0x344   :  { %v5339_v61 = vpop.f32.mrf.mxu0 }
 0x345   :  { %v3068_v42 = vadd.f32 %v5356_v39, %v5339_v61  ;;  %v3244_v28 = vmax.f32 %v3076_v6, 0.0  ;;  %v3363_v53 = vmax.f32 %v3359_v22, %v3239_v13 }
 0x346   :  { %v4231_v26 = vpop.f32.mrf.mxu0 }
 0x347   :  { %v3079_v27 = vadd.f32 %v5356_v39, %v4231_v26  ;;  %v3242_v0 = vmax.f32 %v3068_v42, 0.0  ;;  %v3368_v18 = vmax.f32 %v3364_v50, %v3244_v28 }
 0x348   :  { %v3070_v34 = vpop.f32.mrf.mxu0 }
 0x349   :  { %v3071_v49 = vadd.f32 %v5356_v39, %v3070_v34  ;;  %v3245_v9 = vmax.f32 %v3079_v27, 0.0  ;;  %v3366_v37 = vmax.f32 %v3362_v38, %v3242_v0 }
 0x34a   :  { %v4234_v3 = vpop.f32.mrf.mxu0 }
 0x34b   :  { %v3092_v36 = vadd.f32 %v5356_v39, %v4234_v3  ;;  %v3243_v45 = vmax.f32 %v3071_v49, 0.0  ;;  %v3369_v24 = vmax.f32 %v3365_v32, %v3245_v9 }
 0x34c   :  { %v3083_v35 = vpop.f32.mrf.mxu0 }
 0x34d   :  { %v3084_v40 = vadd.f32 %v5356_v39, %v3083_v35  ;;  %v3248_v26 = vmax.f32 %v3092_v36, 0.0  ;;  %v3367_v30 = vmax.f32 %v3363_v53, %v3243_v45 }
 0x34e   :  { %v4235_v48 = vpop.f32.mrf.mxu0 }
 0x34f   :  { %v3095_v62 = vadd.f32 %v5356_v39, %v4235_v48  ;;  %v3246_v8 = vmax.f32 %v3084_v40, 0.0  ;;  %v3372_v59 = vmax.f32 %v3368_v18, %v3248_v26 }
 0x350   :  { %v3086_v14 = vpop.f32.mrf.mxu0 }
 0x351   :  { %v3087_v3 = vadd.f32 %v5356_v39, %v3086_v14  ;;  %v3249_v51 = vmax.f32 %v3095_v62, 0.0  ;;  %v3370_v46 = vmax.f32 %v3366_v37, %v3246_v8 }
 0x352   :  { %v4238_v52 = vpop.f32.mrf.mxu0 }
 0x353   :  { %v3108_v61 = vadd.f32 %v5356_v39, %v4238_v52  ;;  %v3247_v5 = vmax.f32 %v3087_v3, 0.0  ;;  %v3373_v41 = vmax.f32 %v3369_v24, %v3249_v51 }
 0x354   :  { %v3099_v60 = vpop.f32.mrf.mxu0 }
 0x355   :  { %v3100_v23 = vadd.f32 %v5356_v39, %v3099_v60  ;;  %v3252_v20 = vmax.f32 %v3108_v61, 0.0  ;;  %v3371_v17 = vmax.f32 %v3367_v30, %v3247_v5 }
 0x356   :  { %v4239_v25 = vpop.f32.mrf.mxu0 }
 0x357   :  { %v3111_v34 = vadd.f32 %v5356_v39, %v4239_v25  ;;  %v3250_v56 = vmax.f32 %v3100_v23, 0.0  ;;  %v3376_v48 = vmax.f32 %v3372_v59, %v3252_v20 }
 0x358   :  { %v3102_v47 = vpop.f32.mrf.mxu0 }
 0x359   :  { %v3103_v19 = vadd.f32 %v5356_v39, %v3102_v47  ;;  %v3253_v7 = vmax.f32 %v3111_v34, 0.0  ;;  %v3374_v55 = vmax.f32 %v3370_v46, %v3250_v56 }
 0x35a   :  { %v4242_v35 = vpop.f32.mrf.mxu0 }
 0x35b   :  { %v3124_v31 = vadd.f32 %v5356_v39, %v4242_v35  ;;  %v3251_v2 = vmax.f32 %v3103_v19, 0.0  ;;  %v3377_v58 = vmax.f32 %v3373_v41, %v3253_v7 }
 0x35c   :  { %v3115_v21 = vpop.f32.mrf.mxu0 }
 0x35d   :  { %v3256_v44 = vmax.f32 %v3124_v31, 0.0  ;;  %v3116_v43 = vadd.f32 %v5356_v39, %v3115_v21  ;;  %v3375_v52 = vmax.f32 %v3371_v17, %v3251_v2 }
 0x35e   :  { %v4243_v33 = vpop.f32.mrf.mxu0 }
 0x35f   :  { %v3380_v14 = vmax.f32 %v3376_v48, %v3256_v44  ;;  %v3254_v16 = vmax.f32 %v3116_v43, 0.0  ;;  %v3127_v10 = vadd.f32 %v5356_v39, %v4243_v33 }
 0x360   :  { %v3118_v6 = vpop.f32.mrf.mxu0 }
 0x361   :  { %3384 = vst [vmem:[%s5407_s7 + $0x10] sm:$0xff] %v3380_v14  ;;  %v3378_v12 = vmax.f32 %v3374_v55, %v3254_v16  ;;  %v3257_v63 = vmax.f32 %v3127_v10, 0.0  ;;  %v3119_v42 = vadd.f32 %v5356_v39, %v3118_v6 }
 0x363   :  { %3382 = vst [vmem:[%s5407_s7] sm:$0xff] %v3378_v12  ;;  %v3381_v57 = vmax.f32 %v3377_v58, %v3257_v63  ;;  %v3255_v11 = vmax.f32 %v3119_v42, 0.0 }
 0x365   :  { %3385 = vst [vmem:[%s5407_s7 + $0x18] sm:$0xff] %v3381_v57  ;;  %v3379_v29 = vmax.f32 %v3375_v52, %v3255_v11 }
 0x367   :  { %3383 = vst [vmem:[%s5407_s7 + $0x8] sm:$0xff] %v3379_v29 }

// kernel: neg.4
= control target key start
LH: loop header
LB: loop body
LE: loop exit
PB: predicated region body
PF: predicated region fallthrough
CT: control target
= control target key end

     0   :  { %s40_s0 = inlined_call_operand.vmem [shape: f32[2,16,8], index: 0, kind: input, shape index: {}]   ;;  %s41_s1 = inlined_call_operand.vmem [shape: f32[2,16,8], index: 1, kind: output, shape index: {}]  }
   0x1   :  { %v2_v0 = vld [vmem:[%s40_s0] sm:$0xff]  ;;  %v16_v1 = vld [vmem:[%s40_s0 + $0x8] sm:$0xff] }
   0x2   :  { %v5_v2 = vxor.u32 2147483648, %v2_v0  ;;  %v12_v3 = vxor.u32 2147483648, %v16_v1 }
   0x4   :  { %7 = vst [vmem:[%s41_s1] sm:$0xff] %v5_v2  ;;  %17 = vst [vmem:[%s41_s1 + $0x8] sm:$0xff] %v12_v3 }

// kernel: pointnet2_backbone_forward.8
= control target key start
LH: loop header
LB: loop body
LE: loop exit
PB: predicated region body
PF: predicated region fallthrough
CT: control target
= control target key end

     0   :  { %v2527_v0 = vmov 0   ;;  %vm454_vm0 = vcmask 64512   ;;  %vm551_vm1 = vcmask 1043456   ;;  %vm979_vm2 = vcmask 523264   ;;  %s3228_s1 = inlined_call_operand.vmem [shape: bf16[136,64], index: 1, kind: input, shape index: {}]   ;;  %s3229_s0 = inlined_call_operand.vmem [shape: bf16[512,136], index: 0, kind: input, shape index: {}]   ;;  %s3230_s3 = inlined_call_operand.vmem [shape: bf16[64,64], index: 3, kind: input, shape index: {}]   ;;  %s3231_s2 = inlined_call_operand.vmem [shape: f32[1,64], index: 2, kind: input, shape index: {}]   ;;  %s3232_s5 = inlined_call_operand.vmem [shape: bf16[64,128], index: 5, kind: input, shape index: {}]   ;;  %s3233_s4 = inlined_call_operand.vmem [shape: f32[1,64], index: 4, kind: input, shape index: {}]   ;;  %s3234_s6 = inlined_call_operand.vmem [shape: f32[1,128], index: 6, kind: input, shape index: {}]   ;;  %s3235_s7 = inlined_call_operand.vmem [shape: f32[16,128], index: 7, kind: output, shape index: {}]  }
   0x1   :  { %555 = vmatprep.subr.bf16.mxu0 %v2527_v0  ;;  %v2414_v1 = vld [vmem:[%s3228_s1 + $0x38] sm:$0xff]   ;;  %v2415_v2 = vld [vmem:[%s3228_s1 + $0x30] sm:$0xff]   ;;  %v2416_v3 = vld [vmem:[%s3228_s1 + $0x28] sm:$0xff]  }
   0x2   :  { %556 = vmatpush1.bf16.msra.mxu0 %v2414_v1  ;;  %v2425_v4 = vld [vmem:[%s3229_s0 + $0x4] ss:$8 sps:$4 sm:$0xff]   ;;  %v2418_v6 = vld [vmem:[%s3228_s1 + $0x18] sm:$0xff]   ;;  %v2419_v7 = vld [vmem:[%s3228_s1 + $0x10] sm:$0xff]  }
   0x3   :  { %557 = vmatprep.subr.bf16.mxu0 %v2527_v0  ;;  %v2417_v5 = vld [vmem:[%s3228_s1 + $0x20] sm:$0xff]   ;;  %2091 = vmatprep.mubr.msk.bf16.mxu0 %vm454_vm0, %v2425_v4  ;;  %v2420_v8 = vld [vmem:[%s3228_s1 + $0x8] sm:$0xff]   ;;  %v2426_v13 = vld [vmem:[%s3229_s0 + $0x14] ss:$8 sps:$4 sm:$0xff]  }
   0x4   :  { %v2421_v9 = vld [vmem:[%s3228_s1] sm:$0xff]   ;;  %v2428_v14 = vld [vmem:[%s3229_s0 + $0x10] ss:$8 sps:$4 sm:$0xff]   ;;  %v2432_v17 = vld [vmem:[%s3229_s0 + $0x34] ss:$8 sps:$4 sm:$0xff]  }
   0x5   :  { %v2422_v10 = vld [vmem:[%s3228_s1 + $0x40] ss:$0 sps:$4 sm:$0xff]   ;;  %v2429_v15 = vld [vmem:[%s3229_s0 + $0x24] ss:$8 sps:$4 sm:$0xff]   ;;  %v2434_v18 = vld [vmem:[%s3229_s0 + $0x30] ss:$8 sps:$4 sm:$0xff]  }
   0x6   :  { %558 = vmatpush1.bf16.msra.mxu0 %v2415_v2  ;;  %v553_v11 = vsel %vm551_vm1, %v2422_v10, 0  ;;  %v2423_v12 = vld [vmem:[%s3229_s0] ss:$8 sps:$4 sm:$0xff]   ;;  %v2435_v19 = vld [vmem:[%s3229_s0 + $0x44] ss:$8 sps:$4 sm:$0xff]   ;;  %v2498_v30 = vld [vmem:[%s3230_s3 + $0x18] sm:$0xff]  }
   0x7   :  { %559 = vmatprep.subr.bf16.mxu0 %v2527_v0  ;;  %v2431_v16 = vld [vmem:[%s3229_s0 + $0x20] ss:$8 sps:$4 sm:$0xff]   ;;  %v2438_v21 = vld [vmem:[%s3229_s0 + $0x54] ss:$8 sps:$4 sm:$0xff]   ;;  %v2440_v22 = vld [vmem:[%s3229_s0 + $0x50] ss:$8 sps:$4 sm:$0xff]   ;;  %2269 = vmatprep.subr.bf16.mxu1 %v2498_v30 }
   0x8   :  { %v2437_v20 = vld [vmem:[%s3229_s0 + $0x40] ss:$8 sps:$4 sm:$0xff]   ;;  %v2441_v23 = vld [vmem:[%s3229_s0 + $0x64] ss:$8 sps:$4 sm:$0xff]   ;;  %v2444_v25 = vld [vmem:[%s3229_s0 + $0x74] ss:$8 sps:$4 sm:$0xff]   ;;  %2270 = vmatpush3.bf16.msra.mxu1 %v2498_v30 }
   0x9   :  { %v2443_v24 = vld [vmem:[%s3229_s0 + $0x60] ss:$8 sps:$4 sm:$0xff]   ;;  %v2446_v26 = vld [vmem:[%s3229_s0 + $0x70] ss:$8 sps:$4 sm:$0xff]   ;;  %v2447_v27 = vld [vmem:[%s3229_s0 + $0x84] ss:$8 sps:$4 sm:$0xff]  }
   0xa   :  { %560 = vmatpush1.bf16.msra.mxu0 %v2416_v3  ;;  %v2449_v28 = vld [vmem:[%s3229_s0 + $0x80] ss:$8 sps:$4 sm:$0xff]   ;;  %v2450_v29 = vld [vmem:[%s3229_s0 + $0x94] ss:$8 sps:$4 sm:$0xff]   ;;  %v2452_v31 = vld [vmem:[%s3229_s0 + $0x90] ss:$8 sps:$4 sm:$0xff]  }
   0xb   :  { %561 = vmatprep.subr.bf16.mxu0 %v2527_v0  ;;  %v2453_v32 = vld [vmem:[%s3229_s0 + $0xa4] ss:$8 sps:$4 sm:$0xff]   ;;  %v2501_v33 = vld [vmem:[%s3230_s3 + $0x10] sm:$0xff]   ;;  %v2455_v35 = vld [vmem:[%s3229_s0 + $0xa0] ss:$8 sps:$4 sm:$0xff]  }
   0xc   :  { %2271 = vmatprep.subr.bf16.mxu1 %v2501_v33  ;;  %v2503_v34 = vld [vmem:[%s3230_s3 + $0x8] sm:$0xff]   ;;  %v2456_v36 = vld [vmem:[%s3229_s0 + $0xb4] ss:$8 sps:$4 sm:$0xff]   ;;  %v2506_v37 = vld [vmem:[%s3230_s3] sm:$0xff]  }
   0xd   :  { %2272 = vmatpush3.bf16.msra.mxu1 %v2501_v33  ;;  %v2458_v38 = vld [vmem:[%s3229_s0 + $0xb0] ss:$8 sps:$4 sm:$0xff]   ;;  %v2459_v39 = vld [vmem:[%s3229_s0 + $0xc4] ss:$8 sps:$4 sm:$0xff]   ;;  %v2461_v40 = vld [vmem:[%s3229_s0 + $0xc0] ss:$8 sps:$4 sm:$0xff]  }
   0xe   :  { %562 = vmatpush1.bf16.msra.mxu0 %v2417_v5  ;;  %2273 = vmatprep.subr.bf16.mxu1 %v2503_v34  ;;  %v2462_v41 = vld [vmem:[%s3229_s0 + $0xd4] ss:$8 sps:$4 sm:$0xff]   ;;  %v2464_v42 = vld [vmem:[%s3229_s0 + $0xd0] ss:$8 sps:$4 sm:$0xff]   ;;  %v2465_v43 = vld [vmem:[%s3229_s0 + $0xe4] ss:$8 sps:$4 sm:$0xff]  }
   0xf   :  { %563 = vmatprep.subr.bf16.mxu0 %v2527_v0  ;;  %v2467_v44 = vld [vmem:[%s3229_s0 + $0xe0] ss:$8 sps:$4 sm:$0xff]   ;;  %v2468_v45 = vld [vmem:[%s3229_s0 + $0xf4] ss:$8 sps:$4 sm:$0xff]   ;;  %v2470_v46 = vld [vmem:[%s3229_s0 + $0xf0] ss:$8 sps:$4 sm:$0xff]  }
  0x10   :  { %v2471_v47 = vld [vmem:[%s3229_s0 + $0x104] ss:$8 sps:$4 sm:$0xff]   ;;  %v2473_v48 = vld [vmem:[%s3229_s0 + $0x100] ss:$8 sps:$4 sm:$0xff]   ;;  %v2474_v49 = vld [vmem:[%s3229_s0 + $0x114] ss:$8 sps:$4 sm:$0xff]  }
  0x11   :  { %2274 = vmatpush3.bf16.msra.mxu1 %v2503_v34  ;;  %v2476_v50 = vld [vmem:[%s3229_s0 + $0x110] ss:$8 sps:$4 sm:$0xff]   ;;  %v2477_v51 = vld [vmem:[%s3229_s0 + $0x124] ss:$8 sps:$4 sm:$0xff]   ;;  %v2479_v52 = vld [vmem:[%s3229_s0 + $0x120] ss:$8 sps:$4 sm:$0xff]  }
  0x12   :  { %564 = vmatpush1.bf16.msra.mxu0 %v2418_v6  ;;  %2275 = vmatprep.subr.bf16.mxu1 %v2506_v37  ;;  %v2480_v53 = vld [vmem:[%s3229_s0 + $0x134] ss:$8 sps:$4 sm:$0xff]   ;;  %v2482_v54 = vld [vmem:[%s3229_s0 + $0x130] ss:$8 sps:$4 sm:$0xff]   ;;  %v2483_v55 = vld [vmem:[%s3229_s0 + $0x144] ss:$8 sps:$4 sm:$0xff]  }
  0x13   :  { %565 = vmatprep.subr.bf16.mxu0 %v2527_v0  ;;  %v2485_v56 = vld [vmem:[%s3229_s0 + $0x140] ss:$8 sps:$4 sm:$0xff]   ;;  %v2486_v57 = vld [vmem:[%s3229_s0 + $0x154] ss:$8 sps:$4 sm:$0xff]   ;;  %v2488_v58 = vld [vmem:[%s3229_s0 + $0x150] ss:$8 sps:$4 sm:$0xff]  }
  0x14   :  { %v2489_v59 = vld [vmem:[%s3229_s0 + $0x164] ss:$8 sps:$4 sm:$0xff]   ;;  %v2491_v60 = vld [vmem:[%s3229_s0 + $0x160] ss:$8 sps:$4 sm:$0xff]   ;;  %v2492_v61 = vld [vmem:[%s3229_s0 + $0x174] ss:$8 sps:$4 sm:$0xff]  }
  0x15   :  { %2276 = vmatpush3.bf16.msra.mxu1 %v2506_v37  ;;  %v2494_v62 = vld [vmem:[%s3229_s0 + $0x170] ss:$8 sps:$4 sm:$0xff]   ;;  %v2495_v63 = vld [vmem:[%s3229_s0 + $0x184] ss:$8 sps:$4 sm:$0xff]   ;;  %v2499_v1 = vld [vmem:[%s3229_s0 + $0x194] ss:$8 sps:$4 sm:$0xff]  }
  0x16   :  { %566 = vmatpush1.bf16.msra.mxu0 %v2419_v7  ;;  %v2788_v2 = vld [vmem:[%s3231_s2] ss:$0 sm:$0xff]  ;;  %v2502_v7 = vld [vmem:[%s3229_s0 + $0x190] ss:$8 sps:$4 sm:$0xff]  }
  0x17   :  { %567 = vmatprep.subr.bf16.mxu0 %v2527_v0 }
  0x1a   :  { %568 = vmatpush1.bf16.msra.mxu0 %v2420_v8 }
  0x1b   :  { %569 = vmatprep.subr.bf16.mxu0 %v2527_v0 }
  0x1e   :  { %570 = vmatpush1.bf16.msra.mxu0 %v2421_v9  ;;  %v2504_v9 = vld [vmem:[%s3229_s0 + $0x1a4] ss:$8 sps:$4 sm:$0xff]  }
  0x1f   :  { %585 = vmatprep.subr.bf16.mxu0 %v2527_v0  ;;  %v2497_v0 = vld [vmem:[%s3229_s0 + $0x180] ss:$8 sps:$4 sm:$0xff]  }
  0x22   :  { %586 = vmatpush2.bf16.msra.mxu0 %v553_v11 }
  0x25   :  { %588 = vmatmul.mubr.bf16.vlgmr.msra.gmra.mxu0 %v2423_v12 }
  0x26   :  { %2092 = vmatprep.mubr.msk.bf16.mxu0 %vm454_vm0, %v2426_v13 }
  0x2d   :  { %596 = vmatmul.mubr.bf16.gmra.mxu0 %v2428_v14 }
  0x2e   :  { %2093 = vmatprep.mubr.msk.bf16.mxu0 %vm454_vm0, %v2429_v15 }
  0x35   :  { %604 = vmatmul.mubr.bf16.gmra.mxu0 %v2431_v16 }
  0x36   :  { %2094 = vmatprep.mubr.msk.bf16.mxu0 %vm454_vm0, %v2432_v17 }
  0x3d   :  { %612 = vmatmul.mubr.bf16.gmra.mxu0 %v2434_v18  ;;  %v2507_v18 = vld [vmem:[%s3229_s0 + $0x1a0] ss:$8 sps:$4 sm:$0xff]  }
  0x3e   :  { %2095 = vmatprep.mubr.msk.bf16.mxu0 %vm454_vm0, %v2435_v19 }
  0x45   :  { %620 = vmatmul.mubr.bf16.gmra.mxu0 %v2437_v20  ;;  %v2508_v20 = vld [vmem:[%s3229_s0 + $0x1b4] ss:$8 sps:$4 sm:$0xff]  }
  0x46   :  { %2096 = vmatprep.mubr.msk.bf16.mxu0 %vm454_vm0, %v2438_v21 }
  0x4d   :  { %628 = vmatmul.mubr.bf16.gmra.mxu0 %v2440_v22 }
  0x4e   :  { %2097 = vmatprep.mubr.msk.bf16.mxu0 %vm454_vm0, %v2441_v23 }
  0x55   :  { %636 = vmatmul.mubr.bf16.gmra.mxu0 %v2443_v24 }
  0x56   :  { %2098 = vmatprep.mubr.msk.bf16.mxu0 %vm454_vm0, %v2444_v25 }
  0x5d   :  { %644 = vmatmul.mubr.bf16.gmra.mxu0 %v2446_v26 }
  0x5e   :  { %2099 = vmatprep.mubr.msk.bf16.mxu0 %vm454_vm0, %v2447_v27 }
  0x65   :  { %652 = vmatmul.mubr.bf16.gmra.mxu0 %v2449_v28 }
  0x66   :  { %2100 = vmatprep.mubr.msk.bf16.mxu0 %vm454_vm0, %v2450_v29  ;;  %v2510_v29 = vld [vmem:[%s3229_s0 + $0x1b0] ss:$8 sps:$4 sm:$0xff]  }
  0x6d   :  { %660 = vmatmul.mubr.bf16.gmra.mxu0 %v2452_v31  ;;  %v2511_v31 = vld [vmem:[%s3229_s0 + $0x1c4] ss:$8 sps:$4 sm:$0xff]  }
  0x6e   :  { %2101 = vmatprep.mubr.msk.bf16.mxu0 %vm454_vm0, %v2453_v32 }
  0x75   :  { %668 = vmatmul.mubr.bf16.gmra.mxu0 %v2455_v35 }
  0x76   :  { %2102 = vmatprep.mubr.msk.bf16.mxu0 %vm454_vm0, %v2456_v36 }
  0x7d   :  { %676 = vmatmul.mubr.bf16.gmra.mxu0 %v2458_v38 }
  0x7e   :  { %2103 = vmatprep.mubr.msk.bf16.mxu0 %vm454_vm0, %v2459_v39 }
  0x85   :  { %684 = vmatmul.mubr.bf16.gmra.mxu0 %v2461_v40  ;;  %v2513_v40 = vld [vmem:[%s3229_s0 + $0x1c0] ss:$8 sps:$4 sm:$0xff]  }
  0x86   :  { %2104 = vmatprep.mubr.msk.bf16.mxu0 %vm454_vm0, %v2462_v41 }
  0x8d   :  { %692 = vmatmul.mubr.bf16.gmra.mxu0 %v2464_v42  ;;  %v2514_v42 = vld [vmem:[%s3229_s0 + $0x1d4] ss:$8 sps:$4 sm:$0xff]  }
  0x8e   :  { %2105 = vmatprep.mubr.msk.bf16.mxu0 %vm454_vm0, %v2465_v43 }
  0x95   :  { %700 = vmatmul.mubr.bf16.gmra.mxu0 %v2467_v44 }
  0x96   :  { %2106 = vmatprep.mubr.msk.bf16.mxu0 %vm454_vm0, %v2468_v45 }
  0x9d   :  { %708 = vmatmul.mubr.bf16.gmra.mxu0 %v2470_v46 }
  0x9e   :  { %2107 = vmatprep.mubr.msk.bf16.mxu0 %vm454_vm0, %v2471_v47 }
  0xa5   :  { %716 = vmatmul.mubr.bf16.gmra.mxu0 %v2473_v48 }
  0xa6   :  { %2108 = vmatprep.mubr.msk.bf16.mxu0 %vm454_vm0, %v2474_v49 }
  0xad   :  { %724 = vmatmul.mubr.bf16.gmra.mxu0 %v2476_v50 }
  0xae   :  { %2109 = vmatprep.mubr.msk.bf16.mxu0 %vm454_vm0, %v2477_v51  ;;  %v2516_v51 = vld [vmem:[%s3229_s0 + $0x1d0] ss:$8 sps:$4 sm:$0xff]  }
  0xb5   :  { %732 = vmatmul.mubr.bf16.gmra.mxu0 %v2479_v52 }
  0xb6   :  { %2110 = vmatprep.mubr.msk.bf16.mxu0 %vm454_vm0, %v2480_v53  ;;  %v2517_v53 = vld [vmem:[%s3229_s0 + $0x1e4] ss:$8 sps:$4 sm:$0xff]  }
  0xbd   :  { %740 = vmatmul.mubr.bf16.gmra.mxu0 %v2482_v54 }
  0xbe   :  { %2111 = vmatprep.mubr.msk.bf16.mxu0 %vm454_vm0, %v2483_v55 }
  0xc5   :  { %748 = vmatmul.mubr.bf16.gmra.mxu0 %v2485_v56 }
  0xc6   :  { %2112 = vmatprep.mubr.msk.bf16.mxu0 %vm454_vm0, %v2486_v57 }
  0xcd   :  { %756 = vmatmul.mubr.bf16.gmra.mxu0 %v2488_v58 }
  0xce   :  { %2113 = vmatprep.mubr.msk.bf16.mxu0 %vm454_vm0, %v2489_v59 }
  0xd5   :  { %764 = vmatmul.mubr.bf16.gmra.mxu0 %v2491_v60 }
  0xd6   :  { %2114 = vmatprep.mubr.msk.bf16.mxu0 %vm454_vm0, %v2492_v61 }
  0xdd   :  { %772 = vmatmul.mubr.bf16.gmra.mxu0 %v2494_v62  ;;  %v2519_v62 = vld [vmem:[%s3229_s0 + $0x1e0] ss:$8 sps:$4 sm:$0xff]  }
  0xde   :  { %2115 = vmatprep.mubr.msk.bf16.mxu0 %vm454_vm0, %v2495_v63 }
  0xe5   :  { %v589_v3 = vpop.f32.mrf.mxu0  ;;  %780 = vmatmul.mubr.bf16.gmra.mxu0 %v2497_v0  ;;  %v2520_v0 = vld [vmem:[%s3229_s0 + $0x1f4] ss:$8 sps:$4 sm:$0xff]  }
  0xe6   :  { %2116 = vmatprep.mubr.msk.bf16.mxu0 %vm454_vm0, %v2499_v1  ;;  %v590_v5 = vadd.f32 %v2788_v2, %v589_v3 }
  0xe7   :  { %v591_v4 = vpop.f32.mrf.mxu0 }
  0xe8   :  { %v844_v11 = vmax.f32 %v590_v5, 0.0 }
  0xe9   :  { %v592_v6 = vpop.f32.mrf.mxu0 }
  0xea   :  { %v593_v8 = vadd.f32 %v2788_v2, %v592_v6 }
  0xeb   :  { %v594_v10 = vpop.f32.mrf.mxu0 }
  0xec   :  { %v845_v12 = vmax.f32 %v593_v8, 0.0  ;;  %v2522_v10 = vld [vmem:[%s3229_s0 + $0x1f0] ss:$8 sps:$4 sm:$0xff]  }
  0xed   :  { %v597_v13 = vpop.f32.mrf.mxu0  ;;  %788 = vmatmul.mubr.bf16.gmra.mxu0 %v2502_v7 }
  0xee   :  { %v908_v14 = vpack.c.bf16 %v845_v12, %v844_v11  ;;  %2117 = vmatprep.mubr.msk.bf16.mxu0 %vm454_vm0, %v2504_v9  ;;  %v598_v16 = vadd.f32 %v2788_v2, %v597_v13 }
  0xef   :  { %v599_v15 = vpop.f32.mrf.mxu0 }
  0xf0   :  { %2277 = vmatprep.mubr.msk.bf16.mxu1 %vm979_vm2, %v908_v14  ;;  %v846_v22 = vmax.f32 %v598_v16, 0.0 }
  0xf1   :  { %v600_v17 = vpop.f32.mrf.mxu0 }
  0xf2   :  { %v601_v19 = vadd.f32 %v2788_v2, %v600_v17 }
  0xf3   :  { %v602_v21 = vpop.f32.mrf.mxu0 }
  0xf4   :  { %v847_v23 = vmax.f32 %v601_v19, 0.0 }
  0xf5   :  { %v605_v24 = vpop.f32.mrf.mxu0  ;;  %796 = vmatmul.mubr.bf16.gmra.mxu0 %v2507_v18 }
  0xf6   :  { %v909_v25 = vpack.c.bf16 %v847_v23, %v846_v22  ;;  %2118 = vmatprep.mubr.msk.bf16.mxu0 %vm454_vm0, %v2508_v20  ;;  %v606_v27 = vadd.f32 %v2788_v2, %v605_v24 }
  0xf7   :  { %v607_v26 = vpop.f32.mrf.mxu0 }
  0xf8   :  { %2278 = vmatmul.mubr.msk.bf16.vlgmr.msra.gmra.mxu1 %vm979_vm2, %v909_v25  ;;  %v848_v33 = vmax.f32 %v606_v27, 0.0 }
  0xf9   :  { %v608_v28 = vpop.f32.mrf.mxu0 }
  0xfa   :  { %v609_v30 = vadd.f32 %v2788_v2, %v608_v28 }
  0xfb   :  { %v610_v32 = vpop.f32.mrf.mxu0 }
  0xfc   :  { %v849_v34 = vmax.f32 %v609_v30, 0.0 }
  0xfd   :  { %v613_v35 = vpop.f32.mrf.mxu0  ;;  %804 = vmatmul.mubr.bf16.gmra.mxu0 %v2510_v29 }
  0xfe   :  { %v910_v36 = vpack.c.bf16 %v849_v34, %v848_v33  ;;  %2119 = vmatprep.mubr.msk.bf16.mxu0 %vm454_vm0, %v2511_v31  ;;  %v614_v38 = vadd.f32 %v2788_v2, %v613_v35 }
  0xff   :  { %v615_v37 = vpop.f32.mrf.mxu0 }
 0x100   :  { %2281 = vmatprep.mubr.msk.bf16.mxu1 %vm979_vm2, %v910_v36  ;;  %v850_v44 = vmax.f32 %v614_v38, 0.0 }
 0x101   :  { %v616_v39 = vpop.f32.mrf.mxu0 }
 0x102   :  { %v617_v41 = vadd.f32 %v2788_v2, %v616_v39 }
 0x103   :  { %v618_v43 = vpop.f32.mrf.mxu0 }
 0x104   :  { %v851_v45 = vmax.f32 %v617_v41, 0.0 }
 0x105   :  { %v621_v46 = vpop.f32.mrf.mxu0  ;;  %812 = vmatmul.mubr.bf16.gmra.mxu0 %v2513_v40 }
 0x106   :  { %v911_v47 = vpack.c.bf16 %v851_v45, %v850_v44  ;;  %2120 = vmatprep.mubr.msk.bf16.mxu0 %vm454_vm0, %v2514_v42  ;;  %v622_v49 = vadd.f32 %v2788_v2, %v621_v46 }
 0x107   :  { %v623_v48 = vpop.f32.mrf.mxu0 }
 0x108   :  { %2282 = vmatmul.mubr.msk.bf16.gmra.mxu1 %vm979_vm2, %v911_v47  ;;  %v852_v55 = vmax.f32 %v622_v49, 0.0 }
 0x109   :  { %v624_v50 = vpop.f32.mrf.mxu0 }
 0x10a   :  { %v625_v52 = vadd.f32 %v2788_v2, %v624_v50 }
 0x10b   :  { %v626_v54 = vpop.f32.mrf.mxu0 }
 0x10c   :  { %v853_v56 = vmax.f32 %v625_v52, 0.0 }
 0x10d   :  { %v629_v57 = vpop.f32.mrf.mxu0  ;;  %820 = vmatmul.mubr.bf16.gmra.mxu0 %v2516_v51 }
 0x10e   :  { %v912_v58 = vpack.c.bf16 %v853_v56, %v852_v55  ;;  %2121 = vmatprep.mubr.msk.bf16.mxu0 %vm454_vm0, %v2517_v53  ;;  %v630_v60 = vadd.f32 %v2788_v2, %v629_v57  ;;  %v2523_v57 = vld [vmem:[%s3232_s5 + $0x18] sm:$0xff]  }
 0x10f   :  { %v631_v59 = vpop.f32.mrf.mxu0  ;;  %2341 = vmatprep.subr.bf16.mxu1 %v2523_v57 }
 0x110   :  { %2285 = vmatprep.mubr.msk.bf16.mxu1 %vm979_vm2, %v912_v58  ;;  %v854_v3 = vmax.f32 %v630_v60, 0.0  ;;  %2342 = vmatpush3.bf16.msra.mxu1 %v2523_v57 }
 0x111   :  { %v632_v61 = vpop.f32.mrf.mxu0 }
 0x112   :  { %v633_v63 = vadd.f32 %v2788_v2, %v632_v61 }
 0x113   :  { %v634_v1 = vpop.f32.mrf.mxu0 }
 0x114   :  { %v855_v4 = vmax.f32 %v633_v63, 0.0 }
 0x115   :  { %v637_v5 = vpop.f32.mrf.mxu0  ;;  %828 = vmatmul.mubr.bf16.gmra.mxu0 %v2519_v62 }
 0x116   :  { %v913_v6 = vpack.c.bf16 %v855_v4, %v854_v3  ;;  %2122 = vmatprep.mubr.msk.bf16.mxu0 %vm454_vm0, %v2520_v0  ;;  %v638_v8 = vadd.f32 %v2788_v2, %v637_v5 }
 0x117   :  { %v639_v7 = vpop.f32.mrf.mxu0 }
 0x118   :  { %2286 = vmatmul.mubr.msk.bf16.gmra.mxu1 %vm979_vm2, %v913_v6  ;;  %v856_v13 = vmax.f32 %v638_v8, 0.0 }
 0x119   :  { %v640_v9 = vpop.f32.mrf.mxu0 }
 0x11a   :  { %v641_v11 = vadd.f32 %v2788_v2, %v640_v9 }
 0x11b   :  { %v642_v12 = vpop.f32.mrf.mxu0 }
 0x11c   :  { %v857_v14 = vmax.f32 %v641_v11, 0.0 }
 0x11d   :  { %v645_v15 = vpop.f32.mrf.mxu0  ;;  %836 = vmatmul.mubr.bf16.gmra.mxu0 %v2522_v10 }
 0x11e   :  { %v914_v16 = vpack.c.bf16 %v857_v14, %v856_v13  ;;  %v646_v18 = vadd.f32 %v2788_v2, %v645_v15 }
 0x11f   :  { %v647_v17 = vpop.f32.mrf.mxu0 }
 0x120   :  { %2289 = vmatprep.mubr.msk.bf16.mxu1 %vm979_vm2, %v914_v16  ;;  %v858_v22 = vmax.f32 %v646_v18, 0.0 }
 0x121   :  { %v648_v19 = vpop.f32.mrf.mxu0 }
 0x122   :  { %v649_v20 = vadd.f32 %v2788_v2, %v648_v19 }
 0x123   :  { %v650_v21 = vpop.f32.mrf.mxu0 }
 0x124   :  { %v859_v23 = vmax.f32 %v649_v20, 0.0 }
 0x125   :  { %v653_v24 = vpop.f32.mrf.mxu0 }
 0x126   :  { %v915_v25 = vpack.c.bf16 %v859_v23, %v858_v22  ;;  %v654_v27 = vadd.f32 %v2788_v2, %v653_v24 }
 0x127   :  { %v655_v26 = vpop.f32.mrf.mxu0 }
 0x128   :  { %2290 = vmatmul.mubr.msk.bf16.gmra.mxu1 %vm979_vm2, %v915_v25  ;;  %v860_v31 = vmax.f32 %v654_v27, 0.0 }
 0x129   :  { %v656_v28 = vpop.f32.mrf.mxu0 }
 0x12a   :  { %v657_v29 = vadd.f32 %v2788_v2, %v656_v28 }
 0x12b   :  { %v658_v30 = vpop.f32.mrf.mxu0 }
 0x12c   :  { %v861_v32 = vmax.f32 %v657_v29, 0.0  ;;  %v2524_v30 = vld [vmem:[%s3232_s5 + $0x10] sm:$0xff]  }
 0x12d   :  { %v661_v33 = vpop.f32.mrf.mxu0  ;;  %2343 = vmatprep.subr.bf16.mxu1 %v2524_v30 }
 0x12e   :  { %v916_v34 = vpack.c.bf16 %v861_v32, %v860_v31  ;;  %v662_v36 = vadd.f32 %v2788_v2, %v661_v33  ;;  %2344 = vmatpush3.bf16.msra.mxu1 %v2524_v30 }
 0x12f   :  { %v663_v35 = vpop.f32.mrf.mxu0 }
 0x130   :  { %2293 = vmatprep.mubr.msk.bf16.mxu1 %vm979_vm2, %v916_v34  ;;  %v862_v40 = vmax.f32 %v662_v36, 0.0 }
 0x131   :  { %v664_v37 = vpop.f32.mrf.mxu0 }
 0x132   :  { %v665_v38 = vadd.f32 %v2788_v2, %v664_v37  ;;  %v2525_v37 = vld [vmem:[%s3232_s5 + $0x8] sm:$0xff]  }
 0x133   :  { %v666_v39 = vpop.f32.mrf.mxu0  ;;  %2345 = vmatprep.subr.bf16.mxu1 %v2525_v37 }
 0x134   :  { %v863_v41 = vmax.f32 %v665_v38, 0.0  ;;  %2346 = vmatpush3.bf16.msra.mxu1 %v2525_v37 }
 0x135   :  { %v669_v42 = vpop.f32.mrf.mxu0 }
 0x136   :  { %v917_v43 = vpack.c.bf16 %v863_v41, %v862_v40  ;;  %v670_v45 = vadd.f32 %v2788_v2, %v669_v42  ;;  %v2526_v42 = vld [vmem:[%s3232_s5] sm:$0xff]  }
 0x137   :  { %v671_v44 = vpop.f32.mrf.mxu0  ;;  %2347 = vmatprep.subr.bf16.mxu1 %v2526_v42 }
 0x138   :  { %2294 = vmatmul.mubr.msk.bf16.gmra.mxu1 %vm979_vm2, %v917_v43  ;;  %v864_v49 = vmax.f32 %v670_v45, 0.0 }
 0x139   :  { %v672_v46 = vpop.f32.mrf.mxu0  ;;  %2348 = vmatpush3.bf16.msra.mxu1 %v2526_v42 }
 0x13a   :  { %v673_v47 = vadd.f32 %v2788_v2, %v672_v46 }
 0x13b   :  { %v674_v48 = vpop.f32.mrf.mxu0 }
 0x13c   :  { %v865_v50 = vmax.f32 %v673_v47, 0.0 }
 0x13d   :  { %v677_v51 = vpop.f32.mrf.mxu0 }
 0x13e   :  { %v918_v52 = vpack.c.bf16 %v865_v50, %v864_v49  ;;  %v678_v54 = vadd.f32 %v2788_v2, %v677_v51 }
 0x13f   :  { %v679_v53 = vpop.f32.mrf.mxu0 }
 0x140   :  { %2297 = vmatprep.mubr.msk.bf16.mxu1 %vm979_vm2, %v918_v52  ;;  %v866_v59 = vmax.f32 %v678_v54, 0.0 }
 0x141   :  { %v680_v55 = vpop.f32.mrf.mxu0 }
 0x142   :  { %v681_v56 = vadd.f32 %v2788_v2, %v680_v55 }
 0x143   :  { %v682_v58 = vpop.f32.mrf.mxu0 }
 0x144   :  { %v867_v60 = vmax.f32 %v681_v56, 0.0 }
 0x145   :  { %v685_v61 = vpop.f32.mrf.mxu0 }
 0x146   :  { %v919_v62 = vpack.c.bf16 %v867_v60, %v866_v59  ;;  %v686_v0 = vadd.f32 %v2788_v2, %v685_v61 }
 0x147   :  { %v687_v63 = vpop.f32.mrf.mxu0 }
 0x148   :  { %2298 = vmatmul.mubr.msk.bf16.gmra.mxu1 %vm979_vm2, %v919_v62  ;;  %v868_v5 = vmax.f32 %v686_v0, 0.0 }
 0x149   :  { %v688_v1 = vpop.f32.mrf.mxu0 }
 0x14a   :  { %v689_v3 = vadd.f32 %v2788_v2, %v688_v1 }
 0x14b   :  { %v690_v4 = vpop.f32.mrf.mxu0 }
 0x14c   :  { %v869_v6 = vmax.f32 %v689_v3, 0.0 }
 0x14d   :  { %v693_v7 = vpop.f32.mrf.mxu0 }
 0x14e   :  { %v920_v8 = vpack.c.bf16 %v869_v6, %v868_v5  ;;  %v694_v10 = vadd.f32 %v2788_v2, %v693_v7 }
 0x14f   :  { %v695_v9 = vpop.f32.mrf.mxu0 }
 0x150   :  { %2301 = vmatprep.mubr.msk.bf16.mxu1 %vm979_vm2, %v920_v8  ;;  %v870_v14 = vmax.f32 %v694_v10, 0.0 }
 0x151   :  { %v696_v11 = vpop.f32.mrf.mxu0 }
 0x152   :  { %v697_v12 = vadd.f32 %v2788_v2, %v696_v11 }
 0x153   :  { %v698_v13 = vpop.f32.mrf.mxu0 }
 0x154   :  { %v871_v15 = vmax.f32 %v697_v12, 0.0 }
 0x155   :  { %v701_v16 = vpop.f32.mrf.mxu0 }
 0x156   :  { %v921_v17 = vpack.c.bf16 %v871_v15, %v870_v14  ;;  %v702_v19 = vadd.f32 %v2788_v2, %v701_v16 }
 0x157   :  { %v703_v18 = vpop.f32.mrf.mxu0 }
 0x158   :  { %2302 = vmatmul.mubr.msk.bf16.gmra.mxu1 %vm979_vm2, %v921_v17  ;;  %v872_v23 = vmax.f32 %v702_v19, 0.0 }
 0x159   :  { %v704_v20 = vpop.f32.mrf.mxu0 }
 0x15a   :  { %v705_v21 = vadd.f32 %v2788_v2, %v704_v20 }
 0x15b   :  { %v706_v22 = vpop.f32.mrf.mxu0 }
 0x15c   :  { %v873_v24 = vmax.f32 %v705_v21, 0.0 }
 0x15d   :  { %v709_v25 = vpop.f32.mrf.mxu0 }
 0x15e   :  { %v922_v26 = vpack.c.bf16 %v873_v24, %v872_v23  ;;  %v710_v28 = vadd.f32 %v2788_v2, %v709_v25 }
 0x15f   :  { %v711_v27 = vpop.f32.mrf.mxu0 }
 0x160   :  { %2305 = vmatprep.mubr.msk.bf16.mxu1 %vm979_vm2, %v922_v26  ;;  %v874_v33 = vmax.f32 %v710_v28, 0.0 }
 0x161   :  { %v712_v29 = vpop.f32.mrf.mxu0 }
 0x162   :  { %v713_v31 = vadd.f32 %v2788_v2, %v712_v29 }
 0x163   :  { %v714_v32 = vpop.f32.mrf.mxu0 }
 0x164   :  { %v875_v34 = vmax.f32 %v713_v31, 0.0 }
 0x165   :  { %v717_v35 = vpop.f32.mrf.mxu0 }
 0x166   :  { %v923_v36 = vpack.c.bf16 %v875_v34, %v874_v33  ;;  %v718_v39 = vadd.f32 %v2788_v2, %v717_v35 }
 0x167   :  { %v719_v38 = vpop.f32.mrf.mxu0 }
 0x168   :  { %2306 = vmatmul.mubr.msk.bf16.gmra.mxu1 %vm979_vm2, %v923_v36  ;;  %v876_v44 = vmax.f32 %v718_v39, 0.0 }
 0x169   :  { %v720_v40 = vpop.f32.mrf.mxu0 }
 0x16a   :  { %v721_v41 = vadd.f32 %v2788_v2, %v720_v40 }
 0x16b   :  { %v722_v43 = vpop.f32.mrf.mxu0 }
 0x16c   :  { %v877_v45 = vmax.f32 %v721_v41, 0.0 }
 0x16d   :  { %v725_v46 = vpop.f32.mrf.mxu0 }
 0x16e   :  { %v924_v47 = vpack.c.bf16 %v877_v45, %v876_v44  ;;  %v726_v49 = vadd.f32 %v2788_v2, %v725_v46 }
 0x16f   :  { %v727_v48 = vpop.f32.mrf.mxu0 }
 0x170   :  { %2309 = vmatprep.mubr.msk.bf16.mxu1 %vm979_vm2, %v924_v47  ;;  %v878_v53 = vmax.f32 %v726_v49, 0.0 }
 0x171   :  { %v728_v50 = vpop.f32.mrf.mxu0 }
 0x172   :  { %v729_v51 = vadd.f32 %v2788_v2, %v728_v50 }
 0x173   :  { %v730_v52 = vpop.f32.mrf.mxu0 }
 0x174   :  { %v879_v54 = vmax.f32 %v729_v51, 0.0 }
 0x175   :  { %v733_v55 = vpop.f32.mrf.mxu0 }
 0x176   :  { %v925_v56 = vpack.c.bf16 %v879_v54, %v878_v53  ;;  %v734_v58 = vadd.f32 %v2788_v2, %v733_v55 }
 0x177   :  { %v735_v57 = vpop.f32.mrf.mxu0 }
 0x178   :  { %2310 = vmatmul.mubr.msk.bf16.gmra.mxu1 %vm979_vm2, %v925_v56  ;;  %v880_v62 = vmax.f32 %v734_v58, 0.0 }
 0x179   :  { %v736_v59 = vpop.f32.mrf.mxu0 }
 0x17a   :  { %v737_v60 = vadd.f32 %v2788_v2, %v736_v59 }
 0x17b   :  { %v738_v61 = vpop.f32.mrf.mxu0 }
 0x17c   :  { %v881_v63 = vmax.f32 %v737_v60, 0.0 }
 0x17d   :  { %v741_v0 = vpop.f32.mrf.mxu0 }
 0x17e   :  { %v926_v1 = vpack.c.bf16 %v881_v63, %v880_v62  ;;  %v742_v4 = vadd.f32 %v2788_v2, %v741_v0 }
 0x17f   :  { %v743_v3 = vpop.f32.mrf.mxu0 }
 0x180   :  { %2313 = vmatprep.mubr.msk.bf16.mxu1 %vm979_vm2, %v926_v1  ;;  %v882_v8 = vmax.f32 %v742_v4, 0.0 }
 0x181   :  { %v744_v5 = vpop.f32.mrf.mxu0 }
 0x182   :  { %v745_v6 = vadd.f32 %v2788_v2, %v744_v5 }
 0x183   :  { %v746_v7 = vpop.f32.mrf.mxu0 }
 0x184   :  { %v883_v9 = vmax.f32 %v745_v6, 0.0 }
 0x185   :  { %v749_v10 = vpop.f32.mrf.mxu0 }
 0x186   :  { %v927_v11 = vpack.c.bf16 %v883_v9, %v882_v8  ;;  %v750_v13 = vadd.f32 %v2788_v2, %v749_v10 }
 0x187   :  { %v751_v12 = vpop.f32.mrf.mxu0 }
 0x188   :  { %2314 = vmatmul.mubr.msk.bf16.gmra.mxu1 %vm979_vm2, %v927_v11  ;;  %v884_v17 = vmax.f32 %v750_v13, 0.0 }
 0x189   :  { %v752_v14 = vpop.f32.mrf.mxu0 }
 0x18a   :  { %v753_v15 = vadd.f32 %v2788_v2, %v752_v14 }
 0x18b   :  { %v754_v16 = vpop.f32.mrf.mxu0 }
 0x18c   :  { %v885_v18 = vmax.f32 %v753_v15, 0.0 }
 0x18d   :  { %v757_v19 = vpop.f32.mrf.mxu0 }
 0x18e   :  { %v928_v20 = vpack.c.bf16 %v885_v18, %v884_v17  ;;  %v758_v22 = vadd.f32 %v2788_v2, %v757_v19 }
 0x18f   :  { %v759_v21 = vpop.f32.mrf.mxu0 }
 0x190   :  { %2317 = vmatprep.mubr.msk.bf16.mxu1 %vm979_vm2, %v928_v20  ;;  %v886_v26 = vmax.f32 %v758_v22, 0.0 }
 0x191   :  { %v760_v23 = vpop.f32.mrf.mxu0 }
 0x192   :  { %v761_v24 = vadd.f32 %v2788_v2, %v760_v23 }
 0x193   :  { %v762_v25 = vpop.f32.mrf.mxu0 }
 0x194   :  { %v887_v27 = vmax.f32 %v761_v24, 0.0 }
 0x195   :  { %v765_v28 = vpop.f32.mrf.mxu0 }
 0x196   :  { %v929_v29 = vpack.c.bf16 %v887_v27, %v886_v26  ;;  %v766_v31 = vadd.f32 %v2788_v2, %v765_v28 }
 0x197   :  { %v767_v30 = vpop.f32.mrf.mxu0 }
 0x198   :  { %2318 = vmatmul.mubr.msk.bf16.gmra.mxu1 %vm979_vm2, %v929_v29  ;;  %v888_v35 = vmax.f32 %v766_v31, 0.0 }
 0x199   :  { %v768_v32 = vpop.f32.mrf.mxu0 }
 0x19a   :  { %v769_v33 = vadd.f32 %v2788_v2, %v768_v32 }
 0x19b   :  { %v770_v34 = vpop.f32.mrf.mxu0 }
 0x19c   :  { %v889_v36 = vmax.f32 %v769_v33, 0.0 }
 0x19d   :  { %v773_v37 = vpop.f32.mrf.mxu0 }
 0x19e   :  { %v930_v38 = vpack.c.bf16 %v889_v36, %v888_v35  ;;  %v774_v40 = vadd.f32 %v2788_v2, %v773_v37 }
 0x19f   :  { %v775_v39 = vpop.f32.mrf.mxu0 }
 0x1a0   :  { %2321 = vmatprep.mubr.msk.bf16.mxu1 %vm979_vm2, %v930_v38  ;;  %v890_v44 = vmax.f32 %v774_v40, 0.0 }
 0x1a1   :  { %v776_v41 = vpop.f32.mrf.mxu0 }
 0x1a2   :  { %v777_v42 = vadd.f32 %v2788_v2, %v776_v41 }
 0x1a3   :  { %v778_v43 = vpop.f32.mrf.mxu0 }
 0x1a4   :  { %v891_v45 = vmax.f32 %v777_v42, 0.0 }
 0x1a5   :  { %v781_v46 = vpop.f32.mrf.mxu0 }
 0x1a6   :  { %v931_v47 = vpack.c.bf16 %v891_v45, %v890_v44  ;;  %v782_v49 = vadd.f32 %v2788_v2, %v781_v46 }
 0x1a7   :  { %v783_v48 = vpop.f32.mrf.mxu0 }
 0x1a8   :  { %2322 = vmatmul.mubr.msk.bf16.gmra.mxu1 %vm979_vm2, %v931_v47  ;;  %v892_v53 = vmax.f32 %v782_v49, 0.0 }
 0x1a9   :  { %v784_v50 = vpop.f32.mrf.mxu0 }
 0x1aa   :  { %v785_v51 = vadd.f32 %v2788_v2, %v784_v50 }
 0x1ab   :  { %v786_v52 = vpop.f32.mrf.mxu0 }
 0x1ac   :  { %v893_v54 = vmax.f32 %v785_v51, 0.0 }
 0x1ad   :  { %v789_v55 = vpop.f32.mrf.mxu0 }
 0x1ae   :  { %v932_v56 = vpack.c.bf16 %v893_v54, %v892_v53  ;;  %v790_v58 = vadd.f32 %v2788_v2, %v789_v55 }
 0x1af   :  { %v791_v57 = vpop.f32.mrf.mxu0 }
 0x1b0   :  { %2325 = vmatprep.mubr.msk.bf16.mxu1 %vm979_vm2, %v932_v56  ;;  %v894_v62 = vmax.f32 %v790_v58, 0.0  ;;  %v2947_v56 = vld [vmem:[%s3233_s4] ss:$0 sm:$0xff] }
 0x1b1   :  { %v792_v59 = vpop.f32.mrf.mxu0 }
 0x1b2   :  { %v793_v60 = vadd.f32 %v2788_v2, %v792_v59 }
 0x1b3   :  { %v794_v61 = vpop.f32.mrf.mxu0 }
 0x1b4   :  { %v895_v63 = vmax.f32 %v793_v60, 0.0 }
 0x1b5   :  { %v797_v0 = vpop.f32.mrf.mxu0 }
 0x1b6   :  { %v933_v1 = vpack.c.bf16 %v895_v63, %v894_v62  ;;  %v798_v4 = vadd.f32 %v2788_v2, %v797_v0 }
 0x1b7   :  { %v799_v3 = vpop.f32.mrf.mxu0 }
 0x1b8   :  { %2326 = vmatmul.mubr.msk.bf16.gmra.mxu1 %vm979_vm2, %v933_v1  ;;  %v896_v8 = vmax.f32 %v798_v4, 0.0  ;;  %v2928_v11 = vpop.f32.mrf.mxu1 }
 0x1b9   :  { %v800_v5 = vpop.f32.mrf.mxu0 }
 0x1ba   :  { %v801_v6 = vadd.f32 %v2788_v2, %v800_v5  ;;  %v1110_v16 = vpop.f32.mrf.mxu1 }
 0x1bb   :  { %v802_v7 = vpop.f32.mrf.mxu0  ;;  %v1111_v62 = vadd.f32 %v2947_v56, %v1110_v16 }
 0x1bc   :  { %v897_v9 = vmax.f32 %v801_v6, 0.0  ;;  %v2280_v22 = vpop.f32.mrf.mxu1 }
 0x1bd   :  { %v805_v10 = vpop.f32.mrf.mxu0  ;;  %v1365_v7 = vmax.f32 %v1111_v62, 0.0 }
 0x1be   :  { %v934_v12 = vpack.c.bf16 %v897_v9, %v896_v8  ;;  %v806_v14 = vadd.f32 %v2788_v2, %v805_v10  ;;  %v1113_v27 = vpop.f32.mrf.mxu1  ;;  %v1122_v8 = vadd.f32 %v2280_v22, %v2947_v56 }
 0x1bf   :  { %v807_v13 = vpop.f32.mrf.mxu0  ;;  %v1114_v59 = vadd.f32 %v2947_v56, %v1113_v27 }
 0x1c0   :  { %2329 = vmatprep.mubr.msk.bf16.mxu1 %vm979_vm2, %v934_v12  ;;  %v898_v19 = vmax.f32 %v806_v14, 0.0  ;;  %v1119_v14 = vadd.f32 %v2928_v11, %v2947_v56  ;;  %v1368_v16 = vmax.f32 %v1122_v8, 0.0 }
 0x1c1   :  { %v808_v15 = vpop.f32.mrf.mxu0  ;;  %v1366_v3 = vmax.f32 %v1114_v59, 0.0 }
 0x1c2   :  { %v809_v17 = vadd.f32 %v2788_v2, %v808_v15 }
 0x1c3   :  { %v810_v18 = vpop.f32.mrf.mxu0  ;;  %v1429_v12 = vpack.c.bf16 %v1366_v3, %v1365_v7 }
 0x1c4   :  { %v899_v20 = vmax.f32 %v809_v17, 0.0  ;;  %v1367_v18 = vmax.f32 %v1119_v14, 0.0 }
 0x1c5   :  { %v813_v21 = vpop.f32.mrf.mxu0 }
 0x1c6   :  { %v935_v23 = vpack.c.bf16 %v899_v20, %v898_v19  ;;  %v814_v25 = vadd.f32 %v2788_v2, %v813_v21  ;;  %v1430_v21 = vpack.c.bf16 %v1368_v16, %v1367_v18 }
 0x1c7   :  { %v815_v24 = vpop.f32.mrf.mxu0 }
 0x1c8   :  { %2330 = vmatmul.mubr.msk.bf16.gmra.mxu1 %vm979_vm2, %v935_v23  ;;  %v900_v30 = vmax.f32 %v814_v25, 0.0  ;;  %v2936_v31 = vpop.f32.mrf.mxu1 }
 0x1c9   :  { %v816_v26 = vpop.f32.mrf.mxu0  ;;  %v1135_v11 = vadd.f32 %v2936_v31, %v2947_v56 }
 0x1ca   :  { %v817_v28 = vadd.f32 %v2788_v2, %v816_v26  ;;  %v1126_v36 = vpop.f32.mrf.mxu1 }
 0x1cb   :  { %v818_v29 = vpop.f32.mrf.mxu0 }
 0x1cc   :  { %v901_v32 = vmax.f32 %v817_v28, 0.0  ;;  %v2284_v41 = vpop.f32.mrf.mxu1  ;;  %v1371_v29 = vmax.f32 %v1135_v11, 0.0 }
 0x1cd   :  { %v821_v33 = vpop.f32.mrf.mxu0  ;;  %v1138_v22 = vadd.f32 %v2284_v41, %v2947_v56 }
 0x1ce   :  { %v936_v34 = vpack.c.bf16 %v901_v32, %v900_v30  ;;  %v822_v37 = vadd.f32 %v2788_v2, %v821_v33  ;;  %v1129_v47 = vpop.f32.mrf.mxu1 }
 0x1cf   :  { %v823_v35 = vpop.f32.mrf.mxu0  ;;  %v1130_v13 = vadd.f32 %v2947_v56, %v1129_v47  ;;  %v1372_v27 = vmax.f32 %v1138_v22, 0.0 }
 0x1d0   :  { %2333 = vmatprep.mubr.msk.bf16.mxu1 %vm979_vm2, %v936_v34  ;;  %v902_v42 = vmax.f32 %v822_v37, 0.0 }
 0x1d1   :  { %v824_v38 = vpop.f32.mrf.mxu0  ;;  %v1370_v17 = vmax.f32 %v1130_v13, 0.0  ;;  %v1432_v33 = vpack.c.bf16 %v1372_v27, %v1371_v29 }
 0x1d2   :  { %v825_v39 = vadd.f32 %v2788_v2, %v824_v38 }
 0x1d3   :  { %v826_v40 = vpop.f32.mrf.mxu0 }
 0x1d4   :  { %v903_v43 = vmax.f32 %v825_v39, 0.0 }
 0x1d5   :  { %v829_v44 = vpop.f32.mrf.mxu0 }
 0x1d6   :  { %v937_v45 = vpack.c.bf16 %v903_v43, %v902_v42  ;;  %v830_v48 = vadd.f32 %v2788_v2, %v829_v44 }
 0x1d7   :  { %v831_v46 = vpop.f32.mrf.mxu0 }
 0x1d8   :  { %2334 = vmatmul.mubr.msk.bf16.gmra.mxu1 %vm979_vm2, %v937_v45  ;;  %v2287_v50 = vpop.f32.mrf.mxu1  ;;  %v904_v53 = vmax.f32 %v830_v48, 0.0 }
 0x1d9   :  { %v832_v49 = vpop.f32.mrf.mxu0  ;;  %v1151_v31 = vadd.f32 %v2287_v50, %v2947_v56 }
 0x1da   :  { %v833_v51 = vadd.f32 %v2788_v2, %v832_v49  ;;  %v1142_v58 = vpop.f32.mrf.mxu1 }
 0x1db   :  { %v834_v52 = vpop.f32.mrf.mxu0  ;;  %v1143_v26 = vadd.f32 %v2947_v56, %v1142_v58  ;;  %v1375_v42 = vmax.f32 %v1151_v31, 0.0 }
 0x1dc   :  { %v905_v54 = vmax.f32 %v833_v51, 0.0  ;;  %v2288_v0 = vpop.f32.mrf.mxu1 }
 0x1dd   :  { %v837_v55 = vpop.f32.mrf.mxu0  ;;  %v1373_v32 = vmax.f32 %v1143_v26, 0.0  ;;  %v1154_v34 = vadd.f32 %v2288_v0, %v2947_v56 }
 0x1de   :  { %v938_v57 = vpack.c.bf16 %v905_v54, %v904_v53  ;;  %v838_v61 = vadd.f32 %v2788_v2, %v837_v55  ;;  %v1145_v9 = vpop.f32.mrf.mxu1 }
 0x1df   :  { %v839_v60 = vpop.f32.mrf.mxu0  ;;  %v1146_v24 = vadd.f32 %v2947_v56, %v1145_v9  ;;  %v1376_v39 = vmax.f32 %v1154_v34, 0.0 }
 0x1e0   :  { %2337 = vmatprep.mubr.msk.bf16.mxu1 %vm979_vm2, %v938_v57  ;;  %v906_v5 = vmax.f32 %v838_v61, 0.0 }
 0x1e1   :  { %v840_v63 = vpop.f32.mrf.mxu0  ;;  %v1374_v28 = vmax.f32 %v1146_v24, 0.0  ;;  %v1434_v45 = vpack.c.bf16 %v1376_v39, %v1375_v42 }
 0x1e2   :  { %v841_v1 = vadd.f32 %v2788_v2, %v840_v63  ;;  %v1127_v2 = vadd.f32 %v2947_v56, %v1126_v36 }
 0x1e3   :  { %v842_v4 = vpop.f32.mrf.mxu0  ;;  %v1433_v35 = vpack.c.bf16 %v1374_v28, %v1373_v32 }
 0x1e4   :  { %v907_v6 = vmax.f32 %v841_v1, 0.0  ;;  %v1369_v20 = vmax.f32 %v1127_v2, 0.0 }
 0x1e6   :  { %v939_v10 = vpack.c.bf16 %v907_v6, %v906_v5  ;;  %v1431_v23 = vpack.c.bf16 %v1370_v17, %v1369_v20 }
 0x1e8   :  { %v2291_v15 = vpop.f32.mrf.mxu1  ;;  %2338 = vmatmul.mubr.msk.bf16.gmra.mxu1 %vm979_vm2, %v939_v10 }
 0x1e9   :  { %2349 = vmatprep.mubr.msk.bf16.mxu1 %vm979_vm2, %v1429_v12  ;;  %v1167_v50 = vadd.f32 %v2291_v15, %v2947_v56 }
 0x1ea   :  { %v1158_v19 = vpop.f32.mrf.mxu1 }
 0x1eb   :  { %v1159_v38 = vadd.f32 %v2947_v56, %v1158_v19  ;;  %v1379_v54 = vmax.f32 %v1167_v50, 0.0 }
 0x1ec   :  { %v2292_v25 = vpop.f32.mrf.mxu1 }
 0x1ed   :  { %v1377_v44 = vmax.f32 %v1159_v38, 0.0  ;;  %v1170_v46 = vadd.f32 %v2292_v25, %v2947_v56 }
 0x1ee   :  { %v1161_v30 = vpop.f32.mrf.mxu1 }
 0x1ef   :  { %v1162_v36 = vadd.f32 %v2947_v56, %v1161_v30  ;;  %v1380_v52 = vmax.f32 %v1170_v46, 0.0 }
 0x1f0   :  { %2350 = vmatmul.mubr.msk.bf16.vlgmr.msra.gmra.mxu1 %vm979_vm2, %v1430_v21 }
 0x1f1   :  { %2353 = vmatprep.mubr.msk.bf16.mxu1 %vm979_vm2, %v1431_v23  ;;  %v1378_v41 = vmax.f32 %v1162_v36, 0.0  ;;  %v1436_v57 = vpack.c.bf16 %v1380_v52, %v1379_v54 }
 0x1f3   :  { %v1435_v48 = vpack.c.bf16 %v1378_v41, %v1377_v44 }
 0x1f8   :  { %v2295_v37 = vpop.f32.mrf.mxu1  ;;  %2354 = vmatmul.mubr.msk.bf16.gmra.mxu1 %vm979_vm2, %v1432_v33 }
 0x1f9   :  { %2357 = vmatprep.mubr.msk.bf16.mxu1 %vm979_vm2, %v1433_v35  ;;  %v1183_v60 = vadd.f32 %v2295_v37, %v2947_v56 }
 0x1fa   :  { %v1174_v40 = vpop.f32.mrf.mxu1 }
 0x1fb   :  { %v1175_v51 = vadd.f32 %v2947_v56, %v1174_v40  ;;  %v1383_v0 = vmax.f32 %v1183_v60, 0.0 }
 0x1fc   :  { %v2296_v43 = vpop.f32.mrf.mxu1 }
 0x1fd   :  { %v1381_v55 = vmax.f32 %v1175_v51, 0.0  ;;  %v1186_v58 = vadd.f32 %v2296_v43, %v2947_v56 }
 0x1fe   :  { %v1177_v47 = vpop.f32.mrf.mxu1 }
 0x1ff   :  { %v1178_v49 = vadd.f32 %v2947_v56, %v1177_v47  ;;  %v1384_v62 = vmax.f32 %v1186_v58, 0.0 }
 0x200   :  { %2358 = vmatmul.mubr.msk.bf16.gmra.mxu1 %vm979_vm2, %v1434_v45 }
 0x201   :  { %2361 = vmatprep.mubr.msk.bf16.mxu1 %vm979_vm2, %v1435_v48  ;;  %v1382_v53 = vmax.f32 %v1178_v49, 0.0  ;;  %v1438_v4 = vpack.c.bf16 %v1384_v62, %v1383_v0 }
 0x203   :  { %v1437_v59 = vpack.c.bf16 %v1382_v53, %v1381_v55 }
 0x208   :  { %v2299_v61 = vpop.f32.mrf.mxu1  ;;  %2362 = vmatmul.mubr.msk.bf16.gmra.mxu1 %vm979_vm2, %v1436_v57 }
 0x209   :  { %2365 = vmatprep.mubr.msk.bf16.mxu1 %vm979_vm2, %v1437_v59  ;;  %v1199_v8 = vadd.f32 %v2299_v61, %v2947_v56 }
 0x20a   :  { %v1190_v63 = vpop.f32.mrf.mxu1 }
 0x20b   :  { %v1191_v3 = vadd.f32 %v2947_v56, %v1190_v63  ;;  %v1387_v14 = vmax.f32 %v1199_v8, 0.0 }
 0x20c   :  { %v2300_v1 = vpop.f32.mrf.mxu1 }
 0x20d   :  { %v1202_v5 = vadd.f32 %v2300_v1, %v2947_v56  ;;  %v1385_v9 = vmax.f32 %v1191_v3, 0.0 }
 0x20e   :  { %v1193_v6 = vpop.f32.mrf.mxu1 }
 0x20f   :  { %v1194_v7 = vadd.f32 %v2947_v56, %v1193_v6  ;;  %v1388_v12 = vmax.f32 %v1202_v5, 0.0 }
 0x210   :  { %2366 = vmatmul.mubr.msk.bf16.gmra.mxu1 %vm979_vm2, %v1438_v4 }
 0x211   :  { %v1386_v10 = vmax.f32 %v1194_v7, 0.0  ;;  %v1440_v15 = vpack.c.bf16 %v1388_v12, %v1387_v14 }
 0x213   :  { %v1439_v13 = vpack.c.bf16 %v1386_v10, %v1385_v9 }
 0x215   :  { %2369 = vmatprep.mubr.msk.bf16.mxu1 %vm979_vm2, %v1439_v13 }
 0x218   :  { %v2303_v2 = vpop.f32.mrf.mxu1  ;;  %2370 = vmatmul.mubr.msk.bf16.gmra.mxu1 %vm979_vm2, %v1440_v15 }
 0x219   :  { %v1215_v20 = vadd.f32 %v2303_v2, %v2947_v56 }
 0x21a   :  { %v1206_v16 = vpop.f32.mrf.mxu1 }
 0x21b   :  { %v1207_v18 = vadd.f32 %v2947_v56, %v1206_v16  ;;  %v1391_v25 = vmax.f32 %v1215_v20, 0.0 }
 0x21c   :  { %v2304_v17 = vpop.f32.mrf.mxu1 }
 0x21d   :  { %v1218_v19 = vadd.f32 %v2304_v17, %v2947_v56  ;;  %v1389_v24 = vmax.f32 %v1207_v18, 0.0 }
 0x21e   :  { %v1209_v21 = vpop.f32.mrf.mxu1 }
 0x21f   :  { %v1210_v22 = vadd.f32 %v2947_v56, %v1209_v21  ;;  %v1392_v23 = vmax.f32 %v1218_v19, 0.0 }
 0x221   :  { %v1390_v11 = vmax.f32 %v1210_v22, 0.0  ;;  %v1442_v27 = vpack.c.bf16 %v1392_v23, %v1391_v25 }
 0x223   :  { %v1441_v26 = vpack.c.bf16 %v1390_v11, %v1389_v24 }
 0x225   :  { %2373 = vmatprep.mubr.msk.bf16.mxu1 %vm979_vm2, %v1441_v26 }
 0x226   :  { %2374 = vmatmul.mubr.msk.bf16.gmra.mxu1 %vm979_vm2, %v1442_v27 }
 0x228   :  { %v2307_v28 = vpop.f32.mrf.mxu1 }
 0x229   :  { %v1231_v34 = vadd.f32 %v2307_v28, %v2947_v56 }
 0x22a   :  { %v1222_v29 = vpop.f32.mrf.mxu1 }
 0x22b   :  { %v1223_v32 = vadd.f32 %v2947_v56, %v1222_v29  ;;  %v1395_v39 = vmax.f32 %v1231_v34, 0.0 }
 0x22c   :  { %v2308_v30 = vpop.f32.mrf.mxu1 }
 0x22d   :  { %v1234_v33 = vadd.f32 %v2308_v30, %v2947_v56  ;;  %v1393_v37 = vmax.f32 %v1223_v32, 0.0 }
 0x22e   :  { %v1225_v35 = vpop.f32.mrf.mxu1 }
 0x22f   :  { %v1226_v36 = vadd.f32 %v2947_v56, %v1225_v35  ;;  %v1396_v31 = vmax.f32 %v1234_v33, 0.0 }
 0x231   :  { %v1394_v38 = vmax.f32 %v1226_v36, 0.0  ;;  %v1444_v41 = vpack.c.bf16 %v1396_v31, %v1395_v39 }
 0x233   :  { %v1443_v40 = vpack.c.bf16 %v1394_v38, %v1393_v37 }
 0x235   :  { %2377 = vmatprep.mubr.msk.bf16.mxu1 %vm979_vm2, %v1443_v40 }
 0x236   :  { %2378 = vmatmul.mubr.msk.bf16.gmra.mxu1 %vm979_vm2, %v1444_v41 }
 0x238   :  { %v2311_v42 = vpop.f32.mrf.mxu1 }
 0x239   :  { %v1247_v47 = vadd.f32 %v2311_v42, %v2947_v56 }
 0x23a   :  { %v1238_v43 = vpop.f32.mrf.mxu1 }
 0x23b   :  { %v1239_v45 = vadd.f32 %v2947_v56, %v1238_v43  ;;  %v1399_v53 = vmax.f32 %v1247_v47, 0.0 }
 0x23c   :  { %v2312_v44 = vpop.f32.mrf.mxu1 }
 0x23d   :  { %v1250_v46 = vadd.f32 %v2312_v44, %v2947_v56  ;;  %v1397_v51 = vmax.f32 %v1239_v45, 0.0 }
 0x23e   :  { %v1241_v48 = vpop.f32.mrf.mxu1 }
 0x23f   :  { %v1242_v49 = vadd.f32 %v2947_v56, %v1241_v48  ;;  %v1400_v50 = vmax.f32 %v1250_v46, 0.0 }
 0x241   :  { %v1398_v52 = vmax.f32 %v1242_v49, 0.0  ;;  %v1446_v55 = vpack.c.bf16 %v1400_v50, %v1399_v53 }
 0x243   :  { %v1445_v54 = vpack.c.bf16 %v1398_v52, %v1397_v51 }
 0x245   :  { %2381 = vmatprep.mubr.msk.bf16.mxu1 %vm979_vm2, %v1445_v54 }
 0x246   :  { %2382 = vmatmul.mubr.msk.bf16.gmra.mxu1 %vm979_vm2, %v1446_v55 }
 0x248   :  { %v2315_v57 = vpop.f32.mrf.mxu1 }
 0x249   :  { %v1263_v62 = vadd.f32 %v2315_v57, %v2947_v56 }
 0x24a   :  { %v1254_v58 = vpop.f32.mrf.mxu1 }
 0x24b   :  { %v1255_v60 = vadd.f32 %v2947_v56, %v1254_v58  ;;  %v1403_v5 = vmax.f32 %v1263_v62, 0.0 }
 0x24c   :  { %v2316_v59 = vpop.f32.mrf.mxu1 }
 0x24d   :  { %v1266_v61 = vadd.f32 %v2316_v59, %v2947_v56  ;;  %v1401_v3 = vmax.f32 %v1255_v60, 0.0 }
 0x24e   :  { %v1257_v63 = vpop.f32.mrf.mxu1 }
 0x24f   :  { %v1258_v0 = vadd.f32 %v2947_v56, %v1257_v63  ;;  %v1404_v1 = vmax.f32 %v1266_v61, 0.0 }
 0x251   :  { %v1402_v4 = vmax.f32 %v1258_v0, 0.0  ;;  %v1448_v7 = vpack.c.bf16 %v1404_v1, %v1403_v5 }
 0x253   :  { %v1447_v6 = vpack.c.bf16 %v1402_v4, %v1401_v3 }
 0x255   :  { %2385 = vmatprep.mubr.msk.bf16.mxu1 %vm979_vm2, %v1447_v6 }
 0x256   :  { %2386 = vmatmul.mubr.msk.bf16.gmra.mxu1 %vm979_vm2, %v1448_v7 }
 0x258   :  { %v2319_v8 = vpop.f32.mrf.mxu1 }
 0x259   :  { %v1279_v14 = vadd.f32 %v2319_v8, %v2947_v56 }
 0x25a   :  { %v1270_v9 = vpop.f32.mrf.mxu1 }
 0x25b   :  { %v1271_v12 = vadd.f32 %v2947_v56, %v1270_v9  ;;  %v1407_v19 = vmax.f32 %v1279_v14, 0.0 }
 0x25c   :  { %v2320_v10 = vpop.f32.mrf.mxu1 }
 0x25d   :  { %v1282_v13 = vadd.f32 %v2320_v10, %v2947_v56  ;;  %v1405_v17 = vmax.f32 %v1271_v12, 0.0 }
 0x25e   :  { %v1273_v15 = vpop.f32.mrf.mxu1 }
 0x25f   :  { %v1274_v2 = vadd.f32 %v2947_v56, %v1273_v15  ;;  %v1408_v16 = vmax.f32 %v1282_v13, 0.0 }
 0x261   :  { %v1406_v18 = vmax.f32 %v1274_v2, 0.0  ;;  %v1450_v21 = vpack.c.bf16 %v1408_v16, %v1407_v19 }
 0x263   :  { %v1449_v20 = vpack.c.bf16 %v1406_v18, %v1405_v17 }
 0x265   :  { %2389 = vmatprep.mubr.msk.bf16.mxu1 %vm979_vm2, %v1449_v20 }
 0x266   :  { %2390 = vmatmul.mubr.msk.bf16.gmra.mxu1 %vm979_vm2, %v1450_v21 }
 0x268   :  { %v2323_v22 = vpop.f32.mrf.mxu1 }
 0x269   :  { %v1295_v26 = vadd.f32 %v2323_v22, %v2947_v56 }
 0x26a   :  { %v1286_v23 = vpop.f32.mrf.mxu1 }
 0x26b   :  { %v1287_v11 = vadd.f32 %v2947_v56, %v1286_v23  ;;  %v1411_v33 = vmax.f32 %v1295_v26, 0.0 }
 0x26c   :  { %v2324_v24 = vpop.f32.mrf.mxu1 }
 0x26d   :  { %v1298_v25 = vadd.f32 %v2324_v24, %v2947_v56  ;;  %v1409_v30 = vmax.f32 %v1287_v11, 0.0 }
 0x26e   :  { %v1289_v27 = vpop.f32.mrf.mxu1 }
 0x26f   :  { %v1290_v28 = vadd.f32 %v2947_v56, %v1289_v27  ;;  %v1412_v29 = vmax.f32 %v1298_v25, 0.0 }
 0x271   :  { %v1410_v32 = vmax.f32 %v1290_v28, 0.0  ;;  %v1452_v35 = vpack.c.bf16 %v1412_v29, %v1411_v33 }
 0x273   :  { %v1451_v34 = vpack.c.bf16 %v1410_v32, %v1409_v30 }
 0x275   :  { %2393 = vmatprep.mubr.msk.bf16.mxu1 %vm979_vm2, %v1451_v34 }
 0x276   :  { %2394 = vmatmul.mubr.msk.bf16.gmra.mxu1 %vm979_vm2, %v1452_v35 }
 0x278   :  { %v2327_v36 = vpop.f32.mrf.mxu1 }
 0x279   :  { %v1311_v40 = vadd.f32 %v2327_v36, %v2947_v56 }
 0x27a   :  { %v1302_v31 = vpop.f32.mrf.mxu1 }
 0x27b   :  { %v1303_v38 = vadd.f32 %v2947_v56, %v1302_v31  ;;  %v1415_v46 = vmax.f32 %v1311_v40, 0.0 }
 0x27c   :  { %v2328_v37 = vpop.f32.mrf.mxu1 }
 0x27d   :  { %v1314_v39 = vadd.f32 %v2328_v37, %v2947_v56  ;;  %v1413_v44 = vmax.f32 %v1303_v38, 0.0 }
 0x27e   :  { %v1305_v41 = vpop.f32.mrf.mxu1 }
 0x27f   :  { %v1306_v42 = vadd.f32 %v2947_v56, %v1305_v41  ;;  %v1416_v43 = vmax.f32 %v1314_v39, 0.0 }
 0x281   :  { %v1414_v45 = vmax.f32 %v1306_v42, 0.0  ;;  %v1454_v48 = vpack.c.bf16 %v1416_v43, %v1415_v46 }
 0x283   :  { %v1453_v47 = vpack.c.bf16 %v1414_v45, %v1413_v44 }
 0x285   :  { %2397 = vmatprep.mubr.msk.bf16.mxu1 %vm979_vm2, %v1453_v47 }
 0x286   :  { %2398 = vmatmul.mubr.msk.bf16.gmra.mxu1 %vm979_vm2, %v1454_v48 }
 0x288   :  { %v2331_v49 = vpop.f32.mrf.mxu1 }
 0x289   :  { %v1327_v54 = vadd.f32 %v2331_v49, %v2947_v56 }
 0x28a   :  { %v1318_v50 = vpop.f32.mrf.mxu1 }
 0x28b   :  { %v1319_v52 = vadd.f32 %v2947_v56, %v1318_v50  ;;  %v1419_v61 = vmax.f32 %v1327_v54, 0.0 }
 0x28c   :  { %v2332_v51 = vpop.f32.mrf.mxu1 }
 0x28d   :  { %v1330_v53 = vadd.f32 %v2332_v51, %v2947_v56  ;;  %v1417_v59 = vmax.f32 %v1319_v52, 0.0 }
 0x28e   :  { %v1321_v55 = vpop.f32.mrf.mxu1 }
 0x28f   :  { %v1322_v57 = vadd.f32 %v2947_v56, %v1321_v55  ;;  %v1420_v58 = vmax.f32 %v1330_v53, 0.0 }
 0x291   :  { %v1418_v60 = vmax.f32 %v1322_v57, 0.0  ;;  %v1456_v63 = vpack.c.bf16 %v1420_v58, %v1419_v61 }
 0x293   :  { %v1455_v62 = vpack.c.bf16 %v1418_v60, %v1417_v59 }
 0x295   :  { %2401 = vmatprep.mubr.msk.bf16.mxu1 %vm979_vm2, %v1455_v62 }
 0x296   :  { %2402 = vmatmul.mubr.msk.bf16.gmra.mxu1 %vm979_vm2, %v1456_v63  ;;  %v3096_v63 = vld [vmem:[%s3234_s6] ss:$0 sm:$0xff] }
 0x298   :  { %v2335_v0 = vpop.f32.mrf.mxu1 }
 0x299   :  { %v1343_v6 = vadd.f32 %v2335_v0, %v2947_v56 }
 0x29a   :  { %v1334_v1 = vpop.f32.mrf.mxu1 }
 0x29b   :  { %v1335_v4 = vadd.f32 %v2947_v56, %v1334_v1  ;;  %v1423_v13 = vmax.f32 %v1343_v6, 0.0 }
 0x29c   :  { %v2336_v3 = vpop.f32.mrf.mxu1 }
 0x29d   :  { %v1346_v5 = vadd.f32 %v2336_v3, %v2947_v56  ;;  %v1421_v10 = vmax.f32 %v1335_v4, 0.0 }
 0x29e   :  { %v1337_v7 = vpop.f32.mrf.mxu1 }
 0x29f   :  { %v1338_v8 = vadd.f32 %v2947_v56, %v1337_v7  ;;  %v1424_v9 = vmax.f32 %v1346_v5, 0.0 }
 0x2a1   :  { %v1422_v12 = vmax.f32 %v1338_v8, 0.0  ;;  %v1458_v15 = vpack.c.bf16 %v1424_v9, %v1423_v13 }
 0x2a3   :  { %v1457_v14 = vpack.c.bf16 %v1422_v12, %v1421_v10 }
 0x2a5   :  { %2405 = vmatprep.mubr.msk.bf16.mxu1 %vm979_vm2, %v1457_v14 }
 0x2a6   :  { %2406 = vmatmul.mubr.msk.bf16.gmra.mxu1 %vm979_vm2, %v1458_v15 }
 0x2a8   :  { %v2339_v2 = vpop.f32.mrf.mxu1 }
 0x2a9   :  { %v1359_v20 = vadd.f32 %v2339_v2, %v2947_v56 }
 0x2aa   :  { %v1350_v16 = vpop.f32.mrf.mxu1 }
 0x2ab   :  { %v1351_v18 = vadd.f32 %v2947_v56, %v1350_v16  ;;  %v1427_v26 = vmax.f32 %v1359_v20, 0.0 }
 0x2ac   :  { %v2340_v17 = vpop.f32.mrf.mxu1 }
 0x2ad   :  { %v1362_v19 = vadd.f32 %v2340_v17, %v2947_v56  ;;  %v1425_v11 = vmax.f32 %v1351_v18, 0.0 }
 0x2ae   :  { %v1353_v21 = vpop.f32.mrf.mxu1 }
 0x2af   :  { %v1354_v22 = vadd.f32 %v2947_v56, %v1353_v21  ;;  %v1428_v23 = vmax.f32 %v1362_v19, 0.0 }
 0x2b0   :  { %v2351_v24 = vpop.f32.mrf.mxu1 }
 0x2b1   :  { %v1426_v25 = vmax.f32 %v1354_v22, 0.0  ;;  %v1460_v29 = vpack.c.bf16 %v1428_v23, %v1427_v26  ;;  %v1639_v4 = vadd.f32 %v2351_v24, %v3096_v63 }
 0x2b2   :  { %v1630_v27 = vpop.f32.mrf.mxu1 }
 0x2b3   :  { %v1459_v28 = vpack.c.bf16 %v1426_v25, %v1425_v11  ;;  %v1631_v1 = vadd.f32 %v3096_v63, %v1630_v27  ;;  %v1887_v12 = vmax.f32 %v1639_v4, 0.0 }
 0x2b4   :  { %v2352_v30 = vpop.f32.mrf.mxu1 }
 0x2b5   :  { %2409 = vmatprep.mubr.msk.bf16.mxu1 %vm979_vm2, %v1459_v28  ;;  %v1885_v7 = vmax.f32 %v1631_v1, 0.0  ;;  %v1642_v8 = vadd.f32 %v2352_v30, %v3096_v63 }
 0x2b6   :  { %v1633_v32 = vpop.f32.mrf.mxu1  ;;  %2410 = vmatmul.mubr.msk.bf16.gmra.mxu1 %vm979_vm2, %v1460_v29 }
 0x2b7   :  { %v1634_v6 = vadd.f32 %v3096_v63, %v1633_v32  ;;  %v1949_v15 = vmax.f32 %v1885_v7, %v1887_v12  ;;  %v1888_v17 = vmax.f32 %v1642_v8, 0.0 }
 0x2b8   :  { %v2355_v33 = vpop.f32.mrf.mxu1 }
 0x2b9   :  { %v1886_v14 = vmax.f32 %v1634_v6, 0.0  ;;  %v1655_v2 = vadd.f32 %v2355_v33, %v3096_v63 }
 0x2ba   :  { %v1646_v34 = vpop.f32.mrf.mxu1 }
 0x2bb   :  { %v1647_v5 = vadd.f32 %v3096_v63, %v1646_v34  ;;  %v1950_v21 = vmax.f32 %v1886_v14, %v1888_v17  ;;  %v1891_v24 = vmax.f32 %v1655_v2, 0.0 }
 0x2bc   :  { %v2356_v35 = vpop.f32.mrf.mxu1 }
 0x2bd   :  { %v1889_v13 = vmax.f32 %v1647_v5, 0.0  ;;  %v1658_v22 = vadd.f32 %v2356_v35, %v3096_v63 }
 0x2be   :  { %v1649_v36 = vpop.f32.mrf.mxu1 }
 0x2bf   :  { %v1650_v9 = vadd.f32 %v3096_v63, %v1649_v36  ;;  %v1951_v20 = vmax.f32 %v1949_v15, %v1889_v13  ;;  %v1892_v30 = vmax.f32 %v1658_v22, 0.0 }
 0x2c0   :  { %v2359_v31 = vpop.f32.mrf.mxu1 }
 0x2c1   :  { %v1890_v18 = vmax.f32 %v1650_v9, 0.0  ;;  %v1671_v27 = vadd.f32 %v2359_v31, %v3096_v63  ;;  %v1953_v28 = vmax.f32 %v1951_v20, %v1891_v24 }
 0x2c2   :  { %v1662_v56 = vpop.f32.mrf.mxu1 }
 0x2c3   :  { %v1663_v16 = vadd.f32 %v3096_v63, %v1662_v56  ;;  %v1952_v25 = vmax.f32 %v1950_v21, %v1890_v18 }
 0x2c4   :  { %v2360_v37 = vpop.f32.mrf.mxu1 }
 0x2c5   :  { %v1893_v11 = vmax.f32 %v1663_v16, 0.0  ;;  %v1674_v36 = vadd.f32 %v2360_v37, %v3096_v63  ;;  %v1954_v35 = vmax.f32 %v1952_v25, %v1892_v30 }
 0x2c6   :  { %v1665_v38 = vpop.f32.mrf.mxu1 }
 0x2c7   :  { %v1666_v23 = vadd.f32 %v3096_v63, %v1665_v38  ;;  %v1955_v34 = vmax.f32 %v1953_v28, %v1893_v11  ;;  %v1895_v38 = vmax.f32 %v1671_v27, 0.0  ;;  %v1896_v7 = vmax.f32 %v1674_v36, 0.0 }
 0x2c8   :  { %v3051_v39 = vpop.f32.mrf.mxu1 }
 0x2c9   :  { %v1894_v32 = vmax.f32 %v1666_v23, 0.0  ;;  %v1687_v31 = vadd.f32 %v3051_v39, %v3096_v63  ;;  %v1957_v6 = vmax.f32 %v1955_v34, %v1895_v38 }
 0x2ca   :  { %v1678_v40 = vpop.f32.mrf.mxu1 }
 0x2cb   :  { %v1679_v29 = vadd.f32 %v3096_v63, %v1678_v40  ;;  %v1956_v4 = vmax.f32 %v1954_v35, %v1894_v32  ;;  %v1899_v14 = vmax.f32 %v1687_v31, 0.0 }
 0x2cc   :  { %v3053_v41 = vpop.f32.mrf.mxu1 }
 0x2cd   :  { %v1897_v1 = vmax.f32 %v1679_v29, 0.0  ;;  %v1690_v37 = vadd.f32 %v3053_v41, %v3096_v63  ;;  %v1958_v12 = vmax.f32 %v1956_v4, %v1896_v7 }
 0x2ce   :  { %v1681_v42 = vpop.f32.mrf.mxu1 }
 0x2cf   :  { %v1682_v56 = vadd.f32 %v3096_v63, %v1681_v42  ;;  %v1959_v9 = vmax.f32 %v1957_v6, %v1897_v1  ;;  %v1900_v17 = vmax.f32 %v1690_v37, 0.0 }
 0x2d0   :  { %v3055_v43 = vpop.f32.mrf.mxu1 }
 0x2d1   :  { %v1898_v8 = vmax.f32 %v1682_v56, 0.0  ;;  %v1703_v39 = vadd.f32 %v3055_v43, %v3096_v63  ;;  %v1961_v16 = vmax.f32 %v1959_v9, %v1899_v14 }
 0x2d2   :  { %v3057_v44 = vpop.f32.mrf.mxu1 }
 0x2d3   :  { %v1695_v40 = vadd.f32 %v3096_v63, %v3057_v44  ;;  %v1960_v2 = vmax.f32 %v1958_v12, %v1898_v8  ;;  %v1903_v24 = vmax.f32 %v1703_v39, 0.0 }
 0x2d4   :  { %v3059_v45 = vpop.f32.mrf.mxu1 }
 0x2d5   :  { %v1901_v15 = vmax.f32 %v1695_v40, 0.0  ;;  %v1962_v21 = vmax.f32 %v1960_v2, %v1900_v17 }
 0x2d6   :  { %v3061_v46 = vpop.f32.mrf.mxu1 }
 0x2d7   :  { %v1698_v42 = vadd.f32 %v3096_v63, %v3061_v46  ;;  %v1963_v41 = vmax.f32 %v1961_v16, %v1901_v15  ;;  %v1706_v46 = vadd.f32 %v3059_v45, %v3096_v63 }
 0x2d8   :  { %v3063_v47 = vpop.f32.mrf.mxu1 }
 0x2d9   :  { %v1902_v18 = vmax.f32 %v1698_v42, 0.0  ;;  %v1965_v25 = vmax.f32 %v1963_v41, %v1903_v24  ;;  %v1904_v28 = vmax.f32 %v1706_v46, 0.0 }
 0x2da   :  { %v3065_v48 = vpop.f32.mrf.mxu1 }
 0x2db   :  { %v1711_v44 = vadd.f32 %v3096_v63, %v3065_v48  ;;  %v1964_v11 = vmax.f32 %v1962_v21, %v1902_v18  ;;  %v1719_v48 = vadd.f32 %v3063_v47, %v3096_v63 }
 0x2dc   :  { %v3067_v49 = vpop.f32.mrf.mxu1 }
 0x2dd   :  { %v1905_v43 = vmax.f32 %v1711_v44, 0.0  ;;  %v1966_v32 = vmax.f32 %v1964_v11, %v1904_v28  ;;  %v1907_v36 = vmax.f32 %v1719_v48, 0.0 }
 0x2de   :  { %v3069_v50 = vpop.f32.mrf.mxu1 }
 0x2df   :  { %v1714_v22 = vadd.f32 %v3096_v63, %v3069_v50  ;;  %v1967_v45 = vmax.f32 %v1965_v25, %v1905_v43  ;;  %v1722_v50 = vadd.f32 %v3067_v49, %v3096_v63 }
 0x2e1   :  { %v1906_v29 = vmax.f32 %v1714_v22, 0.0  ;;  %v1969_v38 = vmax.f32 %v1967_v45, %v1907_v36  ;;  %v1908_v4 = vmax.f32 %v1722_v50, 0.0 }
 0x2e3   :  { %v1968_v56 = vmax.f32 %v1966_v32, %v1906_v29 }
 0x2e5   :  { %v1970_v40 = vmax.f32 %v1968_v56, %v1908_v4 }
 0x2e6   :  { %v3071_v51 = vpop.f32.mrf.mxu1 }
 0x2e8   :  { %v3073_v52 = vpop.f32.mrf.mxu1 }
 0x2e9   :  { %v1727_v27 = vadd.f32 %v3096_v63, %v3073_v52  ;;  %v1735_v52 = vadd.f32 %v3071_v51, %v3096_v63 }
 0x2ea   :  { %v3075_v53 = vpop.f32.mrf.mxu1 }
 0x2eb   :  { %v1909_v35 = vmax.f32 %v1727_v27, 0.0  ;;  %v1738_v49 = vadd.f32 %v3075_v53, %v3096_v63  ;;  %v1911_v8 = vmax.f32 %v1735_v52, 0.0 }
 0x2ec   :  { %v3077_v54 = vpop.f32.mrf.mxu1 }
 0x2ed   :  { %v1730_v34 = vadd.f32 %v3096_v63, %v3077_v54  ;;  %v1971_v6 = vmax.f32 %v1969_v38, %v1909_v35  ;;  %v1912_v14 = vmax.f32 %v1738_v49, 0.0 }
 0x2ef   :  { %v1910_v31 = vmax.f32 %v1730_v34, 0.0 }
 0x2f1   :  { %v1972_v37 = vmax.f32 %v1970_v40, %v1910_v31 }
 0x2f6   :  { %v3079_v55 = vpop.f32.mrf.mxu1 }
 0x2f7   :  { %v1751_v51 = vadd.f32 %v3079_v55, %v3096_v63 }
 0x2f8   :  { %v3081_v57 = vpop.f32.mrf.mxu1 }
 0x2f9   :  { %v1743_v1 = vadd.f32 %v3096_v63, %v3081_v57  ;;  %v1973_v57 = vmax.f32 %v1971_v6, %v1911_v8  ;;  %v1915_v44 = vmax.f32 %v1751_v51, 0.0 }
 0x2fa   :  { %v3083_v58 = vpop.f32.mrf.mxu1 }
 0x2fb   :  { %v1913_v9 = vmax.f32 %v1743_v1, 0.0  ;;  %v1754_v2 = vadd.f32 %v3083_v58, %v3096_v63 }
 0x2fc   :  { %v3085_v59 = vpop.f32.mrf.mxu1 }
 0x2fd   :  { %v1746_v54 = vadd.f32 %v3096_v63, %v3085_v59  ;;  %v1975_v53 = vmax.f32 %v1973_v57, %v1913_v9  ;;  %v1974_v59 = vmax.f32 %v1972_v37, %v1912_v14  ;;  %v1916_v46 = vmax.f32 %v1754_v2, 0.0 }
 0x2ff   :  { %v1914_v15 = vmax.f32 %v1746_v54, 0.0  ;;  %v1977_v41 = vmax.f32 %v1975_v53, %v1915_v44 }
 0x301   :  { %v1976_v18 = vmax.f32 %v1974_v59, %v1914_v15 }
 0x303   :  { %v1978_v43 = vmax.f32 %v1976_v18, %v1916_v46 }
 0x306   :  { %v3087_v60 = vpop.f32.mrf.mxu1 }
 0x307   :  { %v1767_v55 = vadd.f32 %v3087_v60, %v3096_v63 }
 0x308   :  { %v3089_v61 = vpop.f32.mrf.mxu1 }
 0x309   :  { %v1759_v42 = vadd.f32 %v3096_v63, %v3089_v61  ;;  %v1919_v11 = vmax.f32 %v1767_v55, 0.0 }
 0x30a   :  { %v3091_v62 = vpop.f32.mrf.mxu1 }
 0x30b   :  { %v1917_v17 = vmax.f32 %v1759_v42, 0.0  ;;  %v1770_v58 = vadd.f32 %v3091_v62, %v3096_v63 }
 0x30c   :  { %v3098_v0 = vpop.f32.mrf.mxu1 }
 0x30d   :  { %v1762_v39 = vadd.f32 %v3096_v63, %v3098_v0  ;;  %v1979_v24 = vmax.f32 %v1977_v41, %v1917_v17  ;;  %v1920_v29 = vmax.f32 %v1770_v58, 0.0 }
 0x30f   :  { %v1918_v21 = vmax.f32 %v1762_v39, 0.0  ;;  %v1981_v28 = vmax.f32 %v1979_v24, %v1919_v11 }
 0x311   :  { %v1980_v25 = vmax.f32 %v1978_v43, %v1918_v21 }
 0x313   :  { %v1982_v34 = vmax.f32 %v1980_v25, %v1920_v29 }
 0x316   :  { %v3101_v3 = vpop.f32.mrf.mxu1 }
 0x317   :  { %v1783_v60 = vadd.f32 %v3101_v3, %v3096_v63 }
 0x318   :  { %v3108_v10 = vpop.f32.mrf.mxu1 }
 0x319   :  { %v1775_v61 = vadd.f32 %v3096_v63, %v3108_v10  ;;  %v1923_v36 = vmax.f32 %v1783_v60, 0.0 }
 0x31a   :  { %v3112_v19 = vpop.f32.mrf.mxu1 }
 0x31b   :  { %v1921_v48 = vmax.f32 %v1775_v61, 0.0  ;;  %v1786_v62 = vadd.f32 %v3112_v19, %v3096_v63 }
 0x31c   :  { %v3116_v26 = vpop.f32.mrf.mxu1 }
 0x31d   :  { %v1778_v0 = vadd.f32 %v3096_v63, %v3116_v26  ;;  %v1983_v32 = vmax.f32 %v1981_v28, %v1921_v48  ;;  %v1924_v1 = vmax.f32 %v1786_v62, 0.0 }
 0x31f   :  { %v1922_v45 = vmax.f32 %v1778_v0, 0.0  ;;  %v1985_v38 = vmax.f32 %v1983_v32, %v1923_v36 }
 0x321   :  { %v1984_v56 = vmax.f32 %v1982_v34, %v1922_v45 }
 0x323   :  { %v1986_v6 = vmax.f32 %v1984_v56, %v1924_v1 }
 0x326   :  { %v3120_v33 = vpop.f32.mrf.mxu1 }
 0x327   :  { %v1799_v3 = vadd.f32 %v3120_v33, %v3096_v63 }
 0x328   :  { %v3124_v5 = vpop.f32.mrf.mxu1 }
 0x329   :  { %v1791_v10 = vadd.f32 %v3096_v63, %v3124_v5  ;;  %v1927_v40 = vmax.f32 %v1799_v3, 0.0 }
 0x32a   :  { %v3134_v13 = vpop.f32.mrf.mxu1 }
 0x32b   :  { %v1925_v35 = vmax.f32 %v1791_v10, 0.0  ;;  %v1802_v19 = vadd.f32 %v3134_v13, %v3096_v63 }
 0x32c   :  { %v3140_v20 = vpop.f32.mrf.mxu1 }
 0x32d   :  { %v1794_v26 = vadd.f32 %v3096_v63, %v3140_v20  ;;  %v1987_v31 = vmax.f32 %v1985_v38, %v1925_v35 }
 0x32f   :  { %v1926_v4 = vmax.f32 %v1794_v26, 0.0  ;;  %v1989_v9 = vmax.f32 %v1987_v31, %v1927_v40 }
 0x331   :  { %v1988_v8 = vmax.f32 %v1986_v6, %v1926_v4 }
 0x336   :  { %v3146_v23 = vpop.f32.mrf.mxu1 }
 0x337   :  { %v1815_v33 = vadd.f32 %v3146_v23, %v3096_v63 }
 0x338   :  { %v3152_v30 = vpop.f32.mrf.mxu1 }
 0x339   :  { %v1807_v5 = vadd.f32 %v3096_v63, %v3152_v30  ;;  %v1928_v30 = vmax.f32 %v1802_v19, 0.0  ;;  %v1931_v53 = vmax.f32 %v1815_v33, 0.0 }
 0x33a   :  { %v3158_v47 = vpop.f32.mrf.mxu1 }
 0x33b   :  { %v1929_v54 = vmax.f32 %v1807_v5, 0.0  ;;  %v1818_v13 = vadd.f32 %v3158_v47, %v3096_v63  ;;  %v1990_v14 = vmax.f32 %v1988_v8, %v1928_v30 }
 0x33c   :  { %v1809_v7 = vpop.f32.mrf.mxu1 }
 0x33d   :  { %v1810_v20 = vadd.f32 %v3096_v63, %v1809_v7  ;;  %v1991_v42 = vmax.f32 %v1989_v9, %v1929_v54  ;;  %v1932_v17 = vmax.f32 %v1818_v13, 0.0 }
 0x33f   :  { %v1930_v51 = vmax.f32 %v1810_v20, 0.0  ;;  %v1993_v44 = vmax.f32 %v1991_v42, %v1931_v53 }
 0x341   :  { %v1992_v59 = vmax.f32 %v1990_v14, %v1930_v51 }
 0x343   :  { %v1994_v47 = vmax.f32 %v1992_v59, %v1932_v17 }
 0x346   :  { %v3168_v12 = vpop.f32.mrf.mxu1 }
 0x347   :  { %v1831_v23 = vadd.f32 %v3168_v12, %v3096_v63 }
 0x348   :  { %v1822_v16 = vpop.f32.mrf.mxu1 }
 0x349   :  { %v1823_v37 = vadd.f32 %v3096_v63, %v1822_v16  ;;  %v1935_v46 = vmax.f32 %v1831_v23, 0.0 }
 0x34a   :  { %v2400_v22 = vpop.f32.mrf.mxu1 }
 0x34b   :  { %v1933_v2 = vmax.f32 %v1823_v37, 0.0  ;;  %v1834_v41 = vadd.f32 %v2400_v22, %v3096_v63 }
 0x34c   :  { %v1825_v27 = vpop.f32.mrf.mxu1 }
 0x34d   :  { %v1826_v7 = vadd.f32 %v3096_v63, %v1825_v27  ;;  %v1995_v55 = vmax.f32 %v1993_v44, %v1933_v2  ;;  %v1936_v11 = vmax.f32 %v1834_v41, 0.0 }
 0x34f   :  { %v1934_v18 = vmax.f32 %v1826_v7, 0.0  ;;  %v1997_v0 = vmax.f32 %v1995_v55, %v1935_v46 }
 0x351   :  { %v1996_v58 = vmax.f32 %v1994_v47, %v1934_v18 }
 0x353   :  { %v1998_v60 = vmax.f32 %v1996_v58, %v1936_v11 }
 0x356   :  { %v2403_v50 = vpop.f32.mrf.mxu1 }
 0x357   :  { %v1847_v43 = vadd.f32 %v2403_v50, %v3096_v63 }
 0x358   :  { %v1838_v52 = vpop.f32.mrf.mxu1 }
 0x359   :  { %v1839_v16 = vadd.f32 %v3096_v63, %v1838_v52  ;;  %v1939_v28 = vmax.f32 %v1847_v43, 0.0 }
 0x35a   :  { %v2404_v49 = vpop.f32.mrf.mxu1 }
 0x35b   :  { %v1937_v21 = vmax.f32 %v1839_v16, 0.0  ;;  %v1850_v22 = vadd.f32 %v2404_v49, %v3096_v63 }
 0x35c   :  { %v1841_v57 = vpop.f32.mrf.mxu1 }
 0x35d   :  { %v1842_v24 = vadd.f32 %v3096_v63, %v1841_v57  ;;  %v1999_v25 = vmax.f32 %v1997_v0, %v1937_v21  ;;  %v1940_v50 = vmax.f32 %v1850_v22, 0.0 }
 0x35f   :  { %v1938_v27 = vmax.f32 %v1842_v24, 0.0  ;;  %v2001_v62 = vmax.f32 %v1999_v25, %v1939_v28 }
 0x361   :  { %v2000_v45 = vmax.f32 %v1998_v60, %v1938_v27 }
 0x363   :  { %v2002_v3 = vmax.f32 %v2000_v45, %v1940_v50 }
 0x366   :  { %v2407_v15 = vpop.f32.mrf.mxu1 }
 0x367   :  { %v1863_v32 = vadd.f32 %v2407_v15, %v3096_v63 }
 0x368   :  { %v1854_v39 = vpop.f32.mrf.mxu1 }
 0x369   :  { %v1855_v12 = vadd.f32 %v3096_v63, %v1854_v39  ;;  %v1943_v52 = vmax.f32 %v1863_v32, 0.0 }
 0x36a   :  { %v2408_v61 = vpop.f32.mrf.mxu1 }
 0x36b   :  { %v1941_v10 = vmax.f32 %v1855_v12, 0.0  ;;  %v1866_v35 = vadd.f32 %v2408_v61, %v3096_v63 }
 0x36c   :  { %v1857_v48 = vpop.f32.mrf.mxu1 }
 0x36d   :  { %v1858_v29 = vadd.f32 %v3096_v63, %v1857_v48  ;;  %v2003_v26 = vmax.f32 %v2001_v62, %v1941_v10  ;;  %v1944_v6 = vmax.f32 %v1866_v35, 0.0 }
 0x36f   :  { %v1942_v36 = vmax.f32 %v1858_v29, 0.0  ;;  %v2005_v19 = vmax.f32 %v2003_v26, %v1943_v52 }
 0x371   :  { %v2004_v4 = vmax.f32 %v2002_v3, %v1942_v36 }
 0x373   :  { %v2006_v37 = vmax.f32 %v2004_v4, %v1944_v6 }
 0x376   :  { %v2411_v34 = vpop.f32.mrf.mxu1 }
 0x377   :  { %v1879_v38 = vadd.f32 %v2411_v34, %v3096_v63 }
 0x378   :  { %v1870_v56 = vpop.f32.mrf.mxu1 }
 0x379   :  { %v1871_v5 = vadd.f32 %v3096_v63, %v1870_v56  ;;  %v1947_v49 = vmax.f32 %v1879_v38, 0.0 }
 0x37a   :  { %v2412_v1 = vpop.f32.mrf.mxu1 }
 0x37b   :  { %v1945_v31 = vmax.f32 %v1871_v5, 0.0  ;;  %v1882_v54 = vadd.f32 %v2412_v1, %v3096_v63 }
 0x37c   :  { %v1873_v20 = vpop.f32.mrf.mxu1 }
 0x37d   :  { %v2007_v40 = vmax.f32 %v2005_v19, %v1945_v31  ;;  %v1874_v8 = vadd.f32 %v3096_v63, %v1873_v20  ;;  %v1948_v30 = vmax.f32 %v1882_v54, 0.0 }
 0x37f   :  { %v2009_v33 = vmax.f32 %v2007_v40, %v1947_v49  ;;  %v1946_v9 = vmax.f32 %v1874_v8, 0.0 }
 0x381   :  { %2011 = vst [vmem:[%s3235_s7] sm:$0xff] %v2009_v33  ;;  %v2008_v51 = vmax.f32 %v2006_v37, %v1946_v9 }
 0x383   :  { %v2010_v57 = vmax.f32 %v2008_v51, %v1948_v30 }
 0x385   :  { %2012 = vst [vmem:[%s3235_s7 + $0x8] sm:$0xff] %v2010_v57 }

// kernel: neg.6
= control target key start
LH: loop header
LB: loop body
LE: loop exit
PB: predicated region body
PF: predicated region fallthrough
CT: control target
= control target key end

     0   :  { %s72_s0 = inlined_call_operand.vmem [shape: f32[2,64,16], index: 0, kind: input, shape index: {}]   ;;  %s73_s1 = inlined_call_operand.vmem [shape: f32[2,64,16], index: 1, kind: output, shape index: {}]  }
   0x1   :  { %v2_v0 = vld [vmem:[%s72_s0] sm:$0xff]  ;;  %v32_v1 = vld [vmem:[%s72_s0 + $0x10] sm:$0xff]  ;;  %v34_v2 = vld [vmem:[%s72_s0 + $0x8] sm:$0xff] }
   0x2   :  { %v5_v3 = vxor.u32 2147483648, %v2_v0  ;;  %v12_v4 = vxor.u32 2147483648, %v32_v1  ;;  %v20_v5 = vxor.u32 2147483648, %v34_v2  ;;  %v36_v6 = vld [vmem:[%s72_s0 + $0x18] sm:$0xff] }
   0x3   :  { %v28_v7 = vxor.u32 2147483648, %v36_v6 }
   0x4   :  { %7 = vst [vmem:[%s73_s1] sm:$0xff] %v5_v3  ;;  %33 = vst [vmem:[%s73_s1 + $0x10] sm:$0xff] %v12_v4 }
   0x5   :  { %35 = vst [vmem:[%s73_s1 + $0x8] sm:$0xff] %v20_v5  ;;  %37 = vst [vmem:[%s73_s1 + $0x18] sm:$0xff] %v28_v7 }

// kernel: pointnet2_backbone_forward.10
= control target key start
LH: loop header
LB: loop body
LE: loop exit
PB: predicated region body
PF: predicated region fallthrough
CT: control target
= control target key end

     0   :  { %v871_v1 = vmov 0   ;;  %s1132_s1 = inlined_call_operand.vmem [shape: bf16[384,256], index: 1, kind: input, shape index: {}]   ;;  %s1133_s0 = inlined_call_operand.vmem [shape: bf16[32,384], index: 0, kind: input, shape index: {}]   ;;  %s1134_s3 = inlined_call_operand.vmem [shape: bf16[256,128], index: 3, kind: input, shape index: {}]   ;;  %s1135_s2 = inlined_call_operand.vmem [shape: f32[1,256], index: 2, kind: input, shape index: {}]   ;;  %s1136_s4 = inlined_call_operand.vmem [shape: f32[1,128], index: 4, kind: input, shape index: {}]   ;;  %s1137_s5 = inlined_call_operand.vmem [shape: f32[32,128], index: 5, kind: output, shape index: {}]  }
   0x1   :  { %v775_v0 = vld [vmem:[%s1132_s1 + $0x74] ss:$8 sps:$4 sm:$0xff]   ;;  %446 = vmatprep.mubr.bf16.mxu1 %v871_v1  ;;  %v777_v2 = vld [vmem:[%s1132_s1 + $0x70] ss:$8 sps:$4 sm:$0xff]   ;;  %v778_v3 = vld [vmem:[%s1132_s1 + $0x64] ss:$8 sps:$4 sm:$0xff]  }
   0x2   :  { %361 = vmatprep.subr.bf16.mxu0 %v775_v0  ;;  %v780_v4 = vld [vmem:[%s1132_s1 + $0x60] ss:$8 sps:$4 sm:$0xff]   ;;  %v781_v5 = vld [vmem:[%s1132_s1 + $0x54] ss:$8 sps:$4 sm:$0xff]   ;;  %v783_v6 = vld [vmem:[%s1132_s1 + $0x50] ss:$8 sps:$4 sm:$0xff]  }
   0x3   :  { %362 = vmatpush1.bf16.msra.mxu0 %v777_v2  ;;  %v784_v7 = vld [vmem:[%s1132_s1 + $0x44] ss:$8 sps:$4 sm:$0xff]   ;;  %v786_v8 = vld [vmem:[%s1132_s1 + $0x40] ss:$8 sps:$4 sm:$0xff]   ;;  %v798_v9 = vld [vmem:[%s1132_s1 + $0x174] ss:$8 sps:$4 sm:$0xff]  }
   0x4   :  { %363 = vmatprep.subr.bf16.mxu0 %v778_v3  ;;  %v801_v10 = vld [vmem:[%s1132_s1 + $0x170] ss:$8 sps:$4 sm:$0xff]   ;;  %v787_v11 = vld [vmem:[%s1132_s1 + $0x34] ss:$8 sps:$4 sm:$0xff]   ;;  %414 = vmatprep.subr.bf16.mxu1 %v798_v9  ;;  %v804_v12 = vld [vmem:[%s1132_s1 + $0x164] ss:$8 sps:$4 sm:$0xff]  }
   0x5   :  { %415 = vmatpush1.bf16.msra.mxu1 %v801_v10  ;;  %v807_v13 = vld [vmem:[%s1132_s1 + $0x160] ss:$8 sps:$4 sm:$0xff]   ;;  %v789_v14 = vld [vmem:[%s1132_s1 + $0x30] ss:$8 sps:$4 sm:$0xff]   ;;  %v790_v15 = vld [vmem:[%s1132_s1 + $0x24] ss:$8 sps:$4 sm:$0xff]  }
   0x6   :  { %416 = vmatprep.subr.bf16.mxu1 %v804_v12  ;;  %v810_v16 = vld [vmem:[%s1132_s1 + $0x154] ss:$8 sps:$4 sm:$0xff]   ;;  %v813_v17 = vld [vmem:[%s1132_s1 + $0x150] ss:$8 sps:$4 sm:$0xff]   ;;  %v792_v18 = vld [vmem:[%s1132_s1 + $0x20] ss:$8 sps:$4 sm:$0xff]  }
   0x7   :  { %364 = vmatpush1.bf16.msra.mxu0 %v780_v4  ;;  %v816_v19 = vld [vmem:[%s1132_s1 + $0x144] ss:$8 sps:$4 sm:$0xff]   ;;  %v793_v20 = vld [vmem:[%s1132_s1 + $0x14] ss:$8 sps:$4 sm:$0xff]   ;;  %v795_v21 = vld [vmem:[%s1132_s1 + $0x10] ss:$8 sps:$4 sm:$0xff]  }
   0x8   :  { %365 = vmatprep.subr.bf16.mxu0 %v781_v5  ;;  %v819_v22 = vld [vmem:[%s1132_s1 + $0x140] ss:$8 sps:$4 sm:$0xff]   ;;  %v822_v23 = vld [vmem:[%s1132_s1 + $0x134] ss:$8 sps:$4 sm:$0xff]   ;;  %v796_v24 = vld [vmem:[%s1132_s1 + $0x4] ss:$8 sps:$4 sm:$0xff]  }
   0x9   :  { %417 = vmatpush1.bf16.msra.mxu1 %v807_v13  ;;  %v825_v25 = vld [vmem:[%s1132_s1 + $0x130] ss:$8 sps:$4 sm:$0xff]   ;;  %v800_v26 = vld [vmem:[%s1132_s1] ss:$8 sps:$4 sm:$0xff]   ;;  %v828_v27 = vld [vmem:[%s1132_s1 + $0x124] ss:$8 sps:$4 sm:$0xff]  }
   0xa   :  { %418 = vmatprep.subr.bf16.mxu1 %v810_v16  ;;  %v802_v28 = vld [vmem:[%s1132_s1 + $0xf4] ss:$8 sps:$4 sm:$0xff]   ;;  %v806_v29 = vld [vmem:[%s1132_s1 + $0xf0] ss:$8 sps:$4 sm:$0xff]   ;;  %v831_v30 = vld [vmem:[%s1132_s1 + $0x120] ss:$8 sps:$4 sm:$0xff]  }
   0xb   :  { %366 = vmatpush1.bf16.msra.mxu0 %v783_v6  ;;  %v834_v31 = vld [vmem:[%s1132_s1 + $0x114] ss:$8 sps:$4 sm:$0xff]   ;;  %v808_v32 = vld [vmem:[%s1132_s1 + $0xe4] ss:$8 sps:$4 sm:$0xff]   ;;  %v812_v33 = vld [vmem:[%s1132_s1 + $0xe0] ss:$8 sps:$4 sm:$0xff]  }
   0xc   :  { %367 = vmatprep.subr.bf16.mxu0 %v784_v7  ;;  %v837_v34 = vld [vmem:[%s1132_s1 + $0x110] ss:$8 sps:$4 sm:$0xff]   ;;  %v840_v36 = vld [vmem:[%s1132_s1 + $0x104] ss:$8 sps:$4 sm:$0xff]   ;;  %v814_v37 = vld [vmem:[%s1132_s1 + $0xd4] ss:$8 sps:$4 sm:$0xff]  }
   0xd   :  { %419 = vmatpush1.bf16.msra.mxu1 %v813_v17  ;;  %v850_v35 = vld [vmem:[%s1133_s0 + $0x4] ss:$12 sps:$4 sm:$0xff]   ;;  %v843_v40 = vld [vmem:[%s1132_s1 + $0x100] ss:$8 sps:$4 sm:$0xff]   ;;  %v855_v41 = vld [vmem:[%s1134_s3 + $0x78] sm:$0xff]  }
   0xe   :  { %420 = vmatprep.subr.bf16.mxu1 %v816_v19  ;;  %393 = vmatprep.mubr.bf16.mxu0 %v850_v35  ;;  %v818_v38 = vld [vmem:[%s1132_s1 + $0xd0] ss:$8 sps:$4 sm:$0xff]   ;;  %v820_v39 = vld [vmem:[%s1132_s1 + $0xc4] ss:$8 sps:$4 sm:$0xff]   ;;  %v846_v42 = vld [vmem:[%s1133_s0 + $0x8] ss:$12 sps:$4 sm:$0xff]  }
   0xf   :  { %368 = vmatpush1.bf16.msra.mxu0 %v786_v8  ;;  %v824_v43 = vld [vmem:[%s1132_s1 + $0xc0] ss:$8 sps:$4 sm:$0xff]   ;;  %v856_v44 = vld [vmem:[%s1134_s3 + $0x38] sm:$0xff]   ;;  %v857_v46 = vld [vmem:[%s1134_s3 + $0x70] sm:$0xff]   ;;  %v79_v8 = vlaneseq }
  0x10   :  { %369 = vmatprep.subr.bf16.mxu0 %v787_v11  ;;  %v826_v45 = vld [vmem:[%s1132_s1 + $0xb4] ss:$8 sps:$4 sm:$0xff]   ;;  %v830_v48 = vld [vmem:[%s1132_s1 + $0xb0] ss:$8 sps:$4 sm:$0xff]   ;;  %v859_v49 = vld [vmem:[%s1134_s3 + $0x68] sm:$0xff]  }
  0x11   :  { %421 = vmatpush1.bf16.msra.mxu1 %v819_v22  ;;  %v858_v47 = vld [vmem:[%s1134_s3 + $0x30] sm:$0xff]   ;;  %v832_v50 = vld [vmem:[%s1132_s1 + $0xa4] ss:$8 sps:$4 sm:$0xff]   ;;  %v836_v53 = vld [vmem:[%s1132_s1 + $0xa0] ss:$8 sps:$4 sm:$0xff]   ;;  %v80_v10 = vshrl.u32 %v79_v8, 7 }
  0x12   :  { %422 = vmatprep.subr.bf16.mxu1 %v822_v23  ;;  %v851_v51 = vld [vmem:[%s1133_s0 + $0x20] ss:$12 sps:$4 sm:$0xff]   ;;  %v838_v54 = vld [vmem:[%s1132_s1 + $0x94] ss:$8 sps:$4 sm:$0xff]   ;;  %v842_v55 = vld [vmem:[%s1132_s1 + $0x90] ss:$8 sps:$4 sm:$0xff]  }
  0x13   :  { %370 = vmatpush1.bf16.msra.mxu0 %v789_v14  ;;  %v860_v52 = vld [vmem:[%s1134_s3 + $0x28] sm:$0xff]   ;;  %v854_v60 = vld [vmem:[%s1133_s0 + $0x18] ss:$12 sps:$4 sm:$0xff]   ;;  %v866_v2 = vld [vmem:[%s1134_s3 + $0x10] sm:$0xff]   ;;  %v85_v11 = vsub.s32 1, %v80_v10  ;;  %v81_v12 = vsub.s32 0, %v80_v10 }
  0x14   :  { %371 = vmatprep.subr.bf16.mxu0 %v790_v15  ;;  %v844_v56 = vld [vmem:[%s1132_s1 + $0x84] ss:$8 sps:$4 sm:$0xff]   ;;  %v847_v57 = vld [vmem:[%s1132_s1 + $0x80] ss:$8 sps:$4 sm:$0xff]   ;;  %v863_v63 = vld [vmem:[%s1134_s3 + $0x58] sm:$0xff]  }
  0x15   :  { %423 = vmatpush1.bf16.msra.mxu1 %v825_v25  ;;  %v848_v58 = vld [vmem:[%s1133_s0] ss:$12 sps:$4 sm:$0xff]   ;;  %v852_v59 = vld [vmem:[%s1133_s0 + $0x1c] ss:$12 sps:$4 sm:$0xff]  }
  0x16   :  { %424 = vmatprep.subr.bf16.mxu1 %v828_v27  ;;  %v861_v61 = vld [vmem:[%s1134_s3 + $0x60] sm:$0xff]   ;;  %v864_v0 = vld [vmem:[%s1134_s3 + $0x18] sm:$0xff]   ;;  %v867_v3 = vld [vmem:[%s1134_s3 + $0x48] sm:$0xff]  }
  0x17   :  { %372 = vmatpush1.bf16.msra.mxu0 %v792_v18  ;;  %v862_v62 = vld [vmem:[%s1134_s3 + $0x20] sm:$0xff]   ;;  %v868_v4 = vld [vmem:[%s1134_s3 + $0x8] sm:$0xff]  }
  0x18   :  { %373 = vmatprep.subr.bf16.mxu0 %v793_v20  ;;  %v869_v5 = vld [vmem:[%s1134_s3 + $0x40] sm:$0xff]  }
  0x19   :  { %425 = vmatpush1.bf16.msra.mxu1 %v831_v30  ;;  %v870_v6 = vld [vmem:[%s1134_s3] sm:$0xff]  }
  0x1a   :  { %426 = vmatprep.subr.bf16.mxu1 %v834_v31  ;;  %v77_v14 = vld [vmem:[%s1135_s2] sm:$0x3] }
  0x1b   :  { %374 = vmatpush1.bf16.msra.mxu0 %v795_v21  ;;  %v86_v15 = vrot.slane %v77_v14, %v85_v11  ;;  %v82_v16 = vrot.slane %v77_v14, %v81_v12 }
  0x1c   :  { %375 = vmatprep.subr.bf16.mxu0 %v796_v24 }
  0x1d   :  { %427 = vmatpush1.bf16.msra.mxu1 %v837_v34 }
  0x1e   :  { %428 = vmatprep.subr.bf16.mxu1 %v840_v36 }
  0x1f   :  { %376 = vmatpush1.bf16.msra.mxu0 %v800_v26 }
  0x20   :  { %377 = vmatprep.subr.bf16.mxu0 %v802_v28 }
  0x21   :  { %429 = vmatpush1.bf16.msra.mxu1 %v843_v40 }
  0x22   :  { %746 = vmatprep.subr.bf16.mxu1 %v855_v41 }
  0x23   :  { %378 = vmatpush2.bf16.msra.mxu0 %v806_v29 }
  0x24   :  { %379 = vmatprep.subr.bf16.mxu0 %v808_v32  ;;  %447 = vmatmul.mubr.bf16.vlgmr.msra.gmra.mxu1 %v846_v42 }
  0x25   :  { %456 = vmatprep.mubr.bf16.mxu1 %v871_v1  ;;  %747 = vmatpush3.bf16.msra.mxu1 %v856_v44  ;;  %v865_v1 = vld [vmem:[%s1134_s3 + $0x50] sm:$0xff]  }
  0x26   :  { %748 = vmatprep.subr.bf16.mxu1 %v857_v46 }
  0x27   :  { %380 = vmatpush2.bf16.msra.mxu0 %v812_v33 }
  0x28   :  { %381 = vmatprep.subr.bf16.mxu0 %v814_v37 }
  0x29   :  { %749 = vmatpush3.bf16.msra.mxu1 %v858_v47 }
  0x2a   :  { %750 = vmatprep.subr.bf16.mxu1 %v859_v49 }
  0x2b   :  { %382 = vmatpush2.bf16.msra.mxu0 %v818_v38 }
  0x2c   :  { %383 = vmatprep.subr.bf16.mxu0 %v820_v39  ;;  %457 = vmatmul.mubr.bf16.gmra.mxu1 %v851_v51 }
  0x2d   :  { %751 = vmatpush3.bf16.msra.mxu1 %v860_v52 }
  0x2e   :  { %752 = vmatprep.subr.bf16.mxu1 %v861_v61 }
  0x2f   :  { %384 = vmatpush2.bf16.msra.mxu0 %v824_v43 }
  0x30   :  { %385 = vmatprep.subr.bf16.mxu0 %v826_v45 }
  0x31   :  { %753 = vmatpush3.bf16.msra.mxu1 %v862_v62 }
  0x32   :  { %754 = vmatprep.subr.bf16.mxu1 %v863_v63 }
  0x33   :  { %386 = vmatpush2.bf16.msra.mxu0 %v830_v48 }
  0x34   :  { %387 = vmatprep.subr.bf16.mxu0 %v832_v50 }
  0x35   :  { %755 = vmatpush3.bf16.msra.mxu1 %v864_v0 }
  0x36   :  { %756 = vmatprep.subr.bf16.mxu1 %v865_v1 }
  0x37   :  { %388 = vmatpush2.bf16.msra.mxu0 %v836_v53 }
  0x38   :  { %389 = vmatprep.subr.bf16.mxu0 %v838_v54 }
  0x39   :  { %757 = vmatpush3.bf16.msra.mxu1 %v866_v2 }
  0x3a   :  { %758 = vmatprep.subr.bf16.mxu1 %v867_v3 }
  0x3b   :  { %390 = vmatpush2.bf16.msra.mxu0 %v842_v55 }
  0x3c   :  { %391 = vmatprep.subr.bf16.mxu0 %v844_v56 }
  0x3d   :  { %759 = vmatpush3.bf16.msra.mxu1 %v868_v4 }
  0x3e   :  { %760 = vmatprep.subr.bf16.mxu1 %v869_v5 }
  0x3f   :  { %392 = vmatpush2.bf16.msra.mxu0 %v847_v57 }
  0x41   :  { %761 = vmatpush3.bf16.msra.mxu1 %v870_v6 }
  0x42   :  { %394 = vmatmul.mubr.bf16.vlgmr.msra.gmra.mxu0 %v848_v58 }
  0x43   :  { %403 = vmatprep.mubr.bf16.mxu0 %v852_v59  ;;  %v729_v59 = vld [vmem:[%s1136_s4] ss:$0 sm:$0xff] }
  0x4a   :  { %404 = vmatmul.mubr.bf16.gmra.mxu0 %v854_v60 }
  0xe4   :  { %v448_v7 = vpop.f32.mrf.mxu1 }
  0xe6   :  { %v450_v9 = vpop.f32.mrf.mxu1 }
  0xe8   :  { %v452_v13 = vpop.f32.mrf.mxu1 }
  0xea   :  { %v454_v18 = vpop.f32.mrf.mxu1 }
  0xec   :  { %v458_v23 = vpop.f32.mrf.mxu1 }
  0xee   :  { %v460_v30 = vpop.f32.mrf.mxu1 }
  0xf0   :  { %v462_v40 = vpop.f32.mrf.mxu1 }
  0xf2   :  { %v464_v50 = vpop.f32.mrf.mxu1 }
 0x102   :  { %v395_v17 = vpop.f32.mrf.mxu0 }
 0x103   :  { %v396_v21 = vadd.f32 %v395_v17, %v82_v16 }
 0x104   :  { %v397_v19 = vpop.f32.mrf.mxu0 }
 0x105   :  { %v398_v20 = vadd.f32 %v397_v19, %v86_v15  ;;  %v449_v29 = vadd.f32 %v448_v7, %v396_v21 }
 0x106   :  { %v399_v22 = vpop.f32.mrf.mxu0 }
 0x107   :  { %v400_v24 = vadd.f32 %v399_v22, %v82_v16  ;;  %v451_v26 = vadd.f32 %v450_v9, %v398_v20  ;;  %v467_v38 = vmax.f32 %v449_v29, 0.0 }
 0x108   :  { %v401_v25 = vpop.f32.mrf.mxu0 }
 0x109   :  { %v453_v27 = vadd.f32 %v452_v13, %v400_v24  ;;  %v402_v28 = vadd.f32 %v401_v25, %v86_v15  ;;  %v468_v35 = vmax.f32 %v451_v26, 0.0 }
 0x10a   :  { %v405_v31 = vpop.f32.mrf.mxu0 }
 0x10b   :  { %v455_v32 = vadd.f32 %v454_v18, %v402_v28  ;;  %v469_v33 = vmax.f32 %v453_v27, 0.0  ;;  %v406_v39 = vadd.f32 %v405_v31, %v82_v16 }
 0x10c   :  { %v407_v34 = vpop.f32.mrf.mxu0 }
 0x10d   :  { %v470_v36 = vmax.f32 %v455_v32, 0.0  ;;  %v408_v37 = vadd.f32 %v407_v34, %v86_v15  ;;  %v475_v44 = vpack.c.bf16 %v469_v33, %v467_v38  ;;  %v459_v49 = vadd.f32 %v458_v23, %v406_v39 }
 0x10e   :  { %v409_v41 = vpop.f32.mrf.mxu0 }
 0x10f   :  { %v410_v42 = vadd.f32 %v409_v41, %v82_v16  ;;  %v476_v43 = vpack.c.bf16 %v470_v36, %v468_v35  ;;  %v461_v46 = vadd.f32 %v460_v30, %v408_v37  ;;  %v471_v55 = vmax.f32 %v459_v49, 0.0 }
 0x110   :  { %v411_v45 = vpop.f32.mrf.mxu0 }
 0x111   :  { %v463_v47 = vadd.f32 %v462_v40, %v410_v42  ;;  %v412_v48 = vadd.f32 %v411_v45, %v86_v15  ;;  %646 = vmatprep.mubr.bf16.mxu1 %v476_v43  ;;  %v472_v53 = vmax.f32 %v461_v46, 0.0 }
 0x112   :  { %647 = vmatmul.mubr.bf16.vlgmr.msra.gmra.mxu1 %v475_v44 }
 0x113   :  { %v465_v51 = vadd.f32 %v464_v50, %v412_v48  ;;  %v473_v52 = vmax.f32 %v463_v47, 0.0 }
 0x115   :  { %v474_v54 = vmax.f32 %v465_v51, 0.0  ;;  %v477_v57 = vpack.c.bf16 %v473_v52, %v471_v55 }
 0x117   :  { %v478_v56 = vpack.c.bf16 %v474_v54, %v472_v53 }
 0x119   :  { %654 = vmatprep.mubr.bf16.mxu1 %v478_v56 }
 0x11a   :  { %655 = vmatmul.mubr.bf16.gmra.mxu1 %v477_v57 }
 0x1d2   :  { %v762_v58 = vpop.f32.mrf.mxu1 }
 0x1d4   :  { %v763_v60 = vpop.f32.mrf.mxu1 }
 0x1d5   :  { %v764_v61 = vadd.f32 %v763_v60, %v762_v58 }
 0x1d6   :  { %v765_v62 = vpop.f32.mrf.mxu1 }
 0x1d7   :  { %v649_v63 = vadd.f32 %v764_v61, %v729_v59 }
 0x1d8   :  { %v766_v0 = vpop.f32.mrf.mxu1 }
 0x1d9   :  { %v663_v1 = vmax.f32 %v649_v63, 0.0  ;;  %v767_v2 = vadd.f32 %v766_v0, %v765_v62 }
 0x1da   :  { %v768_v3 = vpop.f32.mrf.mxu1 }
 0x1db   :  { %667 = vst [vmem:[%s1137_s5] sm:$0xff] %v663_v1  ;;  %v652_v4 = vadd.f32 %v767_v2, %v729_v59 }
 0x1dc   :  { %v769_v5 = vpop.f32.mrf.mxu1 }
 0x1dd   :  { %v664_v6 = vmax.f32 %v652_v4, 0.0  ;;  %v770_v7 = vadd.f32 %v769_v5, %v768_v3 }
 0x1de   :  { %v771_v8 = vpop.f32.mrf.mxu1 }
 0x1df   :  { %668 = vst [vmem:[%s1137_s5 + $0x8] sm:$0xff] %v664_v6  ;;  %v657_v9 = vadd.f32 %v770_v7, %v729_v59 }
 0x1e0   :  { %v772_v10 = vpop.f32.mrf.mxu1 }
 0x1e1   :  { %v665_v11 = vmax.f32 %v657_v9, 0.0  ;;  %v773_v12 = vadd.f32 %v772_v10, %v771_v8 }
 0x1e3   :  { %669 = vst [vmem:[%s1137_s5 + $0x10] sm:$0xff] %v665_v11  ;;  %v660_v13 = vadd.f32 %v773_v12, %v729_v59 }
 0x1e5   :  { %v666_v14 = vmax.f32 %v660_v13, 0.0 }
 0x1e7   :  { %670 = vst [vmem:[%s1137_s5 + $0x18] sm:$0xff] %v666_v14 }

// kernel: pointnet2_backbone_forward.11
= control target key start
LH: loop header
LB: loop body
LE: loop exit
PB: predicated region body
PF: predicated region fallthrough
CT: control target
= control target key end

     0   :  { %s1119_s0 = inlined_call_operand.vmem [shape: bf16[128,128], index: 0, kind: input, shape index: {}]   ;;  %s1120_s1 = inlined_call_operand.vmem [shape: bf16[128,128], index: 1, kind: input, shape index: {}]   ;;  %s1121_s2 = inlined_call_operand.vmem [shape: f32[1,128], index: 2, kind: input, shape index: {}]   ;;  %s1122_s3 = inlined_call_operand.vmem [shape: bf16[128,128], index: 3, kind: input, shape index: {}]   ;;  %s1123_s4 = inlined_call_operand.vmem [shape: f32[1,128], index: 4, kind: input, shape index: {}]   ;;  %s1124_s5 = inlined_call_operand.vmem [shape: bf16[128,128], index: 5, kind: input, shape index: {}]   ;;  %s1125_s6 = inlined_call_operand.vmem [shape: f32[1,128], index: 6, kind: input, shape index: {}]   ;;  %s1126_s7 = inlined_call_operand.hbm [shape: f32[128,128], index: 7, kind: output, shape index: {}]  }
   0x1   :  { %v890_v0 = vld [vmem:[%s1120_s1 + $0x38] sm:$0xff]   ;;  %v891_v1 = vld [vmem:[%s1120_s1 + $0x30] sm:$0xff]   ;;  %v892_v2 = vld [vmem:[%s1120_s1 + $0x28] sm:$0xff]  }
   0x2   :  { %775 = vmatprep.subr.bf16.mxu0 %v890_v0  ;;  %v893_v3 = vld [vmem:[%s1120_s1 + $0x20] sm:$0xff]   ;;  %v894_v5 = vld [vmem:[%s1120_s1 + $0x18] sm:$0xff]   ;;  %v895_v6 = vld [vmem:[%s1120_s1 + $0x10] sm:$0xff]  }
   0x3   :  { %776 = vmatpush3.bf16.msra.mxu0 %v890_v0  ;;  %v898_v4 = vld [vmem:[%s1119_s0] sm:$0xff]   ;;  %v906_v7 = vld [vmem:[%s1122_s3 + $0x38] sm:$0xff]   ;;  %v907_v8 = vld [vmem:[%s1122_s3 + $0x30] sm:$0xff]  }
   0x4   :  { %777 = vmatprep.subr.bf16.mxu0 %v891_v1  ;;  %791 = vmatprep.mubr.bf16.mxu0 %v898_v4  ;;  %v896_v9 = vld [vmem:[%s1120_s1 + $0x8] sm:$0xff]   ;;  %v897_v11 = vld [vmem:[%s1120_s1] sm:$0xff]   ;;  %v910_v13 = vld [vmem:[%s1122_s3 + $0x18] sm:$0xff]  }
   0x5   :  { %807 = vmatprep.subr.bf16.mxu1 %v906_v7  ;;  %v908_v10 = vld [vmem:[%s1122_s3 + $0x28] sm:$0xff]   ;;  %v909_v12 = vld [vmem:[%s1122_s3 + $0x20] sm:$0xff]  }
   0x6   :  { %808 = vmatpush3.bf16.msra.mxu1 %v906_v7 }
   0x7   :  { %778 = vmatpush3.bf16.msra.mxu0 %v891_v1  ;;  %809 = vmatprep.subr.bf16.mxu1 %v907_v8 }
   0x8   :  { %779 = vmatprep.subr.bf16.mxu0 %v892_v2 }
   0xa   :  { %810 = vmatpush3.bf16.msra.mxu1 %v907_v8 }
   0xb   :  { %780 = vmatpush3.bf16.msra.mxu0 %v892_v2  ;;  %811 = vmatprep.subr.bf16.mxu1 %v908_v10 }
   0xc   :  { %781 = vmatprep.subr.bf16.mxu0 %v893_v3 }
   0xe   :  { %812 = vmatpush3.bf16.msra.mxu1 %v908_v10 }
   0xf   :  { %782 = vmatpush3.bf16.msra.mxu0 %v893_v3  ;;  %813 = vmatprep.subr.bf16.mxu1 %v909_v12 }
  0x10   :  { %783 = vmatprep.subr.bf16.mxu0 %v894_v5 }
  0x13   :  { %784 = vmatpush3.bf16.msra.mxu0 %v894_v5 }
  0x14   :  { %785 = vmatprep.subr.bf16.mxu0 %v895_v6 }
  0x17   :  { %786 = vmatpush3.bf16.msra.mxu0 %v895_v6 }
  0x18   :  { %787 = vmatprep.subr.bf16.mxu0 %v896_v9 }
  0x1b   :  { %788 = vmatpush3.bf16.msra.mxu0 %v896_v9 }
  0x1c   :  { %789 = vmatprep.subr.bf16.mxu0 %v897_v11 }
  0x1d   :  { %12 = vsyncpa [#allocation3], 0  ;;  %v899_v14 = vld [vmem:[%s1119_s0 + $0x8] sm:$0xff]   ;;  %v900_v15 = vld [vmem:[%s1119_s0 + $0x10] sm:$0xff]   ;;  %814 = vmatpush3.bf16.msra.mxu1 %v909_v12 }
  0x1e   :  { %815 = vmatprep.subr.bf16.mxu1 %v910_v13  ;;  %v901_v16 = vld [vmem:[%s1119_s0 + $0x18] sm:$0xff]   ;;  %v902_v17 = vld [vmem:[%s1119_s0 + $0x20] sm:$0xff]   ;;  %v903_v18 = vld [vmem:[%s1119_s0 + $0x28] sm:$0xff]  }
  0x1f   :  { %790 = vmatpush3.bf16.msra.mxu0 %v897_v11  ;;  %v904_v19 = vld [vmem:[%s1119_s0 + $0x30] sm:$0xff]   ;;  %v905_v20 = vld [vmem:[%s1119_s0 + $0x38] sm:$0xff]   ;;  %v912_v22 = vld [vmem:[%s1122_s3 + $0x8] sm:$0xff]  }
  0x20   :  { %v911_v21 = vld [vmem:[%s1122_s3 + $0x10] sm:$0xff]   ;;  %v913_v23 = vld [vmem:[%s1122_s3] sm:$0xff]   ;;  %v914_v24 = vld [vmem:[%s1124_s5 + $0x38] sm:$0xff]  }
  0x21   :  { %816 = vmatpush3.bf16.msra.mxu1 %v910_v13  ;;  %v915_v25 = vld [vmem:[%s1124_s5 + $0x30] sm:$0xff]   ;;  %839 = vmatprep.subr.bf16.mxu0 %v914_v24  ;;  %v916_v26 = vld [vmem:[%s1124_s5 + $0x28] sm:$0xff]   ;;  %v917_v27 = vld [vmem:[%s1124_s5 + $0x20] sm:$0xff]  }
  0x22   :  { %792 = vmatmul.mubr.bf16.vlgmr.msra.gmra.mxu0 %v899_v14  ;;  %817 = vmatprep.subr.bf16.mxu1 %v911_v21  ;;  %v1074_v28 = vld [vmem:[%s1124_s5 + $0x18] sm:$0xff]   ;;  %v692_v31 = vld [vmem:[%s1121_s2] ss:$0 sm:$0xff] }
  0x23   :  { %795 = vmatprep.mubr.bf16.mxu0 %v900_v15  ;;  %840 = vmatpush3.bf16.msra.mxu0 %v914_v24 }
  0x24   :  { %841 = vmatprep.subr.bf16.mxu0 %v915_v25 }
  0x25   :  { %818 = vmatpush3.bf16.msra.mxu1 %v911_v21 }
  0x26   :  { %819 = vmatprep.subr.bf16.mxu1 %v912_v22 }
  0x27   :  { %842 = vmatpush3.bf16.msra.mxu0 %v915_v25 }
  0x28   :  { %843 = vmatprep.subr.bf16.mxu0 %v916_v26 }
  0x29   :  { %820 = vmatpush3.bf16.msra.mxu1 %v912_v22  ;;  %v919_v22 = vld [vmem:[%s1124_s5 + $0x10] sm:$0xff]  }
  0x2a   :  { %796 = vmatmul.mubr.bf16.gmra.mxu0 %v901_v16  ;;  %821 = vmatprep.subr.bf16.mxu1 %v913_v23 }
  0x2b   :  { %799 = vmatprep.mubr.bf16.mxu0 %v902_v17  ;;  %844 = vmatpush3.bf16.msra.mxu0 %v916_v26 }
  0x2c   :  { %845 = vmatprep.subr.bf16.mxu0 %v917_v27 }
  0x2d   :  { %822 = vmatpush3.bf16.msra.mxu1 %v913_v23  ;;  %v920_v23 = vld [vmem:[%s1124_s5 + $0x8] sm:$0xff]  }
  0x2e   :  { %871 = vmatprep.subr.bf16.mxu1 %v914_v24 }
  0x2f   :  { %846 = vmatpush3.bf16.msra.mxu0 %v917_v27 }
  0x30   :  { %847 = vmatprep.subr.bf16.mxu0 %v1074_v28 }
  0x32   :  { %800 = vmatmul.mubr.bf16.gmra.mxu0 %v903_v18 }
  0x33   :  { %803 = vmatprep.mubr.bf16.mxu0 %v904_v19  ;;  %848 = vmatpush3.bf16.msra.mxu0 %v1074_v28 }
  0x34   :  { %849 = vmatprep.subr.bf16.mxu0 %v919_v22 }
  0x37   :  { %850 = vmatpush3.bf16.msra.mxu0 %v919_v22 }
  0x38   :  { %851 = vmatprep.subr.bf16.mxu0 %v920_v23 }
  0x3a   :  { %804 = vmatmul.mubr.bf16.gmra.mxu0 %v905_v20 }
  0x3b   :  { %852 = vmatpush3.bf16.msra.mxu0 %v920_v23 }
  0xe2   :  { %v793_v29 = vpop.f32.mrf.mxu0 }
  0xe3   :  { %v206_v35 = vadd.f32 %v793_v29, %v692_v31 }
  0xe4   :  { %v197_v30 = vpop.f32.mrf.mxu0 }
  0xe5   :  { %v198_v33 = vadd.f32 %v692_v31, %v197_v30  ;;  %v262_v42 = vmax.f32 %v206_v35, 0.0 }
  0xe6   :  { %v794_v32 = vpop.f32.mrf.mxu0 }
  0xe7   :  { %v209_v34 = vadd.f32 %v794_v32, %v692_v31  ;;  %v260_v40 = vmax.f32 %v198_v33, 0.0 }
  0xe8   :  { %v200_v36 = vpop.f32.mrf.mxu0 }
  0xe9   :  { %v201_v37 = vadd.f32 %v692_v31, %v200_v36  ;;  %v263_v38 = vmax.f32 %v209_v34, 0.0 }
  0xea   :  { %v797_v39 = vpop.f32.mrf.mxu0 }
  0xeb   :  { %v261_v41 = vmax.f32 %v201_v37, 0.0  ;;  %v277_v45 = vpack.c.bf16 %v263_v38, %v262_v42  ;;  %v222_v49 = vadd.f32 %v797_v39, %v692_v31 }
  0xec   :  { %v213_v43 = vpop.f32.mrf.mxu0 }
  0xed   :  { %v276_v44 = vpack.c.bf16 %v261_v41, %v260_v40  ;;  %v214_v47 = vadd.f32 %v692_v31, %v213_v43  ;;  %v266_v56 = vmax.f32 %v222_v49, 0.0 }
  0xee   :  { %v798_v46 = vpop.f32.mrf.mxu0 }
  0xef   :  { %v225_v48 = vadd.f32 %v798_v46, %v692_v31  ;;  %823 = vmatprep.mubr.bf16.mxu1 %v276_v44  ;;  %v264_v54 = vmax.f32 %v214_v47, 0.0 }
  0xf0   :  { %v216_v50 = vpop.f32.mrf.mxu0  ;;  %824 = vmatmul.mubr.bf16.vlgmr.msra.gmra.mxu1 %v277_v45 }
  0xf1   :  { %v217_v51 = vadd.f32 %v692_v31, %v216_v50  ;;  %879 = vmatpush3.bf16.msra.mxu1 %v914_v24  ;;  %v267_v52 = vmax.f32 %v225_v48, 0.0  ;;  %v921_v24 = vld [vmem:[%s1124_s5] sm:$0xff]  }
  0xf2   :  { %v801_v53 = vpop.f32.mrf.mxu0  ;;  %872 = vmatprep.subr.bf16.mxu1 %v915_v25  ;;  %853 = vmatprep.subr.bf16.mxu0 %v921_v24 }
  0xf3   :  { %v265_v55 = vmax.f32 %v217_v51, 0.0  ;;  %v279_v59 = vpack.c.bf16 %v267_v52, %v266_v56  ;;  %v238_v63 = vadd.f32 %v801_v53, %v692_v31  ;;  %854 = vmatpush3.bf16.msra.mxu0 %v921_v24 }
  0xf4   :  { %v229_v57 = vpop.f32.mrf.mxu0 }
  0xf5   :  { %v278_v58 = vpack.c.bf16 %v265_v55, %v264_v54  ;;  %880 = vmatpush3.bf16.msra.mxu1 %v915_v25  ;;  %v230_v61 = vadd.f32 %v692_v31, %v229_v57  ;;  %v270_v6 = vmax.f32 %v238_v63, 0.0 }
  0xf6   :  { %v802_v60 = vpop.f32.mrf.mxu0  ;;  %873 = vmatprep.subr.bf16.mxu1 %v916_v26 }
  0xf7   :  { %v241_v62 = vadd.f32 %v802_v60, %v692_v31  ;;  %827 = vmatprep.mubr.bf16.mxu1 %v278_v58  ;;  %v268_v4 = vmax.f32 %v230_v61, 0.0 }
  0xf8   :  { %v232_v0 = vpop.f32.mrf.mxu0  ;;  %828 = vmatmul.mubr.bf16.gmra.mxu1 %v279_v59 }
  0xf9   :  { %v233_v1 = vadd.f32 %v692_v31, %v232_v0  ;;  %881 = vmatpush3.bf16.msra.mxu1 %v916_v26  ;;  %v271_v2 = vmax.f32 %v241_v62, 0.0 }
  0xfa   :  { %v805_v3 = vpop.f32.mrf.mxu0  ;;  %874 = vmatprep.subr.bf16.mxu1 %v917_v27 }
  0xfb   :  { %v269_v5 = vmax.f32 %v233_v1, 0.0  ;;  %v281_v9 = vpack.c.bf16 %v271_v2, %v270_v6  ;;  %v254_v13 = vadd.f32 %v805_v3, %v692_v31 }
  0xfc   :  { %v245_v7 = vpop.f32.mrf.mxu0 }
  0xfd   :  { %v280_v8 = vpack.c.bf16 %v269_v5, %v268_v4  ;;  %882 = vmatpush3.bf16.msra.mxu1 %v917_v27  ;;  %v246_v11 = vadd.f32 %v692_v31, %v245_v7  ;;  %v274_v19 = vmax.f32 %v254_v13, 0.0  ;;  %v709_v27 = vld [vmem:[%s1123_s4] ss:$0 sm:$0xff] }
  0xfe   :  { %v806_v10 = vpop.f32.mrf.mxu0  ;;  %875 = vmatprep.subr.bf16.mxu1 %v1074_v28 }
  0xff   :  { %v257_v12 = vadd.f32 %v806_v10, %v692_v31  ;;  %831 = vmatprep.mubr.bf16.mxu1 %v280_v8  ;;  %v272_v17 = vmax.f32 %v246_v11, 0.0 }
 0x100   :  { %v248_v14 = vpop.f32.mrf.mxu0  ;;  %832 = vmatmul.mubr.bf16.gmra.mxu1 %v281_v9 }
 0x101   :  { %v249_v15 = vadd.f32 %v692_v31, %v248_v14  ;;  %883 = vmatpush3.bf16.msra.mxu1 %v1074_v28  ;;  %v275_v16 = vmax.f32 %v257_v12, 0.0 }
 0x102   :  { %876 = vmatprep.subr.bf16.mxu1 %v919_v22 }
 0x103   :  { %v273_v18 = vmax.f32 %v249_v15, 0.0  ;;  %v283_v21 = vpack.c.bf16 %v275_v16, %v274_v19 }
 0x105   :  { %v282_v20 = vpack.c.bf16 %v273_v18, %v272_v17  ;;  %884 = vmatpush3.bf16.msra.mxu1 %v919_v22  ;;  %v1098_v18 = vld [vmem:[%s1125_s6] ss:$0 sm:$0xff]  ;;  %s944_s6 = smov [#allocation2]  }
 0x106   :  { %877 = vmatprep.subr.bf16.mxu1 %v920_v23  ;;  %s681_s18 = sshll.u32 %s944_s6, 4  ;;  %s682_s18 = int_to_ptr.vmem [resolvable:$true] %s681_s18 }
 0x107   :  { %835 = vmatprep.mubr.bf16.mxu1 %v282_v20  ;;  %s922_s19 = scalar_lea.vmem %s682_s18, 2048  ;;  %p927_p1 = scmp.lt.s32.totalorder %s682_s18, %s682_s18 }
 0x108   :  { %836 = vmatmul.mubr.bf16.gmra.mxu1 %v283_v21  ;;  %p923_p0 = scmp.ne.s32.totalorder %s682_s18, %s922_s19  ;;  %p928_p2 = scmp.lt.s32.totalorder %s922_s19, %s922_s19 }
 0x109   :  { %885 = vmatpush3.bf16.msra.mxu1 %v920_v23 }
 0x10a   :  { %878 = vmatprep.subr.bf16.mxu1 %v921_v24  ;;  %p929_p3 = por %p928_p2, %p927_p1 }
 0x10c   :  { %p930_p4 = pnand %p929_p3, %p923_p0 }
 0x10d   :  { %886 = vmatpush3.bf16.msra.mxu1 %v921_v24 }
 0x1b0   :  { %v825_v25 = vpop.f32.mrf.mxu1 }
 0x1b1   :  { %v398_v31 = vadd.f32 %v825_v25, %v709_v27 }
 0x1b2   :  { %v389_v26 = vpop.f32.mrf.mxu1 }
 0x1b3   :  { %v390_v29 = vadd.f32 %v709_v27, %v389_v26  ;;  %v454_v38 = vmax.f32 %v398_v31, 0.0 }
 0x1b4   :  { %v826_v28 = vpop.f32.mrf.mxu1 }
 0x1b5   :  { %v401_v30 = vadd.f32 %v826_v28, %v709_v27  ;;  %v452_v36 = vmax.f32 %v390_v29, 0.0 }
 0x1b6   :  { %v392_v32 = vpop.f32.mrf.mxu1 }
 0x1b7   :  { %v393_v33 = vadd.f32 %v709_v27, %v392_v32  ;;  %v455_v34 = vmax.f32 %v401_v30, 0.0 }
 0x1b8   :  { %v829_v35 = vpop.f32.mrf.mxu1 }
 0x1b9   :  { %v453_v37 = vmax.f32 %v393_v33, 0.0  ;;  %v469_v41 = vpack.c.bf16 %v455_v34, %v454_v38  ;;  %v414_v45 = vadd.f32 %v829_v35, %v709_v27 }
 0x1ba   :  { %v405_v39 = vpop.f32.mrf.mxu1 }
 0x1bb   :  { %v468_v40 = vpack.c.bf16 %v453_v37, %v452_v36  ;;  %v406_v43 = vadd.f32 %v709_v27, %v405_v39  ;;  %v458_v52 = vmax.f32 %v414_v45, 0.0 }
 0x1bc   :  { %v830_v42 = vpop.f32.mrf.mxu1 }
 0x1bd   :  { %v417_v44 = vadd.f32 %v830_v42, %v709_v27  ;;  %855 = vmatprep.mubr.bf16.mxu0 %v468_v40  ;;  %v456_v50 = vmax.f32 %v406_v43, 0.0 }
 0x1be   :  { %v408_v46 = vpop.f32.mrf.mxu1  ;;  %856 = vmatmul.mubr.bf16.vlgmr.msra.gmra.mxu0 %v469_v41 }
 0x1bf   :  { %v409_v47 = vadd.f32 %v709_v27, %v408_v46  ;;  %v459_v48 = vmax.f32 %v417_v44, 0.0 }
 0x1c0   :  { %v833_v49 = vpop.f32.mrf.mxu1 }
 0x1c1   :  { %v457_v51 = vmax.f32 %v409_v47, 0.0  ;;  %v471_v55 = vpack.c.bf16 %v459_v48, %v458_v52  ;;  %v430_v59 = vadd.f32 %v833_v49, %v709_v27 }
 0x1c2   :  { %v421_v53 = vpop.f32.mrf.mxu1 }
 0x1c3   :  { %v470_v54 = vpack.c.bf16 %v457_v51, %v456_v50  ;;  %v422_v57 = vadd.f32 %v709_v27, %v421_v53  ;;  %v462_v2 = vmax.f32 %v430_v59, 0.0 }
 0x1c4   :  { %v834_v56 = vpop.f32.mrf.mxu1 }
 0x1c5   :  { %v433_v58 = vadd.f32 %v834_v56, %v709_v27  ;;  %859 = vmatprep.mubr.bf16.mxu0 %v470_v54  ;;  %v460_v0 = vmax.f32 %v422_v57, 0.0 }
 0x1c6   :  { %v424_v60 = vpop.f32.mrf.mxu1  ;;  %860 = vmatmul.mubr.bf16.gmra.mxu0 %v471_v55 }
 0x1c7   :  { %v425_v61 = vadd.f32 %v709_v27, %v424_v60  ;;  %v463_v62 = vmax.f32 %v433_v58, 0.0 }
 0x1c8   :  { %v837_v63 = vpop.f32.mrf.mxu1 }
 0x1c9   :  { %v461_v1 = vmax.f32 %v425_v61, 0.0  ;;  %v473_v5 = vpack.c.bf16 %v463_v62, %v462_v2  ;;  %v446_v9 = vadd.f32 %v837_v63, %v709_v27 }
 0x1ca   :  { %v437_v3 = vpop.f32.mrf.mxu1 }
 0x1cb   :  { %v472_v4 = vpack.c.bf16 %v461_v1, %v460_v0  ;;  %v438_v7 = vadd.f32 %v709_v27, %v437_v3  ;;  %v466_v15 = vmax.f32 %v446_v9, 0.0 }
 0x1cc   :  { %v838_v6 = vpop.f32.mrf.mxu1 }
 0x1cd   :  { %v449_v8 = vadd.f32 %v838_v6, %v709_v27  ;;  %863 = vmatprep.mubr.bf16.mxu1 %v472_v4  ;;  %v464_v13 = vmax.f32 %v438_v7, 0.0 }
 0x1ce   :  { %v440_v10 = vpop.f32.mrf.mxu1  ;;  %864 = vmatmul.mubr.bf16.vlgmr.msra.gmra.mxu1 %v473_v5 }
 0x1cf   :  { %v441_v11 = vadd.f32 %v709_v27, %v440_v10  ;;  %v467_v12 = vmax.f32 %v449_v8, 0.0 }
 0x1d1   :  { %v465_v14 = vmax.f32 %v441_v11, 0.0  ;;  %v475_v17 = vpack.c.bf16 %v467_v12, %v466_v15 }
 0x1d3   :  { %v474_v16 = vpack.c.bf16 %v465_v14, %v464_v13 }
 0x1d5   :  { %867 = vmatprep.mubr.bf16.mxu1 %v474_v16 }
 0x1d6   :  { %868 = vmatmul.mubr.bf16.gmra.mxu1 %v475_v17 }
 0x27e   :  { %v857_v19 = vpop.f32.mrf.mxu0 }
 0x27f   :  { %v590_v20 = vadd.f32 %v857_v19, %v1098_v18 }
 0x280   :  { %v581_v21 = vpop.f32.mrf.mxu0 }
 0x281   :  { %v646_v22 = vmax.f32 %v590_v20, 0.0  ;;  %v582_v23 = vadd.f32 %v1098_v18, %v581_v21 }
 0x282   :  { %v858_v24 = vpop.f32.mrf.mxu0 }
 0x283   :  { %662 = vst [vmem:[#allocation2 + $0x10] sm:$0xff] %v646_v22  ;;  %v644_v25 = vmax.f32 %v582_v23, 0.0  ;;  %v593_v26 = vadd.f32 %v858_v24, %v1098_v18 }
 0x284   :  { %v584_v27 = vpop.f32.mrf.mxu0 }
 0x285   :  { %660 = vst [vmem:[#allocation2] sm:$0xff] %v644_v25  ;;  %v647_v28 = vmax.f32 %v593_v26, 0.0  ;;  %v585_v29 = vadd.f32 %v1098_v18, %v584_v27 }
 0x286   :  { %v861_v30 = vpop.f32.mrf.mxu0 }
 0x287   :  { %663 = vst [vmem:[#allocation2 + $0x18] sm:$0xff] %v647_v28  ;;  %v645_v31 = vmax.f32 %v585_v29, 0.0  ;;  %v606_v32 = vadd.f32 %v861_v30, %v1098_v18 }
 0x288   :  { %v597_v33 = vpop.f32.mrf.mxu0 }
 0x289   :  { %661 = vst [vmem:[#allocation2 + $0x8] sm:$0xff] %v645_v31  ;;  %v650_v34 = vmax.f32 %v606_v32, 0.0  ;;  %v598_v35 = vadd.f32 %v1098_v18, %v597_v33 }
 0x28a   :  { %v862_v36 = vpop.f32.mrf.mxu0 }
 0x28b   :  { %666 = vst [vmem:[#allocation2 + $0x30] sm:$0xff] %v650_v34  ;;  %v648_v37 = vmax.f32 %v598_v35, 0.0  ;;  %v609_v38 = vadd.f32 %v862_v36, %v1098_v18 }
 0x28c   :  { %v600_v39 = vpop.f32.mrf.mxu0 }
 0x28d   :  { %664 = vst [vmem:[#allocation2 + $0x20] sm:$0xff] %v648_v37  ;;  %v651_v40 = vmax.f32 %v609_v38, 0.0  ;;  %v601_v41 = vadd.f32 %v1098_v18, %v600_v39 }
 0x28e   :  { %v865_v42 = vpop.f32.mrf.mxu1 }
 0x28f   :  { %667 = vst [vmem:[#allocation2 + $0x38] sm:$0xff] %v651_v40  ;;  %v649_v43 = vmax.f32 %v601_v41, 0.0  ;;  %v622_v44 = vadd.f32 %v865_v42, %v1098_v18 }
 0x290   :  { %v613_v45 = vpop.f32.mrf.mxu1 }
 0x291   :  { %665 = vst [vmem:[#allocation2 + $0x28] sm:$0xff] %v649_v43  ;;  %v654_v46 = vmax.f32 %v622_v44, 0.0  ;;  %v614_v47 = vadd.f32 %v1098_v18, %v613_v45 }
 0x292   :  { %v866_v48 = vpop.f32.mrf.mxu1 }
 0x293   :  { %670 = vst [vmem:[#allocation2 + $0x50] sm:$0xff] %v654_v46  ;;  %v652_v49 = vmax.f32 %v614_v47, 0.0  ;;  %v625_v50 = vadd.f32 %v866_v48, %v1098_v18 }
 0x294   :  { %v616_v51 = vpop.f32.mrf.mxu1 }
 0x295   :  { %668 = vst [vmem:[#allocation2 + $0x40] sm:$0xff] %v652_v49  ;;  %v655_v52 = vmax.f32 %v625_v50, 0.0  ;;  %v617_v53 = vadd.f32 %v1098_v18, %v616_v51 }
 0x296   :  { %v869_v54 = vpop.f32.mrf.mxu1 }
 0x297   :  { %671 = vst [vmem:[#allocation2 + $0x58] sm:$0xff] %v655_v52  ;;  %v653_v55 = vmax.f32 %v617_v53, 0.0  ;;  %v638_v56 = vadd.f32 %v869_v54, %v1098_v18 }
 0x298   :  { %v629_v57 = vpop.f32.mrf.mxu1 }
 0x299   :  { %669 = vst [vmem:[#allocation2 + $0x48] sm:$0xff] %v653_v55  ;;  %v658_v58 = vmax.f32 %v638_v56, 0.0  ;;  %v630_v59 = vadd.f32 %v1098_v18, %v629_v57 }
 0x29a   :  { %v870_v60 = vpop.f32.mrf.mxu1 }
 0x29b   :  { %674 = vst [vmem:[#allocation2 + $0x70] sm:$0xff] %v658_v58  ;;  %v656_v61 = vmax.f32 %v630_v59, 0.0  ;;  %v641_v62 = vadd.f32 %v870_v60, %v1098_v18 }
 0x29c   :  { %v632_v63 = vpop.f32.mrf.mxu1 }
 0x29d   :  { %672 = vst [vmem:[#allocation2 + $0x60] sm:$0xff] %v656_v61  ;;  %v659_v0 = vmax.f32 %v641_v62, 0.0  ;;  %v633_v1 = vadd.f32 %v1098_v18, %v632_v63 }
 0x29f   :  { %675 = vst [vmem:[#allocation2 + $0x78] sm:$0xff] %v659_v0  ;;  %v657_v2 = vmax.f32 %v633_v1, 0.0 }
 0x2a1   :  { %673 = vst [vmem:[#allocation2 + $0x68] sm:$0xff] %v657_v2 }
 0x2a2   :  { %933 = shalt.err (!%p930_p4)
}
 0x2a3   :  { %s945_s20 = smov 128   ;;  %s946_s21 = smov 8  }
 0x2a4   :  { %687 = dma.vmem_to_hbm [thread:$0]  %s682_s18, 2048, %s1126_s7, [#allocation3], %s945_s20, %s945_s20, %s946_s21  }
 0x2a5   :  { %942 = dma.done.wait [#allocation3], 2048  }
 0x2a6   :  { %943 = vsyncadd [#allocation3], 4294965248 }
 0x2a7   :  { %691 = vsyncpa [#allocation3], 1 }

</bundles_post_ra>
